<compile_context>
chip_gen: v6e
topology: v6e:2x2x1
jax: 0.10.0
libtpu: 0.0.40
codegen_flags: <defaults>
</compile_context>

<pallas_src>
import jax
import jax.numpy as jnp
from jax import lax
from jax.experimental import pallas as pl
from jax.experimental.pallas import tpu as pltpu

PROJ = 256        # proj_size in Matcher.__init__
N_SCALES = 3
LRELU_SLOPE = 0.2
SL1_BETA = 0.1


def _round_up(x, m):
    return (x + m - 1) // m * m


# ----------------------------------------------------------------------------
# Fused Pallas kernel: one pixel tile of one scale
#   proj_A (LeakyReLU + Conv1x1) -> L2 normalize -> barlow gram ->
#   smooth_l1 partial sum (masked to un-padded pixels)
# ----------------------------------------------------------------------------
def _matcher_kernel(scale_ids_ref, valid_ref,          # scalar prefetch (SMEM)
                    fake_ref, ins_ref, w_ref, b_ref,   # inputs (VMEM)
                    match_ref, loss_ref):              # outputs (VMEM)
    p = pl.program_id(0)

    fake = fake_ref[...]                # (N, tp, C) f32
    ins = ins_ref[...]                  # (N, tp, C) f32
    N, tp, C = fake.shape

    # ---- proj_A: LeakyReLU(0.2) then equal-lr Conv1x1 (MXU, bf16 in / f32 acc) ----
    a = jnp.where(fake > 0, fake, LRELU_SLOPE * fake)
    a2 = a.reshape(N * tp, C).astype(jnp.bfloat16)
    w = w_ref[0]                        # (C, C) bf16, already gain-scaled
    b = b_ref[0]                        # (1, C) f32
    f1 = jnp.dot(a2, w, preferred_element_type=jnp.float32) + b
    f1 = f1.reshape(N, tp, C)
    f2 = ins                            # proj_B = Identity

    # ---- F.normalize(dim=C), eps=1e-12, via EUP rsqrt (no sqrt + divide chain) ----
    def l2n(x):
        ss = jnp.sum(x * x, axis=-1, keepdims=True)
        return x * lax.rsqrt(jnp.maximum(ss, 1e-24))

    f1n = l2n(f1)
    f2n = l2n(f2)

    # valid-pixel mask: the padded tail of a scale must not contribute to the loss
    pix = lax.broadcasted_iota(jnp.int32, (1, tp), 1)
    mask = (pix < valid_ref[p]).astype(jnp.float32)            # (1, tp)

    # ---- barlow + smooth_l1, unrolled over the (small, static) batch dim ----
    # out[i, j, pixel] = <f1n[i, pixel, :], f2n[j, pixel, :]>
    row_idx = lax.broadcasted_iota(jnp.int32, (N, 1), 0)       # hoisted eye builder
    loss_vec = jnp.zeros((N, tp), jnp.float32)
    for i in range(N):
        row = jnp.sum(f1n[i][None, :, :] * f2n, axis=-1)        # (N, tp)
        match_ref[i] = row.astype(match_ref.dtype)
        tgt = (row_idx == i).astype(jnp.float32)                 # (N, 1) eye column
        d = row - tgt
        ad = jnp.abs(d)
        loss_vec = loss_vec + jnp.where(ad < SL1_BETA,
                                        0.5 * d * d / SL1_BETA,
                                        ad - 0.5 * SL1_BETA)

    # single masked cross-lane reduce per tile; per-tile partial loss output keeps
    # the grid free of a resident accumulator -> stays 'parallel'
    loss_ref[...] = jnp.zeros_like(loss_ref) + jnp.sum(loss_vec * mask)


# ----------------------------------------------------------------------------
# Wrapper: pad/concat all scales into one lane-dense pixel axis, one kernel launch
# ----------------------------------------------------------------------------
def _pick_tile(hw_list, n, c):
    # Lane-dense tile sized from the smallest scale (minimizes padded work at small
    # resolutions) and capped so each (N, tp, C) f32 input block stays ~<= 4 MiB:
    # 2 inputs x 2 pipeline buffers x 4 MiB = 16 MiB, well under the default
    # scoped-VMEM limit (32 MiB on v6e/v7x, 16 MiB on v5e physical 128 MiB).
    vmem_cap = max(128, ((4 << 20) // (n * c * 4)) // 128 * 128)
    tp = _round_up(min(hw_list), 128)
    return int(min(tp, vmem_cap, 1024))


def matcher_scales_fused(fake_feats, ins_feats, w_stack, b_stack):
    """fake_feats / ins_feats: per-scale lists of (N, HW_s, C) f32 features.
    w_stack: (S, C, C) bf16 (Cin x Cout, gain-scaled).  b_stack: (S, 1, C) f32.
    Returns (matches (N, N, sum HW_s), scalar loss = sum of per-scale means)."""
    N, _, C = fake_feats[0].shape
    hw_list = [f.shape[1] for f in fake_feats]
    tp = _pick_tile(hw_list, N, C)
    hw_pad = [_round_up(hw, tp) for hw in hw_list]

    def pad_cat(feats):
        return jnp.concatenate(
            [jnp.pad(f, ((0, 0), (0, hp - hw), (0, 0)))
             for f, hw, hp in zip(feats, hw_list, hw_pad)], axis=1)

    fake_cat = pad_cat(fake_feats)
    ins_cat = pad_cat(ins_feats)
    hw_total = fake_cat.shape[1]
    num_tiles = hw_total // tp

    # per-tile scale id (selects Conv1x1 weights) and valid-pixel count
    scale_ids, valid = [], []
    for s, (hw, hp) in enumerate(zip(hw_list, hw_pad)):
        for t in range(hp // tp):
            scale_ids.append(s)
            valid.append(max(0, min(tp, hw - t * tp)))
    scale_ids = jnp.asarray(scale_ids, jnp.int32)
    valid = jnp.asarray(valid, jnp.int32)

    matches_pad, loss_parts = pl.pallas_call(
        _matcher_kernel,
        out_shape=(
            jax.ShapeDtypeStruct((N, N, hw_total), jnp.float32),
            jax.ShapeDtypeStruct((num_tiles, 1, 1), jnp.float32),
        ),
        grid_spec=pltpu.PrefetchScalarGridSpec(
            num_scalar_prefetch=2,
            grid=(num_tiles,),
            in_specs=[
                pl.BlockSpec((N, tp, C), lambda p, sid, vld: (0, p, 0)),
                pl.BlockSpec((N, tp, C), lambda p, sid, vld: (0, p, 0)),
                pl.BlockSpec((1, C, C), lambda p, sid, vld: (sid[p], 0, 0)),
                pl.BlockSpec((1, 1, C), lambda p, sid, vld: (sid[p], 0, 0)),
            ],
            out_specs=[
                pl.BlockSpec((N, N, tp), lambda p, sid, vld: (0, 0, p)),
                pl.BlockSpec((1, 1, 1), lambda p, sid, vld: (p, 0, 0)),
            ],
        ),
        compiler_params=pltpu.CompilerParams(
            dimension_semantics=("parallel",),   # tiles independent -> both v7x TCs
        ),
    )(scale_ids, valid, fake_cat, ins_cat, w_stack, b_stack)

    # strip the per-scale padding; smooth_l1 'mean' per scale, summed over scales
    segs = []
    total_loss = jnp.float32(0.0)
    off, t_off = 0, 0
    for hw, hp in zip(hw_list, hw_pad):
        segs.append(matches_pad[:, :, off:off + hw])
        nt = hp // tp
        total_loss = total_loss + jnp.sum(loss_parts[t_off:t_off + nt]) / (N * N * hw)
        off += hp
        t_off += nt
    return jnp.concatenate(segs, axis=2), total_loss


# ----------------------------------------------------------------------------
# Glue: multi-scale resize, backbone stand-in, parameter setup
# ----------------------------------------------------------------------------
def bilinear_down(x, scale):
    # F.interpolate(scale_factor=1/scale, mode='bilinear', align_corners=False)
    # TODO(synk): jax.image.resize uses half-pixel sampling like PyTorch but edge
    # behavior may differ marginally from F.interpolate.
    if scale == 1:
        return x
    n, c, h, w = x.shape
    return jax.image.resize(
        x, (n, c, h // scale, w // scale), method="bilinear", antialias=False)


def make_params(key, in_channels):
    params = []
    for _ in range(N_SCALES):
        key, kb, kw = jax.random.split(key, 3)
        # TODO(synk): patch34().remove_batchnorm().to_equal_lr() backbone is external
        # to the snippet; a deterministic 1x1 conv to proj_size channels stands in.
        wb = jax.random.normal(kb, (PROJ, in_channels), jnp.float32) * 0.1
        # proj_A Conv1x1: tu.kaiming(..., dynamic=True) -> N(0,1) weights, runtime gain
        wa = jax.random.normal(kw, (PROJ, PROJ), jnp.float32)
        ba = jnp.zeros((PROJ,), jnp.float32)
        params.append((wb, wa, ba))
    return params


@jax.jit
def matcher_forward(fake, ins, params):
    N = fake.shape[0]
    # equal-lr kaiming gain for the LeakyReLU(0.2)-preceded Conv1x1
    # TODO(synk): verify exact torchelie tu.kaiming(dynamic=True) gain convention.
    gain = (2.0 / ((1.0 + LRELU_SLOPE ** 2) * PROJ)) ** 0.5

    # Conv1x1 weights laid out (Cin, Cout), gain pre-applied, stored bf16 (MXU path);
    # biases stay f32.
    w_stack = jnp.stack([(wa * gain).T for (_, wa, _) in params]).astype(jnp.bfloat16)
    b_stack = jnp.stack([ba for (_, _, ba) in params]).reshape(N_SCALES, 1, PROJ)

    fake_feats, ins_feats, labels = [], [], []
    for s in range(N_SCALES):
        scale = 2 ** s
        wb = params[s][0]
        f_s = bilinear_down(fake, scale)
        i_s = bilinear_down(ins, scale)
        # backbone stand-in: 1x1 conv Cin -> PROJ, emitted directly in NHWC layout
        # (no separate XLA transpose before the kernel).
        ff = jnp.einsum("nchw,oc->nhwo", f_s, wb).reshape(N, -1, PROJ)
        fi = jnp.einsum("nchw,oc->nhwo", i_s, wb).reshape(N, -1, PROJ)
        fake_feats.append(ff)
        ins_feats.append(fi)
        labels.append(jnp.broadcast_to(jnp.arange(N)[:, None], (N, ff.shape[1])))

    matches, total_loss = matcher_scales_fused(fake_feats, ins_feats, w_stack, b_stack)
    return {
        "matches": matches,
        "loss": total_loss,
        "labels": jnp.concatenate(labels, axis=1),
    }


if __name__ == "__main__":
    key = jax.random.PRNGKey(0)
    k_params, k_fake, k_ins = jax.random.split(key, 3)

    N, Cin, H, W = 2, 3, 16, 16
    fake = jax.random.normal(k_fake, (N, Cin, H, W), jnp.float32)
    ins = jax.random.normal(k_ins, (N, Cin, H, W), jnp.float32)
    params = make_params(k_params, Cin)

    out = matcher_forward(fake, ins, params)
    out = jax.block_until_ready(out)

    # sanity on output shapes implied by the PyTorch module
    hw_total = sum((H // 2 ** s) * (W // 2 ** s) for s in range(N_SCALES))
    assert out["matches"].shape == (N, N, hw_total)
    assert out["labels"].shape == (N, hw_total)
    assert out["loss"].shape == ()
    assert bool(jnp.isfinite(out["loss"]))

    print("KERNEL_OK")
</pallas_src>

<mosaic_0001>
module attributes {stable_mosaic.version = 11 : i64} {
  func.func @_matcher_kernel(%arg0: i32, %arg1: memref<4xi32, #tpu.memory_space<smem>>, %arg2: memref<4xi32, #tpu.memory_space<smem>>, %arg3: memref<2x128x256xf32, #tpu.memory_space<vmem>>, %arg4: memref<2x128x256xf32, #tpu.memory_space<vmem>>, %arg5: memref<1x256x256xbf16, #tpu.memory_space<vmem>>, %arg6: memref<1x1x256xf32, #tpu.memory_space<vmem>>, %arg7: memref<2x2x128xf32, #tpu.memory_space<vmem>>, %arg8: memref<1x1x1xf32, #tpu.memory_space<vmem>>) attributes {dimension_semantics = [#tpu.dimension_semantics<parallel>], iteration_bounds = array<i64: 4>, scalar_prefetch = 2 : i64, scratch_operands = 0 : i64, tpu.core_type = #tpu.core_type<tc>, window_params = [{transform_indices = @transform_0, window_bounds = array<i64: 2, 128, 256>}, {transform_indices = @transform_1, window_bounds = array<i64: 2, 128, 256>}, {transform_indices = @transform_2, window_bounds = array<i64: 1, 256, 256>}, {transform_indices = @transform_3, window_bounds = array<i64: 1, 1, 256>}, {transform_indices = @transform_4, window_bounds = array<i64: 2, 2, 128>}, {transform_indices = @transform_5, window_bounds = array<i64: 1, 1, 1>}]} {
    %c0 = arith.constant 0 : index
    %c0_0 = arith.constant 0 : index
    %c0_1 = arith.constant 0 : index
    %0 = vector.load %arg3[%c0, %c0_0, %c0_1] : memref<2x128x256xf32, #tpu.memory_space<vmem>>, vector<2x128x256xf32>
    %c0_2 = arith.constant 0 : index
    %c0_3 = arith.constant 0 : index
    %c0_4 = arith.constant 0 : index
    %1 = vector.load %arg4[%c0_2, %c0_3, %c0_4] : memref<2x128x256xf32, #tpu.memory_space<vmem>>, vector<2x128x256xf32>
    %cst = arith.constant 0.000000e+00 : f32
    %2 = vector.broadcast %cst : f32 to vector<2x128x256xf32>
    %3 = arith.cmpf ogt, %0, %2 : vector<2x128x256xf32>
    %cst_5 = arith.constant 2.000000e-01 : f32
    %4 = vector.broadcast %cst_5 : f32 to vector<2x128x256xf32>
    %5 = arith.mulf %4, %0 : vector<2x128x256xf32>
    %6 = arith.select %3, %0, %5 : vector<2x128x256xi1>, vector<2x128x256xf32>
    %7 = vector.shape_cast %6 : vector<2x128x256xf32> to vector<256x256xf32>
    %8 = arith.truncf %7 : vector<256x256xf32> to vector<256x256xbf16>
    %c0_6 = arith.constant 0 : index
    %c0_7 = arith.constant 0 : index
    %c0_8 = arith.constant 0 : index
    %9 = vector.load %arg5[%c0_6, %c0_7, %c0_8] : memref<1x256x256xbf16, #tpu.memory_space<vmem>>, vector<1x256x256xbf16>
    %10 = vector.shape_cast %9 : vector<1x256x256xbf16> to vector<256x256xbf16>
    %c0_9 = arith.constant 0 : index
    %c0_10 = arith.constant 0 : index
    %c0_11 = arith.constant 0 : index
    %11 = vector.load %arg6[%c0_9, %c0_10, %c0_11] : memref<1x1x256xf32, #tpu.memory_space<vmem>>, vector<1x1x256xf32>
    %12 = vector.shape_cast %11 : vector<1x1x256xf32> to vector<1x256xf32>
    %cst_12 = arith.constant dense<0.000000e+00> : vector<256x256xf32>
    %13 = tpu.matmul %8, %10, %cst_12 {dimension_numbers = #tpu.dot_dimension_numbers<[1], [0], [0], [1], [0, 0, 1, 1], [], []>} : vector<256x256xbf16>, vector<256x256xbf16>, vector<256x256xf32> -> vector<256x256xf32>
    %14 = vector.broadcast %12 : vector<1x256xf32> to vector<256x256xf32>
    %15 = arith.addf %13, %14 : vector<256x256xf32>
    %16 = vector.shape_cast %15 : vector<256x256xf32> to vector<2x128x256xf32>
    %17 = arith.mulf %16, %16 : vector<2x128x256xf32>
    %cst_13 = arith.constant dense<0.000000e+00> : vector<2x128xf32>
    %18 = vector.multi_reduction <add>, %17, %cst_13 [2] : vector<2x128x256xf32> to vector<2x128xf32>
    %19 = vector.shape_cast %18 : vector<2x128xf32> to vector<2x128x1xf32>
    %cst_14 = arith.constant 1.000000e-24 : f32
    %20 = vector.broadcast %cst_14 : f32 to vector<2x128x1xf32>
    %21 = arith.maximumf %19, %20 : vector<2x128x1xf32>
    %22 = math.rsqrt %21 : vector<2x128x1xf32>
    %23 = vector.broadcast %22 : vector<2x128x1xf32> to vector<2x128x256xf32>
    %24 = arith.mulf %16, %23 : vector<2x128x256xf32>
    %25 = arith.mulf %1, %1 : vector<2x128x256xf32>
    %cst_15 = arith.constant dense<0.000000e+00> : vector<2x128xf32>
    %26 = vector.multi_reduction <add>, %25, %cst_15 [2] : vector<2x128x256xf32> to vector<2x128xf32>
    %27 = vector.shape_cast %26 : vector<2x128xf32> to vector<2x128x1xf32>
    %cst_16 = arith.constant 1.000000e-24 : f32
    %28 = vector.broadcast %cst_16 : f32 to vector<2x128x1xf32>
    %29 = arith.maximumf %27, %28 : vector<2x128x1xf32>
    %30 = math.rsqrt %29 : vector<2x128x1xf32>
    %31 = vector.broadcast %30 : vector<2x128x1xf32> to vector<2x128x256xf32>
    %32 = arith.mulf %1, %31 : vector<2x128x256xf32>
    %33 = tpu.iota {dimensions = array<i32: 1>} : vector<1x128xi32>
    %34 = arith.index_cast %arg0 : i32 to index
    %35 = memref.load %arg2[%34] : memref<4xi32, #tpu.memory_space<smem>>
    %36 = vector.broadcast %35 : i32 to vector<1x128xi32>
    %37 = arith.cmpi slt, %33, %36 : vector<1x128xi32>
    %38 = arith.extui %37 : vector<1x128xi1> to vector<1x128xi32>
    %39 = arith.sitofp %38 : vector<1x128xi32> to vector<1x128xf32>
    %40 = tpu.iota {dimensions = array<i32: 0>} : vector<2x1xi32>
    %cst_17 = arith.constant 0.000000e+00 : f32
    %41 = vector.broadcast %cst_17 : f32 to vector<2x128xf32>
    %42 = vector.extract_strided_slice %24 {offsets = [0, 0, 0], sizes = [1, 128, 256], strides = [1, 1, 1]} : vector<2x128x256xf32> to vector<1x128x256xf32>
    %43 = vector.shape_cast %42 : vector<1x128x256xf32> to vector<128x256xf32>
    %44 = vector.shape_cast %43 : vector<128x256xf32> to vector<1x128x256xf32>
    %45 = vector.broadcast %44 : vector<1x128x256xf32> to vector<2x128x256xf32>
    %46 = arith.mulf %45, %32 : vector<2x128x256xf32>
    %cst_18 = arith.constant dense<0.000000e+00> : vector<2x128xf32>
    %47 = vector.multi_reduction <add>, %46, %cst_18 [2] : vector<2x128x256xf32> to vector<2x128xf32>
    %c0_19 = arith.constant 0 : index
    %c0_20 = arith.constant 0 : index
    %c0_21 = arith.constant 0 : index
    %48 = vector.load %arg7[%c0_19, %c0_20, %c0_21] : memref<2x2x128xf32, #tpu.memory_space<vmem>>, vector<1x2x128xf32>
    %49 = vector.shape_cast %48 : vector<1x2x128xf32> to vector<2x128xf32>
    %50 = vector.shape_cast %47 : vector<2x128xf32> to vector<1x2x128xf32>
    tpu.vector_store %arg7[%c0_19, %c0_20, %c0_21], %50 {strides = array<i32>} : memref<2x2x128xf32, #tpu.memory_space<vmem>>, vector<1x2x128xf32>,
    %c0_i32 = arith.constant 0 : i32
    %51 = vector.broadcast %c0_i32 : i32 to vector<2x1xi32>
    %52 = arith.cmpi eq, %40, %51 : vector<2x1xi32>
    %53 = arith.extui %52 : vector<2x1xi1> to vector<2x1xi32>
    %54 = arith.sitofp %53 : vector<2x1xi32> to vector<2x1xf32>
    %55 = vector.broadcast %54 : vector<2x1xf32> to vector<2x128xf32>
    %56 = arith.subf %47, %55 : vector<2x128xf32>
    %57 = math.absf %56 : vector<2x128xf32>
    %cst_22 = arith.constant 1.000000e-01 : f32
    %58 = vector.broadcast %cst_22 : f32 to vector<2x128xf32>
    %59 = arith.cmpf olt, %57, %58 : vector<2x128xf32>
    %cst_23 = arith.constant 5.000000e-01 : f32
    %60 = vector.broadcast %cst_23 : f32 to vector<2x128xf32>
    %61 = arith.mulf %60, %56 : vector<2x128xf32>
    %62 = arith.mulf %61, %56 : vector<2x128xf32>
    %cst_24 = arith.constant 1.000000e-01 : f32
    %63 = vector.broadcast %cst_24 : f32 to vector<2x128xf32>
    %64 = arith.divf %62, %63 : vector<2x128xf32>
    %cst_25 = arith.constant 5.000000e-02 : f32
    %65 = vector.broadcast %cst_25 : f32 to vector<2x128xf32>
    %66 = arith.subf %57, %65 : vector<2x128xf32>
    %67 = arith.select %59, %64, %66 : vector<2x128xi1>, vector<2x128xf32>
    %68 = arith.addf %41, %67 : vector<2x128xf32>
    %69 = vector.extract_strided_slice %24 {offsets = [1, 0, 0], sizes = [1, 128, 256], strides = [1, 1, 1]} : vector<2x128x256xf32> to vector<1x128x256xf32>
    %70 = vector.shape_cast %69 : vector<1x128x256xf32> to vector<128x256xf32>
    %71 = vector.shape_cast %70 : vector<128x256xf32> to vector<1x128x256xf32>
    %72 = vector.broadcast %71 : vector<1x128x256xf32> to vector<2x128x256xf32>
    %73 = arith.mulf %72, %32 : vector<2x128x256xf32>
    %cst_26 = arith.constant dense<0.000000e+00> : vector<2x128xf32>
    %74 = vector.multi_reduction <add>, %73, %cst_26 [2] : vector<2x128x256xf32> to vector<2x128xf32>
    %c1 = arith.constant 1 : index
    %c0_27 = arith.constant 0 : index
    %c0_28 = arith.constant 0 : index
    %75 = vector.load %arg7[%c1, %c0_27, %c0_28] : memref<2x2x128xf32, #tpu.memory_space<vmem>>, vector<1x2x128xf32>
    %76 = vector.shape_cast %75 : vector<1x2x128xf32> to vector<2x128xf32>
    %77 = vector.shape_cast %74 : vector<2x128xf32> to vector<1x2x128xf32>
    tpu.vector_store %arg7[%c1, %c0_27, %c0_28], %77 {strides = array<i32>} : memref<2x2x128xf32, #tpu.memory_space<vmem>>, vector<1x2x128xf32>,
    %c1_i32 = arith.constant 1 : i32
    %78 = vector.broadcast %c1_i32 : i32 to vector<2x1xi32>
    %79 = arith.cmpi eq, %40, %78 : vector<2x1xi32>
    %80 = arith.extui %79 : vector<2x1xi1> to vector<2x1xi32>
    %81 = arith.sitofp %80 : vector<2x1xi32> to vector<2x1xf32>
    %82 = vector.broadcast %81 : vector<2x1xf32> to vector<2x128xf32>
    %83 = arith.subf %74, %82 : vector<2x128xf32>
    %84 = math.absf %83 : vector<2x128xf32>
    %cst_29 = arith.constant 1.000000e-01 : f32
    %85 = vector.broadcast %cst_29 : f32 to vector<2x128xf32>
    %86 = arith.cmpf olt, %84, %85 : vector<2x128xf32>
    %cst_30 = arith.constant 5.000000e-01 : f32
    %87 = vector.broadcast %cst_30 : f32 to vector<2x128xf32>
    %88 = arith.mulf %87, %83 : vector<2x128xf32>
    %89 = arith.mulf %88, %83 : vector<2x128xf32>
    %cst_31 = arith.constant 1.000000e-01 : f32
    %90 = vector.broadcast %cst_31 : f32 to vector<2x128xf32>
    %91 = arith.divf %89, %90 : vector<2x128xf32>
    %cst_32 = arith.constant 5.000000e-02 : f32
    %92 = vector.broadcast %cst_32 : f32 to vector<2x128xf32>
    %93 = arith.subf %84, %92 : vector<2x128xf32>
    %94 = arith.select %86, %91, %93 : vector<2x128xi1>, vector<2x128xf32>
    %95 = arith.addf %68, %94 : vector<2x128xf32>
    %cst_33 = arith.constant 0.000000e+00 : f32
    %96 = vector.broadcast %cst_33 : f32 to vector<1x1x1xf32>
    %97 = vector.broadcast %39 : vector<1x128xf32> to vector<2x128xf32>
    %98 = arith.mulf %95, %97 : vector<2x128xf32>
    %99 = vector.shape_cast %98 : vector<2x128xf32> to vector<1x2x128xf32>
    %cst_34 = arith.constant dense<0.000000e+00> : vector<1xf32>
    %100 = vector.multi_reduction <add>, %99, %cst_34 [1, 2] : vector<1x2x128xf32> to vector<1xf32>
    %101 = vector.shape_cast %100 : vector<1xf32> to vector<1x1x1xf32>
    %102 = vector.extract %101[0, 0, 0] : f32 from vector<1x1x1xf32>
    %103 = vector.broadcast %102 : f32 to vector<1x1x1xf32>
    %104 = arith.addf %96, %103 : vector<1x1x1xf32>
    %c0_35 = arith.constant 0 : index
    %c0_36 = arith.constant 0 : index
    %c0_37 = arith.constant 0 : index
    %105 = vector.load %arg8[%c0_35, %c0_36, %c0_37] : memref<1x1x1xf32, #tpu.memory_space<vmem>>, vector<1x1x1xf32>
    tpu.vector_store %arg8[%c0_35, %c0_36, %c0_37], %104 {strides = array<i32>} : memref<1x1x1xf32, #tpu.memory_space<vmem>>, vector<1x1x1xf32>,
    return
  }
  func.func @transform_0(%arg0: i32, %arg1: memref<4xi32, #tpu.memory_space<smem>>, %arg2: memref<4xi32, #tpu.memory_space<smem>>) -> (i32, i32, i32) {
    %c0_i32 = arith.constant 0 : i32
    %c0_i32_0 = arith.constant 0 : i32
    %c0_i32_1 = arith.constant 0 : i32
    return %c0_i32, %arg0, %c0_i32_0 : i32, i32, i32
  }
  func.func @transform_1(%arg0: i32, %arg1: memref<4xi32, #tpu.memory_space<smem>>, %arg2: memref<4xi32, #tpu.memory_space<smem>>) -> (i32, i32, i32) {
    %c0_i32 = arith.constant 0 : i32
    %c0_i32_0 = arith.constant 0 : i32
    %c0_i32_1 = arith.constant 0 : i32
    return %c0_i32, %arg0, %c0_i32_0 : i32, i32, i32
  }
  func.func @transform_2(%arg0: i32, %arg1: memref<4xi32, #tpu.memory_space<smem>>, %arg2: memref<4xi32, #tpu.memory_space<smem>>) -> (i32, i32, i32) {
    %0 = arith.index_cast %arg0 : i32 to index
    %1 = memref.load %arg1[%0] : memref<4xi32, #tpu.memory_space<smem>>
    %c0_i32 = arith.constant 0 : i32
    %c0_i32_0 = arith.constant 0 : i32
    %c0_i32_1 = arith.constant 0 : i32
    return %1, %c0_i32, %c0_i32_0 : i32, i32, i32
  }
  func.func @transform_3(%arg0: i32, %arg1: memref<4xi32, #tpu.memory_space<smem>>, %arg2: memref<4xi32, #tpu.memory_space<smem>>) -> (i32, i32, i32) {
    %0 = arith.index_cast %arg0 : i32 to index
    %1 = memref.load %arg1[%0] : memref<4xi32, #tpu.memory_space<smem>>
    %c0_i32 = arith.constant 0 : i32
    %c0_i32_0 = arith.constant 0 : i32
    %c0_i32_1 = arith.constant 0 : i32
    return %1, %c0_i32, %c0_i32_0 : i32, i32, i32
  }
  func.func @transform_4(%arg0: i32, %arg1: memref<4xi32, #tpu.memory_space<smem>>, %arg2: memref<4xi32, #tpu.memory_space<smem>>) -> (i32, i32, i32) {
    %c0_i32 = arith.constant 0 : i32
    %c0_i32_0 = arith.constant 0 : i32
    %c0_i32_1 = arith.constant 0 : i32
    return %c0_i32, %c0_i32_0, %arg0 : i32, i32, i32
  }
  func.func @transform_5(%arg0: i32, %arg1: memref<4xi32, #tpu.memory_space<smem>>, %arg2: memref<4xi32, #tpu.memory_space<smem>>) -> (i32, i32, i32) {
    %c0_i32 = arith.constant 0 : i32
    %c0_i32_0 = arith.constant 0 : i32
    %c0_i32_1 = arith.constant 0 : i32
    return %arg0, %c0_i32, %c0_i32_0 : i32, i32, i32
  }
}

</mosaic_0001>

<bundles_post_ra>
// kernel: matcher_forward.1
= control target key start
LH: loop header
LB: loop body
LE: loop exit
PB: predicated region body
PF: predicated region fallthrough
CT: control target
= control target key end

     0   :  { %s6989_s0 = inlined_call_operand.vmem [shape: s32[4], index: 0, kind: input, shape index: {}]   ;;  %s6990_s2 = inlined_call_operand.vmem [shape: f32[2,512,256], index: 2, kind: input, shape index: {}]   ;;  %s6991_s3 = inlined_call_operand.vmem [shape: f32[2,512,256], index: 3, kind: input, shape index: {}]   ;;  %s6992_s4 = inlined_call_operand.vmem [shape: bf16[3,256,256], index: 4, kind: input, shape index: {}]   ;;  %s6993_s5 = inlined_call_operand.vmem [shape: f32[3,1,256], index: 5, kind: input, shape index: {}]   ;;  %s6994_s6 = inlined_call_operand.vmem [shape: f32[2,2,512], index: 6, kind: output, shape index: {0}]   ;;  %s6995_s7 = inlined_call_operand.vmem [shape: f32[4,1,1], index: 7, kind: output, shape index: {1}]   ;;  %s6996_s1 = inlined_call_operand.vmem [shape: s32[4], index: 1, kind: input, shape index: {}]  }
   0x1   :  { %s13_s26 = sshll.u32 %s6989_s0, 4  ;;  %s17_s29 = sshll.u32 %s6996_s1, 4  ;;  %s14_s26 = int_to_ptr.vmem [resolvable:$true] %s13_s26  ;;  %s18_s29 = int_to_ptr.vmem [resolvable:$true] %s17_s29 }
   0x2   :  { %s4300_s30 = scalar_lea.vmem %s14_s26, 16  ;;  %p4305_p1 = scmp.lt.s32.totalorder %s14_s26, %s14_s26 }
   0x3   :  { %p4301_p0 = scmp.ne.s32.totalorder %s14_s26, %s4300_s30  ;;  %p4306_p2 = scmp.lt.s32.totalorder %s4300_s30, %s4300_s30 }
   0x5   :  { %p4307_p3 = por %p4306_p2, %p4305_p1 }
   0x7   :  { %p4308_p4 = pnand %p4307_p3, %p4301_p0 }
   0x9   :  { %4311 = shalt.err (!%p4308_p4)  }
   0xa   :  { %s4350_s8 = smov [#allocation3]   ;;  %s4312_s9 = scalar_lea.vmem %s18_s29, 16 }
   0xb   :  { %16 = dma.vmem_to_smem %s14_s26, 16, %s4350_s8, [#allocation2] }
   0xc   :  { %p4313_p5 = scmp.ne.s32.totalorder %s18_s29, %s4312_s9  ;;  %p4317_p6 = scmp.lt.s32.totalorder %s18_s29, %s18_s29 }
   0xd   :  { %p4318_p7 = scmp.lt.s32.totalorder %s4312_s9, %s4312_s9 }
   0xf   :  { %p4319_p8 = por %p4318_p7, %p4317_p6 }
  0x11   :  { %p4320_p9 = pnand %p4319_p8, %p4313_p5 }
  0x13   :  { %4323 = shalt.err (!%p4320_p9)  }
  0x14   :  { %s4351_s0 = smov [#allocation4]  }
  0x15   :  { %20 = dma.vmem_to_smem %s18_s29, 16, %s4351_s0, [#allocation2] }
  0x16   :  { %4336 = dma.done.wait [#allocation2], 32 }
  0x17   :  { %4337 = vsyncadd [#allocation2], 4294967264 }
  0x18   :  { %22 = sfence }
  0x19   :  { %s4400_s1 = smov 0   ;;  %s4402_s10 = smov 0  }
  0x1a   :  { %s4404_s11 = smov 0  }
  0x1b LB: > { %s4416_s12 = sadd.s32 4294967295, %s4348_s11   ;;  %s4419_s13 = sadd.s32 1, %s4348_s11   ;;  %s4348_s11 = sphi %s4404_s11, %s7356_s11   ;;  %s4344_s10 = sphi %s4402_s10, %s7355_s10   ;;  %s4340_s1 = sphi %s4400_s1, %s7354_s1  }
  0x1c   : > { %s32_s14 = ssub.s32 %s4348_s11, %s4419_s13  ;;  %s35_s15 = sadd.s32 1, %s4344_s10 }
  0x1d   : > { %p33_p10 = scmp.eq.s32.totalorder %s32_s14, 0  ;;  %p42_p11 = scmp.ne.s32.totalorder %s4344_s10, %s4340_s1 }
  0x1e   : > { %p43_p12 = scmp.eq.s32.totalorder %s4348_s11, 0  ;;  %p154_p13 = scmp.eq.s32.totalorder %s4416_s12, 3 }
  0x1f   : > { %s4429_s16 = scalar_select %p33_p10, %s4344_s10, %s35_s15  }
  0x20   : > { %p4431_p0 = por %p43_p12, %p42_p11  ;;  %p4435_p1 = por %p154_p13, %p42_p11 }
  0x21   : > { %p3871_p2 = scmp.ge.s32.totalorder %s4348_s11, 4 }
  0x23   : > { %202 = sbr.rel (%p3871_p2) target bundleno = 112 (0x70), region = 16 }
  0x28   : > { %205 = sbr.rel (!%p4431_p0) target bundleno = 76 (0x4c), region = 20  ;;  %s207_s19 = sand.u32 (%p4431_p0), 1, %s4344_s10  }
  0x29   : > { %s3992_s20 = sshll.u32 (%p4431_p0), %s4348_s11, 8  ;;  %s3872_s21 = sshll.u32 (%p4431_p0), %s207_s19, 9 }
  0x2a   : > { %s4447_s24 = scalar_lea.vmem (%p4431_p0), %s6990_s2, %s3992_s20  ;;  %s4452_s25 = scalar_lea.vmem (%p4431_p0), [#allocation5], %s3872_s21 }
  0x2b   : > { %v226_v0 = vld [vmem:[%s4447_s24] sm:$0xff] (%p4431_p0)  ;;  %v228_v1 = vld [vmem:[%s4447_s24 + $0x8] sm:$0xff] (%p4431_p0)  ;;  %v230_v2 = vld [vmem:[%s4447_s24 + $0x10] sm:$0xff] (%p4431_p0) }
  0x2c   : > { %227 = vst [vmem:[%s4452_s25] sm:$0xff] (%p4431_p0), %v226_v0  ;;  %229 = vst [vmem:[%s4452_s25 + $0x8] sm:$0xff] (%p4431_p0), %v228_v1  ;;  %v232_v3 = vld [vmem:[%s4447_s24 + $0x18] sm:$0xff] (%p4431_p0)  ;;  %v234_v4 = vld [vmem:[%s4447_s24 + $0x20] sm:$0xff] (%p4431_p0) }
  0x2d   : > { %231 = vst [vmem:[%s4452_s25 + $0x10] sm:$0xff] %v230_v2  ;;  %v236_v5 = vld [vmem:[%s4447_s24 + $0x28] sm:$0xff]  ;;  %233 = vst [vmem:[%s4452_s25 + $0x18] sm:$0xff] %v232_v3  ;;  %v238_v6 = vld [vmem:[%s4447_s24 + $0x30] sm:$0xff] }
  0x2e   : > { %235 = vst [vmem:[%s4452_s25 + $0x20] sm:$0xff] %v234_v4  ;;  %237 = vst [vmem:[%s4452_s25 + $0x28] sm:$0xff] %v236_v5  ;;  %v240_v7 = vld [vmem:[%s4447_s24 + $0x38] sm:$0xff]  ;;  %v242_v8 = vld [vmem:[%s4447_s24 + $0x40] sm:$0xff] }
  0x2f   : > { %239 = vst [vmem:[%s4452_s25 + $0x30] sm:$0xff] %v238_v6  ;;  %241 = vst [vmem:[%s4452_s25 + $0x38] sm:$0xff] %v240_v7  ;;  %v244_v9 = vld [vmem:[%s4447_s24 + $0x48] sm:$0xff]  ;;  %v246_v10 = vld [vmem:[%s4447_s24 + $0x50] sm:$0xff] }
  0x30   : > { %243 = vst [vmem:[%s4452_s25 + $0x40] sm:$0xff] %v242_v8  ;;  %v248_v11 = vld [vmem:[%s4447_s24 + $0x58] sm:$0xff]  ;;  %245 = vst [vmem:[%s4452_s25 + $0x48] sm:$0xff] %v244_v9  ;;  %v250_v12 = vld [vmem:[%s4447_s24 + $0x60] sm:$0xff] }
  0x31   : > { %247 = vst [vmem:[%s4452_s25 + $0x50] sm:$0xff] %v246_v10  ;;  %249 = vst [vmem:[%s4452_s25 + $0x58] sm:$0xff] %v248_v11  ;;  %v252_v13 = vld [vmem:[%s4447_s24 + $0x68] sm:$0xff]  ;;  %v254_v14 = vld [vmem:[%s4447_s24 + $0x70] sm:$0xff] }
  0x32   : > { %251 = vst [vmem:[%s4452_s25 + $0x60] sm:$0xff] %v250_v12  ;;  %253 = vst [vmem:[%s4452_s25 + $0x68] sm:$0xff] %v252_v13  ;;  %v256_v15 = vld [vmem:[%s4447_s24 + $0x78] sm:$0xff]  ;;  %v258_v16 = vld [vmem:[%s4447_s24 + $0x80] sm:$0xff] }
  0x33   : > { %255 = vst [vmem:[%s4452_s25 + $0x70] sm:$0xff] %v254_v14  ;;  %v260_v17 = vld [vmem:[%s4447_s24 + $0x88] sm:$0xff]  ;;  %257 = vst [vmem:[%s4452_s25 + $0x78] sm:$0xff] %v256_v15  ;;  %v262_v18 = vld [vmem:[%s4447_s24 + $0x90] sm:$0xff] }
  0x34   : > { %259 = vst [vmem:[%s4452_s25 + $0x80] sm:$0xff] %v258_v16  ;;  %261 = vst [vmem:[%s4452_s25 + $0x88] sm:$0xff] %v260_v17  ;;  %v264_v19 = vld [vmem:[%s4447_s24 + $0x98] sm:$0xff]  ;;  %v266_v20 = vld [vmem:[%s4447_s24 + $0xa0] sm:$0xff] }
  0x35   : > { %263 = vst [vmem:[%s4452_s25 + $0x90] sm:$0xff] %v262_v18  ;;  %265 = vst [vmem:[%s4452_s25 + $0x98] sm:$0xff] %v264_v19  ;;  %v268_v21 = vld [vmem:[%s4447_s24 + $0xa8] sm:$0xff]  ;;  %v270_v22 = vld [vmem:[%s4447_s24 + $0xb0] sm:$0xff] }
  0x36   : > { %267 = vst [vmem:[%s4452_s25 + $0xa0] sm:$0xff] %v266_v20  ;;  %v272_v23 = vld [vmem:[%s4447_s24 + $0xb8] sm:$0xff]  ;;  %269 = vst [vmem:[%s4452_s25 + $0xa8] sm:$0xff] %v268_v21  ;;  %v274_v24 = vld [vmem:[%s4447_s24 + $0xc0] sm:$0xff] }
  0x37   : > { %271 = vst [vmem:[%s4452_s25 + $0xb0] sm:$0xff] %v270_v22  ;;  %273 = vst [vmem:[%s4452_s25 + $0xb8] sm:$0xff] %v272_v23  ;;  %v276_v25 = vld [vmem:[%s4447_s24 + $0xc8] sm:$0xff]  ;;  %v278_v26 = vld [vmem:[%s4447_s24 + $0xd0] sm:$0xff] }
  0x38   : > { %275 = vst [vmem:[%s4452_s25 + $0xc0] sm:$0xff] %v274_v24  ;;  %277 = vst [vmem:[%s4452_s25 + $0xc8] sm:$0xff] %v276_v25  ;;  %v280_v27 = vld [vmem:[%s4447_s24 + $0xd8] sm:$0xff]  ;;  %v282_v28 = vld [vmem:[%s4447_s24 + $0xe0] sm:$0xff] }
  0x39   : > { %279 = vst [vmem:[%s4452_s25 + $0xd0] sm:$0xff] %v278_v26  ;;  %v284_v29 = vld [vmem:[%s4447_s24 + $0xe8] sm:$0xff]  ;;  %281 = vst [vmem:[%s4452_s25 + $0xd8] sm:$0xff] %v280_v27  ;;  %v286_v30 = vld [vmem:[%s4447_s24 + $0xf0] sm:$0xff] }
  0x3a   : > { %283 = vst [vmem:[%s4452_s25 + $0xe0] sm:$0xff] %v282_v28  ;;  %285 = vst [vmem:[%s4452_s25 + $0xe8] sm:$0xff] %v284_v29  ;;  %v288_v31 = vld [vmem:[%s4447_s24 + $0xf8] sm:$0xff]  ;;  %v290_v32 = vld [vmem:[%s4447_s24 + $0x400] sm:$0xff] }
  0x3b   : > { %287 = vst [vmem:[%s4452_s25 + $0xf0] sm:$0xff] %v286_v30  ;;  %289 = vst [vmem:[%s4452_s25 + $0xf8] sm:$0xff] %v288_v31  ;;  %v292_v33 = vld [vmem:[%s4447_s24 + $0x408] sm:$0xff]  ;;  %v294_v34 = vld [vmem:[%s4447_s24 + $0x410] sm:$0xff] }
  0x3c   : > { %291 = vst [vmem:[%s4452_s25 + $0x100] sm:$0xff] %v290_v32  ;;  %v296_v35 = vld [vmem:[%s4447_s24 + $0x418] sm:$0xff]  ;;  %293 = vst [vmem:[%s4452_s25 + $0x108] sm:$0xff] %v292_v33  ;;  %v298_v36 = vld [vmem:[%s4447_s24 + $0x420] sm:$0xff] }
  0x3d   : > { %295 = vst [vmem:[%s4452_s25 + $0x110] sm:$0xff] %v294_v34  ;;  %297 = vst [vmem:[%s4452_s25 + $0x118] sm:$0xff] %v296_v35  ;;  %v300_v37 = vld [vmem:[%s4447_s24 + $0x428] sm:$0xff]  ;;  %v302_v38 = vld [vmem:[%s4447_s24 + $0x430] sm:$0xff] }
  0x3e   : > { %299 = vst [vmem:[%s4452_s25 + $0x120] sm:$0xff] %v298_v36  ;;  %301 = vst [vmem:[%s4452_s25 + $0x128] sm:$0xff] %v300_v37  ;;  %v304_v39 = vld [vmem:[%s4447_s24 + $0x438] sm:$0xff]  ;;  %v306_v40 = vld [vmem:[%s4447_s24 + $0x440] sm:$0xff] }
  0x3f   : > { %303 = vst [vmem:[%s4452_s25 + $0x130] sm:$0xff] %v302_v38  ;;  %v308_v41 = vld [vmem:[%s4447_s24 + $0x448] sm:$0xff]  ;;  %305 = vst [vmem:[%s4452_s25 + $0x138] sm:$0xff] %v304_v39  ;;  %v310_v42 = vld [vmem:[%s4447_s24 + $0x450] sm:$0xff] }
  0x40   : > { %307 = vst [vmem:[%s4452_s25 + $0x140] sm:$0xff] %v306_v40  ;;  %309 = vst [vmem:[%s4452_s25 + $0x148] sm:$0xff] %v308_v41  ;;  %v312_v43 = vld [vmem:[%s4447_s24 + $0x458] sm:$0xff]  ;;  %v314_v44 = vld [vmem:[%s4447_s24 + $0x460] sm:$0xff] }
  0x41   : > { %311 = vst [vmem:[%s4452_s25 + $0x150] sm:$0xff] %v310_v42  ;;  %313 = vst [vmem:[%s4452_s25 + $0x158] sm:$0xff] %v312_v43  ;;  %v316_v45 = vld [vmem:[%s4447_s24 + $0x468] sm:$0xff]  ;;  %v318_v46 = vld [vmem:[%s4447_s24 + $0x470] sm:$0xff] }
  0x42   : > { %315 = vst [vmem:[%s4452_s25 + $0x160] sm:$0xff] %v314_v44  ;;  %v320_v47 = vld [vmem:[%s4447_s24 + $0x478] sm:$0xff]  ;;  %317 = vst [vmem:[%s4452_s25 + $0x168] sm:$0xff] %v316_v45  ;;  %v322_v48 = vld [vmem:[%s4447_s24 + $0x480] sm:$0xff] }
  0x43   : > { %319 = vst [vmem:[%s4452_s25 + $0x170] sm:$0xff] %v318_v46  ;;  %321 = vst [vmem:[%s4452_s25 + $0x178] sm:$0xff] %v320_v47  ;;  %v324_v49 = vld [vmem:[%s4447_s24 + $0x488] sm:$0xff]  ;;  %v326_v50 = vld [vmem:[%s4447_s24 + $0x490] sm:$0xff] }
  0x44   : > { %323 = vst [vmem:[%s4452_s25 + $0x180] sm:$0xff] %v322_v48  ;;  %325 = vst [vmem:[%s4452_s25 + $0x188] sm:$0xff] %v324_v49  ;;  %v328_v51 = vld [vmem:[%s4447_s24 + $0x498] sm:$0xff]  ;;  %v330_v52 = vld [vmem:[%s4447_s24 + $0x4a0] sm:$0xff] }
  0x45   : > { %327 = vst [vmem:[%s4452_s25 + $0x190] sm:$0xff] %v326_v50  ;;  %v332_v53 = vld [vmem:[%s4447_s24 + $0x4a8] sm:$0xff]  ;;  %329 = vst [vmem:[%s4452_s25 + $0x198] sm:$0xff] %v328_v51  ;;  %v334_v54 = vld [vmem:[%s4447_s24 + $0x4b0] sm:$0xff] }
  0x46   : > { %331 = vst [vmem:[%s4452_s25 + $0x1a0] sm:$0xff] %v330_v52  ;;  %333 = vst [vmem:[%s4452_s25 + $0x1a8] sm:$0xff] %v332_v53  ;;  %v336_v55 = vld [vmem:[%s4447_s24 + $0x4b8] sm:$0xff]  ;;  %v338_v56 = vld [vmem:[%s4447_s24 + $0x4c0] sm:$0xff] }
  0x47   : > { %335 = vst [vmem:[%s4452_s25 + $0x1b0] sm:$0xff] %v334_v54  ;;  %337 = vst [vmem:[%s4452_s25 + $0x1b8] sm:$0xff] %v336_v55  ;;  %v340_v57 = vld [vmem:[%s4447_s24 + $0x4c8] sm:$0xff]  ;;  %v342_v58 = vld [vmem:[%s4447_s24 + $0x4d0] sm:$0xff] }
  0x48   : > { %339 = vst [vmem:[%s4452_s25 + $0x1c0] sm:$0xff] %v338_v56  ;;  %v344_v59 = vld [vmem:[%s4447_s24 + $0x4d8] sm:$0xff]  ;;  %341 = vst [vmem:[%s4452_s25 + $0x1c8] sm:$0xff] %v340_v57  ;;  %v346_v60 = vld [vmem:[%s4447_s24 + $0x4e0] sm:$0xff] }
  0x49   : > { %343 = vst [vmem:[%s4452_s25 + $0x1d0] sm:$0xff] %v342_v58  ;;  %345 = vst [vmem:[%s4452_s25 + $0x1d8] sm:$0xff] %v344_v59  ;;  %v348_v61 = vld [vmem:[%s4447_s24 + $0x4e8] sm:$0xff]  ;;  %v350_v62 = vld [vmem:[%s4447_s24 + $0x4f0] sm:$0xff] }
  0x4a   : > { %347 = vst [vmem:[%s4452_s25 + $0x1e0] sm:$0xff] %v346_v60  ;;  %349 = vst [vmem:[%s4452_s25 + $0x1e8] sm:$0xff] %v348_v61  ;;  %v352_v63 = vld [vmem:[%s4447_s24 + $0x4f8] sm:$0xff] }
  0x4b   : > { %351 = vst [vmem:[%s4452_s25 + $0x1f0] sm:$0xff] %v350_v62  ;;  %353 = vst [vmem:[%s4452_s25 + $0x1f8] sm:$0xff] %v352_v63 }
  0x4c PF: > { %359 = sbr.rel (!%p4431_p0) target bundleno = 112 (0x70), region = 43  ;;  %s361_s26 = sand.u32 (%p4431_p0), 1, %s4344_s10  }
  0x4d   : > { %s3994_s27 = sshll.u32 (%p4431_p0), %s4348_s11, 8  ;;  %s3876_s28 = sshll.u32 (%p4431_p0), %s361_s26, 9 }
  0x4e   : > { %s4586_s8 = scalar_lea.vmem (%p4431_p0), %s6991_s3, %s3994_s27  ;;  %s4591_s9 = scalar_lea.vmem (%p4431_p0), [#allocation6], %s3876_s28 }
  0x4f   : > { %v380_v0 = vld [vmem:[%s4586_s8] sm:$0xff] (%p4431_p0)  ;;  %v382_v1 = vld [vmem:[%s4586_s8 + $0x8] sm:$0xff] (%p4431_p0)  ;;  %v384_v2 = vld [vmem:[%s4586_s8 + $0x10] sm:$0xff] (%p4431_p0) }
  0x50   : > { %381 = vst [vmem:[%s4591_s9] sm:$0xff] (%p4431_p0), %v380_v0  ;;  %383 = vst [vmem:[%s4591_s9 + $0x8] sm:$0xff] (%p4431_p0), %v382_v1  ;;  %v386_v3 = vld [vmem:[%s4586_s8 + $0x18] sm:$0xff] (%p4431_p0)  ;;  %v388_v4 = vld [vmem:[%s4586_s8 + $0x20] sm:$0xff] (%p4431_p0) }
  0x51   : > { %385 = vst [vmem:[%s4591_s9 + $0x10] sm:$0xff] %v384_v2  ;;  %v390_v5 = vld [vmem:[%s4586_s8 + $0x28] sm:$0xff]  ;;  %387 = vst [vmem:[%s4591_s9 + $0x18] sm:$0xff] %v386_v3  ;;  %v392_v6 = vld [vmem:[%s4586_s8 + $0x30] sm:$0xff] }
  0x52   : > { %389 = vst [vmem:[%s4591_s9 + $0x20] sm:$0xff] %v388_v4  ;;  %391 = vst [vmem:[%s4591_s9 + $0x28] sm:$0xff] %v390_v5  ;;  %v394_v7 = vld [vmem:[%s4586_s8 + $0x38] sm:$0xff]  ;;  %v396_v8 = vld [vmem:[%s4586_s8 + $0x40] sm:$0xff] }
  0x53   : > { %393 = vst [vmem:[%s4591_s9 + $0x30] sm:$0xff] %v392_v6  ;;  %395 = vst [vmem:[%s4591_s9 + $0x38] sm:$0xff] %v394_v7  ;;  %v398_v9 = vld [vmem:[%s4586_s8 + $0x48] sm:$0xff]  ;;  %v400_v10 = vld [vmem:[%s4586_s8 + $0x50] sm:$0xff] }
  0x54   : > { %397 = vst [vmem:[%s4591_s9 + $0x40] sm:$0xff] %v396_v8  ;;  %v402_v11 = vld [vmem:[%s4586_s8 + $0x58] sm:$0xff]  ;;  %399 = vst [vmem:[%s4591_s9 + $0x48] sm:$0xff] %v398_v9  ;;  %v404_v12 = vld [vmem:[%s4586_s8 + $0x60] sm:$0xff] }
  0x55   : > { %401 = vst [vmem:[%s4591_s9 + $0x50] sm:$0xff] %v400_v10  ;;  %403 = vst [vmem:[%s4591_s9 + $0x58] sm:$0xff] %v402_v11  ;;  %v406_v13 = vld [vmem:[%s4586_s8 + $0x68] sm:$0xff]  ;;  %v408_v14 = vld [vmem:[%s4586_s8 + $0x70] sm:$0xff] }
  0x56   : > { %405 = vst [vmem:[%s4591_s9 + $0x60] sm:$0xff] %v404_v12  ;;  %407 = vst [vmem:[%s4591_s9 + $0x68] sm:$0xff] %v406_v13  ;;  %v410_v15 = vld [vmem:[%s4586_s8 + $0x78] sm:$0xff]  ;;  %v412_v16 = vld [vmem:[%s4586_s8 + $0x80] sm:$0xff] }
  0x57   : > { %409 = vst [vmem:[%s4591_s9 + $0x70] sm:$0xff] %v408_v14  ;;  %v414_v17 = vld [vmem:[%s4586_s8 + $0x88] sm:$0xff]  ;;  %411 = vst [vmem:[%s4591_s9 + $0x78] sm:$0xff] %v410_v15  ;;  %v416_v18 = vld [vmem:[%s4586_s8 + $0x90] sm:$0xff] }
  0x58   : > { %413 = vst [vmem:[%s4591_s9 + $0x80] sm:$0xff] %v412_v16  ;;  %415 = vst [vmem:[%s4591_s9 + $0x88] sm:$0xff] %v414_v17  ;;  %v418_v19 = vld [vmem:[%s4586_s8 + $0x98] sm:$0xff]  ;;  %v420_v20 = vld [vmem:[%s4586_s8 + $0xa0] sm:$0xff] }
  0x59   : > { %417 = vst [vmem:[%s4591_s9 + $0x90] sm:$0xff] %v416_v18  ;;  %419 = vst [vmem:[%s4591_s9 + $0x98] sm:$0xff] %v418_v19  ;;  %v422_v21 = vld [vmem:[%s4586_s8 + $0xa8] sm:$0xff]  ;;  %v424_v22 = vld [vmem:[%s4586_s8 + $0xb0] sm:$0xff] }
  0x5a   : > { %421 = vst [vmem:[%s4591_s9 + $0xa0] sm:$0xff] %v420_v20  ;;  %v426_v23 = vld [vmem:[%s4586_s8 + $0xb8] sm:$0xff]  ;;  %423 = vst [vmem:[%s4591_s9 + $0xa8] sm:$0xff] %v422_v21  ;;  %v428_v24 = vld [vmem:[%s4586_s8 + $0xc0] sm:$0xff] }
  0x5b   : > { %425 = vst [vmem:[%s4591_s9 + $0xb0] sm:$0xff] %v424_v22  ;;  %427 = vst [vmem:[%s4591_s9 + $0xb8] sm:$0xff] %v426_v23  ;;  %v430_v25 = vld [vmem:[%s4586_s8 + $0xc8] sm:$0xff]  ;;  %v432_v26 = vld [vmem:[%s4586_s8 + $0xd0] sm:$0xff] }
  0x5c   : > { %429 = vst [vmem:[%s4591_s9 + $0xc0] sm:$0xff] %v428_v24  ;;  %431 = vst [vmem:[%s4591_s9 + $0xc8] sm:$0xff] %v430_v25  ;;  %v434_v27 = vld [vmem:[%s4586_s8 + $0xd8] sm:$0xff]  ;;  %v436_v28 = vld [vmem:[%s4586_s8 + $0xe0] sm:$0xff] }
  0x5d   : > { %433 = vst [vmem:[%s4591_s9 + $0xd0] sm:$0xff] %v432_v26  ;;  %v438_v29 = vld [vmem:[%s4586_s8 + $0xe8] sm:$0xff]  ;;  %435 = vst [vmem:[%s4591_s9 + $0xd8] sm:$0xff] %v434_v27  ;;  %v440_v30 = vld [vmem:[%s4586_s8 + $0xf0] sm:$0xff] }
  0x5e   : > { %437 = vst [vmem:[%s4591_s9 + $0xe0] sm:$0xff] %v436_v28  ;;  %439 = vst [vmem:[%s4591_s9 + $0xe8] sm:$0xff] %v438_v29  ;;  %v442_v31 = vld [vmem:[%s4586_s8 + $0xf8] sm:$0xff]  ;;  %v444_v32 = vld [vmem:[%s4586_s8 + $0x400] sm:$0xff] }
  0x5f   : > { %441 = vst [vmem:[%s4591_s9 + $0xf0] sm:$0xff] %v440_v30  ;;  %443 = vst [vmem:[%s4591_s9 + $0xf8] sm:$0xff] %v442_v31  ;;  %v446_v33 = vld [vmem:[%s4586_s8 + $0x408] sm:$0xff]  ;;  %v448_v34 = vld [vmem:[%s4586_s8 + $0x410] sm:$0xff] }
  0x60   : > { %445 = vst [vmem:[%s4591_s9 + $0x100] sm:$0xff] %v444_v32  ;;  %v450_v35 = vld [vmem:[%s4586_s8 + $0x418] sm:$0xff]  ;;  %447 = vst [vmem:[%s4591_s9 + $0x108] sm:$0xff] %v446_v33  ;;  %v452_v36 = vld [vmem:[%s4586_s8 + $0x420] sm:$0xff] }
  0x61   : > { %449 = vst [vmem:[%s4591_s9 + $0x110] sm:$0xff] %v448_v34  ;;  %451 = vst [vmem:[%s4591_s9 + $0x118] sm:$0xff] %v450_v35  ;;  %v454_v37 = vld [vmem:[%s4586_s8 + $0x428] sm:$0xff]  ;;  %v456_v38 = vld [vmem:[%s4586_s8 + $0x430] sm:$0xff] }
  0x62   : > { %453 = vst [vmem:[%s4591_s9 + $0x120] sm:$0xff] %v452_v36  ;;  %455 = vst [vmem:[%s4591_s9 + $0x128] sm:$0xff] %v454_v37  ;;  %v458_v39 = vld [vmem:[%s4586_s8 + $0x438] sm:$0xff]  ;;  %v460_v40 = vld [vmem:[%s4586_s8 + $0x440] sm:$0xff] }
  0x63   : > { %457 = vst [vmem:[%s4591_s9 + $0x130] sm:$0xff] %v456_v38  ;;  %v462_v41 = vld [vmem:[%s4586_s8 + $0x448] sm:$0xff]  ;;  %459 = vst [vmem:[%s4591_s9 + $0x138] sm:$0xff] %v458_v39  ;;  %v464_v42 = vld [vmem:[%s4586_s8 + $0x450] sm:$0xff] }
  0x64   : > { %461 = vst [vmem:[%s4591_s9 + $0x140] sm:$0xff] %v460_v40  ;;  %463 = vst [vmem:[%s4591_s9 + $0x148] sm:$0xff] %v462_v41  ;;  %v466_v43 = vld [vmem:[%s4586_s8 + $0x458] sm:$0xff]  ;;  %v468_v44 = vld [vmem:[%s4586_s8 + $0x460] sm:$0xff] }
  0x65   : > { %465 = vst [vmem:[%s4591_s9 + $0x150] sm:$0xff] %v464_v42  ;;  %467 = vst [vmem:[%s4591_s9 + $0x158] sm:$0xff] %v466_v43  ;;  %v470_v45 = vld [vmem:[%s4586_s8 + $0x468] sm:$0xff]  ;;  %v472_v46 = vld [vmem:[%s4586_s8 + $0x470] sm:$0xff] }
  0x66   : > { %469 = vst [vmem:[%s4591_s9 + $0x160] sm:$0xff] %v468_v44  ;;  %v474_v47 = vld [vmem:[%s4586_s8 + $0x478] sm:$0xff]  ;;  %471 = vst [vmem:[%s4591_s9 + $0x168] sm:$0xff] %v470_v45  ;;  %v476_v48 = vld [vmem:[%s4586_s8 + $0x480] sm:$0xff] }
  0x67   : > { %473 = vst [vmem:[%s4591_s9 + $0x170] sm:$0xff] %v472_v46  ;;  %475 = vst [vmem:[%s4591_s9 + $0x178] sm:$0xff] %v474_v47  ;;  %v478_v49 = vld [vmem:[%s4586_s8 + $0x488] sm:$0xff]  ;;  %v480_v50 = vld [vmem:[%s4586_s8 + $0x490] sm:$0xff] }
  0x68   : > { %477 = vst [vmem:[%s4591_s9 + $0x180] sm:$0xff] %v476_v48  ;;  %479 = vst [vmem:[%s4591_s9 + $0x188] sm:$0xff] %v478_v49  ;;  %v482_v51 = vld [vmem:[%s4586_s8 + $0x498] sm:$0xff]  ;;  %v484_v52 = vld [vmem:[%s4586_s8 + $0x4a0] sm:$0xff] }
  0x69   : > { %481 = vst [vmem:[%s4591_s9 + $0x190] sm:$0xff] %v480_v50  ;;  %v486_v53 = vld [vmem:[%s4586_s8 + $0x4a8] sm:$0xff]  ;;  %483 = vst [vmem:[%s4591_s9 + $0x198] sm:$0xff] %v482_v51  ;;  %v488_v54 = vld [vmem:[%s4586_s8 + $0x4b0] sm:$0xff] }
  0x6a   : > { %485 = vst [vmem:[%s4591_s9 + $0x1a0] sm:$0xff] %v484_v52  ;;  %487 = vst [vmem:[%s4591_s9 + $0x1a8] sm:$0xff] %v486_v53  ;;  %v490_v55 = vld [vmem:[%s4586_s8 + $0x4b8] sm:$0xff]  ;;  %v492_v56 = vld [vmem:[%s4586_s8 + $0x4c0] sm:$0xff] }
  0x6b   : > { %489 = vst [vmem:[%s4591_s9 + $0x1b0] sm:$0xff] %v488_v54  ;;  %491 = vst [vmem:[%s4591_s9 + $0x1b8] sm:$0xff] %v490_v55  ;;  %v494_v57 = vld [vmem:[%s4586_s8 + $0x4c8] sm:$0xff]  ;;  %v496_v58 = vld [vmem:[%s4586_s8 + $0x4d0] sm:$0xff] }
  0x6c   : > { %493 = vst [vmem:[%s4591_s9 + $0x1c0] sm:$0xff] %v492_v56  ;;  %v498_v59 = vld [vmem:[%s4586_s8 + $0x4d8] sm:$0xff]  ;;  %495 = vst [vmem:[%s4591_s9 + $0x1c8] sm:$0xff] %v494_v57  ;;  %v500_v60 = vld [vmem:[%s4586_s8 + $0x4e0] sm:$0xff] }
  0x6d   : > { %497 = vst [vmem:[%s4591_s9 + $0x1d0] sm:$0xff] %v496_v58  ;;  %499 = vst [vmem:[%s4591_s9 + $0x1d8] sm:$0xff] %v498_v59  ;;  %v502_v61 = vld [vmem:[%s4586_s8 + $0x4e8] sm:$0xff]  ;;  %v504_v62 = vld [vmem:[%s4586_s8 + $0x4f0] sm:$0xff] }
  0x6e   : > { %501 = vst [vmem:[%s4591_s9 + $0x1e0] sm:$0xff] %v500_v60  ;;  %503 = vst [vmem:[%s4591_s9 + $0x1e8] sm:$0xff] %v502_v61  ;;  %v506_v63 = vld [vmem:[%s4586_s8 + $0x4f8] sm:$0xff] }
  0x6f   : > { %505 = vst [vmem:[%s4591_s9 + $0x1f0] sm:$0xff] %v504_v62  ;;  %507 = vst [vmem:[%s4591_s9 + $0x1f8] sm:$0xff] %v506_v63 }
  0x70 PF: > { %p3880_p3 = scmp.ge.s32.totalorder %s4348_s11, 1  ;;  %p531_p4 = scmp.lt.s32.totalorder %s4348_s11, 5 }
  0x72   : > { %p532_p5 = pnand %p3880_p3, %p531_p4 }
  0x74   : > { %535 = sbr.rel (%p532_p5) target bundleno = 1218 (0x4c2), region = 74 }
  0x79   : > { %s591_s0 = sld [smem:[#allocation3 + %s4416_s12]]  ;;  %s538_s14 = sand.u32 1, %s4340_s1  }
  0x7a   : > { %s4724_s15 = sshll.u32 %s538_s14, 9  ;;  %s1934_s23 = sld [smem:[#allocation4 + %s4416_s12]] }
  0x7b   : > { %s4727_s17 = scalar_lea.vmem [#allocation5], %s4724_s15  ;;  %s4852_s22 = scalar_lea.vmem [#allocation6], %s4724_s15 }
  0x7c   : > { %v608_v0 = vld [vmem:[%s4727_s17 + $0x8] sm:$0xff]  ;;  %v610_v1 = vld [vmem:[%s4727_s17 + $0x18] sm:$0xff]  ;;  %v607_v33 = vld [vmem:[%s4727_s17] sm:$0xff]  ;;  %s598_s24 = sld [smem:[#allocation3 + %s4416_s12]]  ;;  %s3883_s29 = sshll.u32 %s538_s14, 2 }
  0x7d   : > { %v640_v2 = vld [vmem:[%s4727_s17 + $0x108] sm:$0xff]  ;;  %vm736_vm0 = vcmp.gt.f32.partialorder %v608_v0, 0.0  ;;  %vm738_vm1 = vcmp.gt.f32.partialorder %v610_v1, 0.0  ;;  %v800_v3 = vmul.f32 0.2, %v608_v0  ;;  %v642_v5 = vld [vmem:[%s4727_s17 + $0x118] sm:$0xff] }
  0x7e   : > { %v802_v4 = vmul.f32 0.2, %v610_v1  ;;  %vm768_vm2 = vcmp.gt.f32.partialorder %v640_v2, 0.0  ;;  %v832_v6 = vmul.f32 0.2, %v640_v2  ;;  %vm770_vm3 = vcmp.gt.f32.partialorder %v642_v5, 0.0 }
  0x7f   : > { %p592_p6 = scmp.lt.s32.totalorder %s591_s0, 2  ;;  %v864_v7 = vsel %vm736_vm0, %v608_v0, %v800_v3  ;;  %v834_v9 = vmul.f32 0.2, %v642_v5  ;;  %v609_v35 = vld [vmem:[%s4727_s17 + $0x10] sm:$0xff]  ;;  %v639_v37 = vld [vmem:[%s4727_s17 + $0x100] sm:$0xff]  ;;  %vm735_vm4 = vcmp.gt.f32.partialorder %v607_v33, 0.0 }
  0x80   : > { %v866_v8 = vsel %vm738_vm1, %v610_v1, %v802_v4  ;;  %v896_v11 = vsel %vm768_vm2, %v640_v2, %v832_v6  ;;  %v641_v38 = vld [vmem:[%s4727_s17 + $0x110] sm:$0xff]  ;;  %vm737_vm5 = vcmp.gt.f32.partialorder %v609_v35, 0.0  ;;  %v799_v39 = vmul.f32 0.2, %v607_v33  ;;  %v612_v40 = vld [vmem:[%s4727_s17 + $0x28] sm:$0xff]  ;;  %v614_v41 = vld [vmem:[%s4727_s17 + $0x38] sm:$0xff] }
  0x81   : > { %v928_v10 = vpack.c.bf16 %v866_v8, %v864_v7  ;;  %s7358_s0 = smov (!%p592_p6, %s591_s0), 2  ;;  %v898_v12 = vsel %vm770_vm3, %v642_v5, %v834_v9  ;;  %v4766_v42 = vld [vmem:[%s4727_s17 + $0x20] sm:$0xff]  ;;  %v801_v44 = vmul.f32 0.2, %v609_v35  ;;  %v831_v45 = vmul.f32 0.2, %v639_v37 }
  0x82   : > { %v944_v13 = vpack.c.bf16 %v898_v12, %v896_v11  ;;  %s3995_s11 = sshll.u32 %s7358_s0, 8  ;;  %vm767_vm6 = vcmp.gt.f32.partialorder %v639_v37, 0.0  ;;  %v833_v47 = vmul.f32 0.2, %v641_v38  ;;  %v613_v48 = vld [vmem:[%s4727_s17 + $0x30] sm:$0xff]  ;;  %vm769_vm7 = vcmp.gt.f32.partialorder %v641_v38, 0.0 }
  0x83   : > { %1195 = vmatprep.mubr.bf16.mxu0 %v928_v10  ;;  %s4736_s21 = scalar_lea.vmem %s6992_s4, %s3995_s11  ;;  %v804_v49 = vmul.f32 0.2, %v612_v40  ;;  %v644_v50 = vld [vmem:[%s4727_s17 + $0x128] sm:$0xff]  ;;  %v646_v51 = vld [vmem:[%s4727_s17 + $0x138] sm:$0xff]  ;;  %v4774_v52 = vsel %vm735_vm4, %v607_v33, %v799_v39  ;;  %vm740_vm8 = vcmp.gt.f32.partialorder %v612_v40, 0.0  ;;  %vm742_vm9 = vcmp.gt.f32.partialorder %v614_v41, 0.0 }
  0x84   : > { %1275 = vmatprep.mubr.bf16.mxu1 %v944_v13  ;;  %v4060_v14 = vld [vmem:[%s4736_s21 + $0x74] ss:$8 sps:$4 sm:$0xff]   ;;  %v4062_v15 = vld [vmem:[%s4736_s21 + $0x70] ss:$8 sps:$4 sm:$0xff]   ;;  %v4063_v16 = vld [vmem:[%s4736_s21 + $0x64] ss:$8 sps:$4 sm:$0xff]   ;;  %v4780_v57 = vsel %vm737_vm5, %v609_v35, %v801_v44  ;;  %v4783_v58 = vsel %vm767_vm6, %v639_v37, %v831_v45  ;;  %v4790_v62 = vsel %vm769_vm7, %v641_v38, %v833_v47 }
  0x85   : > { %1163 = vmatprep.subr.bf16.mxu0 %v4060_v14  ;;  %3996 = vmatprep.subr.bf16.mxu1 %v4060_v14  ;;  %v4065_v17 = vld [vmem:[%s4736_s21 + $0x60] ss:$8 sps:$4 sm:$0xff]   ;;  %v4066_v18 = vld [vmem:[%s4736_s21 + $0x54] ss:$8 sps:$4 sm:$0xff]   ;;  %v4068_v19 = vld [vmem:[%s4736_s21 + $0x50] ss:$8 sps:$4 sm:$0xff]   ;;  %v4794_v0 = vsel %vm740_vm8, %v612_v40, %v804_v49  ;;  %v927_v12 = vpack.c.bf16 %v4780_v57, %v4774_v52  ;;  %v943_v13 = vpack.c.bf16 %v4790_v62, %v4783_v58 }
  0x86   : > { %1164 = vmatpush1.bf16.msra.mxu0 %v4062_v15  ;;  %4012 = vmatpush1.bf16.msra.mxu1 %v4062_v15  ;;  %v4069_v20 = vld [vmem:[%s4736_s21 + $0x44] ss:$8 sps:$4 sm:$0xff]   ;;  %v4071_v21 = vld [vmem:[%s4736_s21 + $0x40] ss:$8 sps:$4 sm:$0xff]   ;;  %v4072_v22 = vld [vmem:[%s4736_s21 + $0x34] ss:$8 sps:$4 sm:$0xff]  }
  0x87   : > { %1165 = vmatprep.subr.bf16.mxu0 %v4063_v16  ;;  %3997 = vmatprep.subr.bf16.mxu1 %v4063_v16  ;;  %v4074_v23 = vld [vmem:[%s4736_s21 + $0x30] ss:$8 sps:$4 sm:$0xff]   ;;  %v4075_v24 = vld [vmem:[%s4736_s21 + $0x24] ss:$8 sps:$4 sm:$0xff]   ;;  %v4077_v25 = vld [vmem:[%s4736_s21 + $0x20] ss:$8 sps:$4 sm:$0xff]  }
  0x88   : > { %v4078_v26 = vld [vmem:[%s4736_s21 + $0x14] ss:$8 sps:$4 sm:$0xff]   ;;  %v4080_v27 = vld [vmem:[%s4736_s21 + $0x10] ss:$8 sps:$4 sm:$0xff]   ;;  %v4081_v28 = vld [vmem:[%s4736_s21 + $0x4] ss:$8 sps:$4 sm:$0xff]  }
  0x89   : > { %v4083_v29 = vld [vmem:[%s4736_s21] ss:$8 sps:$4 sm:$0xff]   ;;  %v4084_v30 = vld [vmem:[%s4736_s21 + $0xf4] ss:$8 sps:$4 sm:$0xff]   ;;  %v4086_v31 = vld [vmem:[%s4736_s21 + $0xf0] ss:$8 sps:$4 sm:$0xff]  }
  0x8a   : > { %1166 = vmatpush1.bf16.msra.mxu0 %v4065_v17  ;;  %4013 = vmatpush1.bf16.msra.mxu1 %v4065_v17  ;;  %v4087_v32 = vld [vmem:[%s4736_s21 + $0xe4] ss:$8 sps:$4 sm:$0xff]   ;;  %v4089_v34 = vld [vmem:[%s4736_s21 + $0xe0] ss:$8 sps:$4 sm:$0xff]   ;;  %v4090_v36 = vld [vmem:[%s4736_s21 + $0xd4] ss:$8 sps:$4 sm:$0xff]  }
  0x8b   : > { %1167 = vmatprep.subr.bf16.mxu0 %v4066_v18  ;;  %3998 = vmatprep.subr.bf16.mxu1 %v4066_v18  ;;  %v4092_v43 = vld [vmem:[%s4736_s21 + $0xd0] ss:$8 sps:$4 sm:$0xff]   ;;  %v4093_v46 = vld [vmem:[%s4736_s21 + $0xc4] ss:$8 sps:$4 sm:$0xff]   ;;  %v806_v53 = vmul.f32 0.2, %v614_v41 }
  0x8c   : > { %v643_v54 = vld [vmem:[%s4727_s17 + $0x120] sm:$0xff]  ;;  %v645_v55 = vld [vmem:[%s4727_s17 + $0x130] sm:$0xff]  ;;  %vm739_vm10 = vcmp.gt.f32.partialorder %v4766_v42, 0.0  ;;  %vm741_vm11 = vcmp.gt.f32.partialorder %v613_v48, 0.0  ;;  %v616_v59 = vld [vmem:[%s4727_s17 + $0x48] sm:$0xff]  ;;  %vm772_vm12 = vcmp.gt.f32.partialorder %v644_v50, 0.0 }
  0x8d   : > { %v4095_v56 = vld [vmem:[%s4736_s21 + $0xc0] ss:$8 sps:$4 sm:$0xff]   ;;  %v618_v60 = vld [vmem:[%s4727_s17 + $0x58] sm:$0xff]  ;;  %v803_v63 = vmul.f32 0.2, %v4766_v42  ;;  %vm774_vm13 = vcmp.gt.f32.partialorder %v646_v51, 0.0  ;;  %v4798_v4 = vsel %vm742_vm9, %v614_v41, %v806_v53 }
  0x8e   : > { %1168 = vmatpush1.bf16.msra.mxu0 %v4068_v19  ;;  %4014 = vmatpush1.bf16.msra.mxu1 %v4068_v19  ;;  %v4096_v61 = vld [vmem:[%s4736_s21 + $0xb4] ss:$8 sps:$4 sm:$0xff]   ;;  %v805_v1 = vmul.f32 0.2, %v613_v48  ;;  %v836_v2 = vmul.f32 0.2, %v644_v50  ;;  %v930_v16 = vpack.c.bf16 %v4798_v4, %v4794_v0 }
  0x8f   : > { %1169 = vmatprep.subr.bf16.mxu0 %v4069_v20  ;;  %3999 = vmatprep.subr.bf16.mxu1 %v4069_v20  ;;  %vm771_vm14 = vcmp.gt.f32.partialorder %v643_v54, 0.0  ;;  %v615_v3 = vld [vmem:[%s4727_s17 + $0x40] sm:$0xff]  ;;  %v838_v5 = vmul.f32 0.2, %v646_v51  ;;  %v835_v6 = vmul.f32 0.2, %v643_v54  ;;  %v4813_v18 = vsel %vm739_vm10, %v4766_v42, %v803_v63 }
  0x90   : > { %v837_v7 = vmul.f32 0.2, %v645_v55  ;;  %v4098_v8 = vld [vmem:[%s4736_s21 + $0xb0] ss:$8 sps:$4 sm:$0xff]   ;;  %vm773_vm15 = vcmp.gt.f32.partialorder %v645_v55, 0.0  ;;  %vm744_vm0 = vcmp.gt.f32.partialorder %v616_v59, 0.0  ;;  %v4816_v19 = vsel %vm741_vm11, %v613_v48, %v805_v1 }
  0x91   : > { %v808_v9 = vmul.f32 0.2, %v616_v59  ;;  %v617_v10 = vld [vmem:[%s4727_s17 + $0x50] sm:$0xff]  ;;  %v4099_v11 = vld [vmem:[%s4736_s21 + $0xa4] ss:$8 sps:$4 sm:$0xff]   ;;  %vm746_vm1 = vcmp.gt.f32.partialorder %v618_v60, 0.0  ;;  %v4819_v20 = vsel %vm772_vm12, %v644_v50, %v836_v2  ;;  %v929_v45 = vpack.c.bf16 %v4816_v19, %v4813_v18 }
  0x92   : > { %1170 = vmatpush1.bf16.msra.mxu0 %v4071_v21  ;;  %4015 = vmatpush1.bf16.msra.mxu1 %v4071_v21  ;;  %v810_v14 = vmul.f32 0.2, %v618_v60  ;;  %v807_v15 = vmul.f32 0.2, %v615_v3  ;;  %vm743_vm2 = vcmp.gt.f32.partialorder %v615_v3, 0.0  ;;  %vm745_vm3 = vcmp.gt.f32.partialorder %v617_v10, 0.0 }
  0x93   : > { %1171 = vmatprep.subr.bf16.mxu0 %v4072_v22  ;;  %4000 = vmatprep.subr.bf16.mxu1 %v4072_v22  ;;  %v4101_v17 = vld [vmem:[%s4736_s21 + $0xa0] ss:$8 sps:$4 sm:$0xff]   ;;  %v809_v21 = vmul.f32 0.2, %v617_v10  ;;  %v4104_v35 = vld [vmem:[%s4736_s21 + $0x90] ss:$8 sps:$4 sm:$0xff]  }
  0x94   : > { %v648_v22 = vld [vmem:[%s4727_s17 + $0x148] sm:$0xff]  ;;  %v4843_v33 = vsel %vm743_vm2, %v615_v3, %v807_v15  ;;  %v671_v44 = vld [vmem:[%s4852_s22] sm:$0xff]  ;;  %v621_v49 = vld [vmem:[%s4727_s17 + $0x70] sm:$0xff]  ;;  %p599_p7 = scmp.lt.s32.totalorder %s598_s24, 2  ;;  %s6897_s1 = scalar_lea.vmem [#allocation7], %s3883_s29 }
  0x95   : > { %vm776_vm4 = vcmp.gt.f32.partialorder %v648_v22, 0.0  ;;  %v4105_v38 = vld [vmem:[%s4736_s21 + $0x84] ss:$8 sps:$4 sm:$0xff]   ;;  %v4849_v39 = vsel %vm745_vm3, %v617_v10, %v809_v21  ;;  %v654_v63 = vld [vmem:[%s4727_s17 + $0x178] sm:$0xff]  ;;  %v1644_v1 = vmul.f32 %v671_v44, %v671_v44  ;;  %v673_v2 = vld [vmem:[%s4852_s22 + $0x10] sm:$0xff]  ;;  %vm749_vm11 = vcmp.gt.f32.partialorder %v621_v49, 0.0 }
  0x96   : > { %1172 = vmatpush1.bf16.msra.mxu0 %v4074_v23  ;;  %4016 = vmatpush1.bf16.msra.mxu1 %v4074_v23  ;;  %v650_v23 = vld [vmem:[%s4727_s17 + $0x158] sm:$0xff]  ;;  %v619_v48 = vld [vmem:[%s4727_s17 + $0x60] sm:$0xff]  ;;  %v672_v50 = vld [vmem:[%s4852_s22 + $0x8] sm:$0xff]  ;;  %v931_v53 = vpack.c.bf16 %v4849_v39, %v4843_v33  ;;  %s7360_s24 = smov (!%p599_p7, %s598_s24), 2  ;;  %p604_p8 = scmp.lt.s32.totalorder %s4416_s12, 3 }
  0x97   : > { %1173 = vmatprep.subr.bf16.mxu0 %v4075_v24  ;;  %4001 = vmatprep.subr.bf16.mxu1 %v4075_v24  ;;  %v4824_v24 = vsel %vm774_vm13, %v646_v51, %v838_v5  ;;  %vm778_vm5 = vcmp.gt.f32.partialorder %v650_v23, 0.0  ;;  %v842_v37 = vmul.f32 0.2, %v650_v23  ;;  %v674_v3 = vld [vmem:[%s4852_s22 + $0x18] sm:$0xff]  ;;  %v4107_v5 = vld [vmem:[%s4736_s21 + $0x80] ss:$8 sps:$4 sm:$0xff]  }
  0x98   : > { %vm747_vm10 = vcmp.gt.f32.partialorder %v619_v48, 0.0  ;;  %v703_v15 = vld [vmem:[%s4852_s22 + $0x100] sm:$0xff]  ;;  %vm782_vm13 = vcmp.gt.f32.partialorder %v654_v63, 0.0  ;;  %v626_v57 = vld [vmem:[%s4727_s17 + $0x98] sm:$0xff]  ;;  %v713_v18 = vld [vmem:[%s4852_s22 + $0x150] sm:$0xff]  ;;  %s3886_s25 = sshll.u32 %s7360_s24, 1 }
  0x99   : > { %v623_v58 = vld [vmem:[%s4727_s17 + $0x80] sm:$0xff]  ;;  %v714_v19 = vld [vmem:[%s4852_s22 + $0x158] sm:$0xff]  ;;  %s602_s28 = scalar_lea.vmem %s6993_s5, %s3886_s25  ;;  %s3988_s15 = sshll.u32 (%p4435_p1), %s4416_s12, 1 }
  0x9a   : > { %1174 = vmatpush1.bf16.msra.mxu0 %v4077_v25  ;;  %4017 = vmatpush1.bf16.msra.mxu1 %v4077_v25  ;;  %v4827_v25 = vsel %vm771_vm14, %v643_v54, %v835_v6  ;;  %vm751_vm2 = vcmp.gt.f32.partialorder %v623_v58, 0.0  ;;  %s605_s30 = scalar_select %p604_p8, %s4416_s12, 3 }
  0x9b   : > { %1175 = vmatprep.subr.bf16.mxu0 %v4078_v26  ;;  %4002 = vmatprep.subr.bf16.mxu1 %v4078_v26  ;;  %v4830_v26 = vsel %vm773_vm15, %v645_v55, %v837_v7  ;;  %v4872_v55 = vsel %vm778_vm5, %v650_v23, %v842_v37  ;;  %v811_v7 = vmul.f32 0.2, %v619_v48  ;;  %v1647_v23 = vmul.f32 %v674_v3, %v674_v3  ;;  %v4923_v3 = vld [vmem:[%s4727_s17 + $0x88] sm:$0xff]  ;;  %s3710_s19 = scalar_lea.vmem (%p4435_p1), %s6994_s6, %s3988_s15 }
  0x9c   : > { %v945_v47 = vpack.c.bf16 %v4830_v26, %v4827_v25  ;;  %s606_s0 = scalar_lea.vmem %s6995_s7, %s605_s30 }
  0x9d   : > { %v4907_v37 = vsel %vm747_vm10, %v619_v48, %v811_v7 }
  0x9e   : > { %1176 = vmatpush1.bf16.msra.mxu0 %v4080_v27  ;;  %4018 = vmatpush1.bf16.msra.mxu1 %v4080_v27  ;;  %v647_v27 = vld [vmem:[%s4727_s17 + $0x140] sm:$0xff] }
  0x9f   : > { %1177 = vmatprep.subr.bf16.mxu0 %v4081_v28  ;;  %4003 = vmatprep.subr.bf16.mxu1 %v4081_v28  ;;  %v649_v28 = vld [vmem:[%s4727_s17 + $0x150] sm:$0xff]  ;;  %v839_v40 = vmul.f32 0.2, %v647_v27  ;;  %vm775_vm6 = vcmp.gt.f32.partialorder %v647_v27, 0.0 }
  0xa0   : > { %v841_v41 = vmul.f32 0.2, %v649_v28  ;;  %vm777_vm7 = vcmp.gt.f32.partialorder %v649_v28, 0.0 }
  0xa2   : > { %1178 = vmatpush1.bf16.msra.mxu0 %v4083_v29  ;;  %4019 = vmatpush1.bf16.msra.mxu1 %v4083_v29  ;;  %v620_v29 = vld [vmem:[%s4727_s17 + $0x68] sm:$0xff] }
  0xa3   : > { %1179 = vmatprep.subr.bf16.mxu0 %v4084_v30  ;;  %4004 = vmatprep.subr.bf16.mxu1 %v4084_v30  ;;  %v4102_v30 = vld [vmem:[%s4736_s21 + $0x94] ss:$8 sps:$4 sm:$0xff]   ;;  %v812_v42 = vmul.f32 0.2, %v620_v29  ;;  %vm748_vm8 = vcmp.gt.f32.partialorder %v620_v29, 0.0 }
  0xa6   : > { %1180 = vmatpush2.bf16.msra.mxu0 %v4086_v31  ;;  %4020 = vmatpush2.bf16.msra.mxu1 %v4086_v31  ;;  %v4837_v31 = vsel %vm744_vm0, %v616_v59, %v808_v9  ;;  %v4876_v59 = vsel %vm775_vm6, %v647_v27, %v839_v40  ;;  %v1645_v9 = vmul.f32 %v672_v50, %v672_v50  ;;  %v704_v27 = vld [vmem:[%s4852_s22 + $0x108] sm:$0xff]  ;;  %v653_v40 = vld [vmem:[%s4727_s17 + $0x170] sm:$0xff]  ;;  %vm752_vm0 = vcmp.gt.f32.partialorder %v4923_v3, 0.0 }
  0xa7   : > { %1181 = vmatprep.subr.bf16.mxu0 %v4087_v32  ;;  %4005 = vmatprep.subr.bf16.mxu1 %v4087_v32  ;;  %v4840_v32 = vsel %vm746_vm1, %v618_v60, %v810_v14  ;;  %v4879_v60 = vsel %vm777_vm7, %v649_v28, %v841_v41  ;;  %v4894_v14 = vld [vmem:[%s4727_s17 + $0x160] sm:$0xff]  ;;  %v705_v28 = vld [vmem:[%s4852_s22 + $0x110] sm:$0xff]  ;;  %vm781_vm15 = vcmp.gt.f32.partialorder %v653_v40, 0.0  ;;  %vm754_vm1 = vcmp.gt.f32.partialorder %v626_v57, 0.0 }
  0xa8   : > { %v932_v51 = vpack.c.bf16 %v4840_v32, %v4837_v31  ;;  %v1708_v21 = vadd.f32 %v1645_v9, %v1644_v1  ;;  %vm779_vm14 = vcmp.gt.f32.partialorder %v4894_v14, 0.0  ;;  %v1678_v44 = vmul.f32 %v705_v28, %v705_v28  ;;  %v707_v1 = vld [vmem:[%s4852_s22 + $0x120] sm:$0xff]  ;;  %v678_v9 = vld [vmem:[%s4852_s22 + $0x38] sm:$0xff]  ;;  %v680_v28 = vld [vmem:[%s4852_s22 + $0x48] sm:$0xff] }
  0xa9   : > { %v1680_v62 = vmul.f32 %v707_v1, %v707_v1  ;;  %v655_v1 = vld [vmem:[%s4727_s17 + $0x180] sm:$0xff] }
  0xaa   : > { %1182 = vmatpush2.bf16.msra.mxu0 %v4089_v34  ;;  %4021 = vmatpush2.bf16.msra.mxu1 %v4089_v34  ;;  %v622_v34 = vld [vmem:[%s4727_s17 + $0x78] sm:$0xff]  ;;  %vm783_vm6 = vcmp.gt.f32.partialorder %v655_v1, 0.0 }
  0xab   : > { %1183 = vmatprep.subr.bf16.mxu0 %v4090_v36  ;;  %4006 = vmatprep.subr.bf16.mxu1 %v4090_v36  ;;  %v840_v36 = vmul.f32 0.2, %v648_v22  ;;  %vm750_vm9 = vcmp.gt.f32.partialorder %v622_v34, 0.0 }
  0xac   : > { %1709 = vadd.xlane.f32.xlu0 %v1708_v21  ;;  %v710_v21 = vld [vmem:[%s4852_s22 + $0x138] sm:$0xff] }
  0xad   : > { %v4869_v54 = vsel %vm776_vm4, %v648_v22, %v840_v36  ;;  %v1646_v22 = vmul.f32 %v673_v2, %v673_v2  ;;  %v676_v36 = vld [vmem:[%s4852_s22 + $0x28] sm:$0xff] }
  0xae   : > { %1184 = vmatpush2.bf16.msra.mxu0 %v4092_v43  ;;  %4022 = vmatpush2.bf16.msra.mxu1 %v4092_v43  ;;  %v814_v43 = vmul.f32 0.2, %v622_v34  ;;  %v948_v10 = vpack.c.bf16 %v4872_v55, %v4869_v54  ;;  %v708_v2 = vld [vmem:[%s4852_s22 + $0x128] sm:$0xff]  ;;  %v1649_v7 = vmul.f32 %v676_v36, %v676_v36  ;;  %v818_v36 = vmul.f32 0.2, %v626_v57  ;;  %v683_v55 = vld [vmem:[%s4852_s22 + $0x60] sm:$0xff] }
  0xaf   : > { %1185 = vmatprep.subr.bf16.mxu0 %v4093_v46  ;;  %4007 = vmatprep.subr.bf16.mxu1 %v4093_v46  ;;  %v946_v46 = vpack.c.bf16 %v4824_v24, %v4819_v20  ;;  %v1711_v41 = vadd.f32 %v1647_v23, %v1646_v22  ;;  %v4949_v22 = vld [vmem:[%s4727_s17 + $0x90] sm:$0xff]  ;;  %v816_v20 = vmul.f32 0.2, %v4923_v3  ;;  %v1683_v23 = vmul.f32 %v710_v21, %v710_v21 }
  0xb0   : > { %v4889_v6 = vsel %vm750_vm9, %v622_v34, %v814_v43  ;;  %v1677_v43 = vmul.f32 %v704_v27, %v704_v27  ;;  %v679_v27 = vld [vmem:[%s4852_s22 + $0x40] sm:$0xff]  ;;  %vm753_vm3 = vcmp.gt.f32.partialorder %v4949_v22, 0.0  ;;  %v4987_v21 = vsel %vm754_vm1, %v626_v57, %v818_v36  ;;  %v660_v36 = vld [vmem:[%s4727_s17 + $0x1a8] sm:$0xff] }
  0xb1   : > { %1712 = vadd.xlane.f32.xlu1 %v1711_v41  ;;  %v815_v41 = vmul.f32 0.2, %v623_v58  ;;  %v1687_v54 = vmul.f32 %v714_v19, %v714_v19  ;;  %v659_v19 = vld [vmem:[%s4727_s17 + $0x1a0] sm:$0xff] }
  0xb2   : > { %1186 = vmatpush2.bf16.msra.mxu0 %v4095_v56  ;;  %4023 = vmatpush2.bf16.msra.mxu1 %v4095_v56  ;;  %v652_v56 = vld [vmem:[%s4727_s17 + $0x168] sm:$0xff] }
  0xb3   : > { %1187 = vmatprep.subr.bf16.mxu0 %v4096_v61  ;;  %4008 = vmatprep.subr.bf16.mxu1 %v4096_v61  ;;  %v4882_v61 = vsel %vm748_vm8, %v620_v29, %v812_v42  ;;  %v706_v29 = vld [vmem:[%s4852_s22 + $0x118] sm:$0xff]  ;;  %vm780_vm12 = vcmp.gt.f32.partialorder %v652_v56, 0.0  ;;  %v1676_v42 = vmul.f32 %v703_v15, %v703_v15 }
  0xb4   : > { %v934_v34 = vpack.c.bf16 %v4889_v6, %v4882_v61  ;;  %v1679_v50 = vmul.f32 %v706_v29, %v706_v29 }
  0xb6   : > { %1188 = vmatpush2.bf16.msra.mxu0 %v4098_v8  ;;  %4024 = vmatpush2.bf16.msra.mxu1 %v4098_v8  ;;  %v813_v8 = vmul.f32 0.2, %v621_v49  ;;  %v1759_v15 = vadd.f32 %v1679_v50, %v1678_v44  ;;  %v656_v44 = vld [vmem:[%s4727_s17 + $0x188] sm:$0xff]  ;;  %v658_v50 = vld [vmem:[%s4727_s17 + $0x198] sm:$0xff] }
  0xb7   : > { %1189 = vmatprep.subr.bf16.mxu0 %v4099_v11  ;;  %4009 = vmatprep.subr.bf16.mxu1 %v4099_v11  ;;  %v844_v11 = vmul.f32 0.2, %v652_v56  ;;  %vm784_vm4 = vcmp.gt.f32.partialorder %v656_v44, 0.0  ;;  %vm786_vm5 = vcmp.gt.f32.partialorder %v658_v50, 0.0  ;;  %v848_v25 = vmul.f32 0.2, %v656_v44 }
  0xb8   : > { %1760 = vadd.xlane.f32.xlu1 %v1759_v15  ;;  %v682_v15 = vld [vmem:[%s4852_s22 + $0x58] sm:$0xff]  ;;  %v850_v26 = vmul.f32 0.2, %v658_v50 }
  0xb9   : > { %v4917_v48 = vsel %vm780_vm12, %v652_v56, %v844_v11  ;;  %v843_v56 = vmul.f32 0.2, %v4894_v14  ;;  %v1756_v11 = vadd.f32 %v1677_v43, %v1676_v42  ;;  %v711_v42 = vld [vmem:[%s4852_s22 + $0x140] sm:$0xff]  ;;  %v712_v43 = vld [vmem:[%s4852_s22 + $0x148] sm:$0xff]  ;;  %vm788_vm12 = vcmp.gt.f32.partialorder %v660_v36, 0.0 }
  0xba   : > { %1190 = vmatpush2.bf16.msra.mxu0 %v4101_v17  ;;  %4025 = vmatpush2.bf16.msra.mxu1 %v4101_v17  ;;  %v846_v17 = vmul.f32 0.2, %v654_v63 }
  0xbb   : > { %1191 = vmatprep.subr.bf16.mxu0 %v4102_v30  ;;  %4010 = vmatprep.subr.bf16.mxu1 %v4102_v30  ;;  %v947_v30 = vpack.c.bf16 %v4879_v60, %v4876_v59  ;;  %v4957_v29 = vsel %vm779_vm14, %v4894_v14, %v843_v56  ;;  %v817_v14 = vmul.f32 0.2, %v4949_v22  ;;  %v1684_v56 = vmul.f32 %v711_v42, %v711_v42 }
  0xbc   : > { %1757 = vadd.xlane.f32.xlu0 %v1756_v11  ;;  %v681_v11 = vld [vmem:[%s4852_s22 + $0x50] sm:$0xff]  ;;  %v1656_v42 = vmul.f32 %v683_v55, %v683_v55  ;;  %v851_v55 = vmul.f32 0.2, %v659_v19  ;;  %vm787_vm14 = vcmp.gt.f32.partialorder %v659_v19, 0.0 }
  0xbd   : > { %v1654_v57 = vmul.f32 %v681_v11, %v681_v11 }
  0xbe   : > { %1192 = vmatpush2.bf16.msra.mxu0 %v4104_v35  ;;  %4026 = vmatpush2.bf16.msra.mxu1 %v4104_v35  ;;  %v675_v35 = vld [vmem:[%s4852_s22 + $0x20] sm:$0xff] }
  0xbf   : > { %1193 = vmatprep.subr.bf16.mxu0 %v4105_v38  ;;  %4011 = vmatprep.subr.bf16.mxu1 %v4105_v38  ;;  %v4910_v38 = vsel %vm749_vm11, %v621_v49, %v813_v8  ;;  %v4920_v49 = vsel %vm782_vm13, %v654_v63, %v846_v17  ;;  %v677_v8 = vld [vmem:[%s4852_s22 + $0x30] sm:$0xff]  ;;  %v845_v63 = vmul.f32 0.2, %v653_v40 }
  0xc0   : > { %v709_v17 = vld [vmem:[%s4852_s22 + $0x130] sm:$0xff]  ;;  %v933_v52 = vpack.c.bf16 %v4910_v38, %v4907_v37  ;;  %v1650_v4 = vmul.f32 %v677_v8, %v677_v8 }
  0xc1   : > { %v657_v8 = vld [vmem:[%s4727_s17 + $0x190] sm:$0xff] }
  0xc2   : > { %1194 = vmatpush2.bf16.msra.mxu0 %v4107_v5  ;;  %4027 = vmatpush2.bf16.msra.mxu1 %v4107_v5  ;;  %v1648_v5 = vmul.f32 %v675_v35, %v675_v35  ;;  %v4960_v35 = vsel %vm781_vm15, %v653_v40, %v845_v63  ;;  %v1685_v63 = vmul.f32 %v712_v43, %v712_v43  ;;  %v849_v31 = vmul.f32 0.2, %v657_v8 }
  0xc3   : > { %vm785_vm7 = vcmp.gt.f32.partialorder %v657_v8, 0.0 }
  0xc4   : > { %v1714_v0 = vadd.f32 %v1649_v7, %v1648_v5  ;;  %v1653_v5 = vmul.f32 %v680_v28, %v680_v28  ;;  %v949_v7 = vpack.c.bf16 %v4960_v35, %v4957_v29  ;;  %v1768_v32 = vadd.f32 %v1685_v63, %v1684_v56  ;;  %v629_v28 = vld [vmem:[%s4727_s17 + $0xb0] sm:$0xff]  ;;  %v718_v63 = vld [vmem:[%s4852_s22 + $0x178] sm:$0xff]  ;;  %v664_v35 = vld [vmem:[%s4727_s17 + $0x1c8] sm:$0xff] }
  0xc5   : > { %1196 = vmatmul.mubr.bf16.vlgmr.msra.gmra.mxu0 %v927_v12  ;;  %1276 = vmatmul.mubr.bf16.vlgmr.msra.gmra.mxu1 %v943_v13  ;;  %v1681_v12 = vmul.f32 %v708_v2, %v708_v2  ;;  %v950_v13 = vpack.c.bf16 %v4920_v49, %v4917_v48  ;;  %v1652_v2 = vmul.f32 %v679_v27, %v679_v27  ;;  %v627_v27 = vld [vmem:[%s4727_s17 + $0xa0] sm:$0xff]  ;;  %vm757_vm11 = vcmp.gt.f32.partialorder %v629_v28, 0.0  ;;  %v717_v56 = vld [vmem:[%s4852_s22 + $0x170] sm:$0xff] }
  0xc6   : > { %1205 = vmatprep.mubr.bf16.mxu0 %v930_v16  ;;  %1285 = vmatprep.mubr.bf16.mxu1 %v946_v46  ;;  %v1651_v16 = vmul.f32 %v678_v9, %v678_v9  ;;  %v1682_v46 = vmul.f32 %v709_v17, %v709_v17  ;;  %v4984_v17 = vsel %vm752_vm0, %v4923_v3, %v816_v20  ;;  %v716_v20 = vld [vmem:[%s4852_s22 + $0x168] sm:$0xff]  ;;  %vm755_vm10 = vcmp.gt.f32.partialorder %v627_v27, 0.0  ;;  %v687_v49 = vld [vmem:[%s4852_s22 + $0x80] sm:$0xff]  ;;  %v5097_v29 = vld [vmem:[%s4727_s17 + $0xd0] sm:$0xff] }
  0xc7   : > { %v1762_v24 = vadd.f32 %v1681_v12, %v1680_v62  ;;  %1715 = vadd.xlane.f32.xlu0 %v1714_v0  ;;  %v4990_v62 = vsel %vm751_vm2, %v623_v58, %v815_v41  ;;  %v628_v12 = vld [vmem:[%s4727_s17 + $0xa8] sm:$0xff]  ;;  %v1720_v3 = vadd.f32 %v1653_v5, %v1652_v2  ;;  %v1655_v58 = vmul.f32 %v682_v15, %v682_v15  ;;  %v685_v5 = vld [vmem:[%s4852_s22 + $0x70] sm:$0xff] }
  0xc8   : > { %v1717_v40 = vadd.f32 %v1651_v16, %v1650_v4  ;;  %v1765_v9 = vadd.f32 %v1683_v23, %v1682_v46  ;;  %v5007_v0 = vsel %vm753_vm3, %v4949_v22, %v817_v14  ;;  %vm756_vm8 = vcmp.gt.f32.partialorder %v628_v12, 0.0  ;;  %v715_v16 = vld [vmem:[%s4852_s22 + $0x160] sm:$0xff]  ;;  %v662_v14 = vld [vmem:[%s4727_s17 + $0x1b8] sm:$0xff] }
  0xc9   : > { %1763 = vadd.xlane.f32.xlu1 %v1762_v24  ;;  %v820_v4 = vmul.f32 0.2, %v628_v12  ;;  %v5012_v24 = vsel %vm784_vm4, %v656_v44, %v848_v25  ;;  %v5015_v46 = vsel %vm786_vm5, %v658_v50, %v850_v26  ;;  %v1723_v41 = vadd.f32 %v1655_v58, %v1654_v57  ;;  %v719_v25 = vld [vmem:[%s4852_s22 + $0x180] sm:$0xff]  ;;  %v720_v26 = vld [vmem:[%s4852_s22 + $0x188] sm:$0xff] }
  0xca   : > { %v5024_v44 = vsel %vm785_vm7, %v657_v8, %v849_v31  ;;  %v1689_v2 = vmul.f32 %v716_v20, %v716_v20  ;;  %v819_v8 = vmul.f32 0.2, %v627_v27  ;;  %v821_v39 = vmul.f32 0.2, %v629_v28  ;;  %v632_v58 = vld [vmem:[%s4727_s17 + $0xc8] sm:$0xff]  ;;  %v634_v31 = vld [vmem:[%s4727_s17 + $0xd8] sm:$0xff] }
  0xcb   : > { %1718 = vadd.xlane.f32.xlu0 %v1717_v40  ;;  %v1688_v40 = vmul.f32 %v715_v16, %v715_v16  ;;  %v854_v59 = vmul.f32 0.2, %v662_v14  ;;  %v1658_v61 = vmul.f32 %v685_v5, %v685_v5  ;;  %vm790_vm13 = vcmp.gt.f32.partialorder %v662_v14, 0.0  ;;  %v723_v5 = vld [vmem:[%s4852_s22 + $0x1a0] sm:$0xff] }
  0xcc   : > { %v1691_v48 = vmul.f32 %v718_v63, %v718_v63  ;;  %v936_v11 = vpack.c.bf16 %v4987_v21, %v4984_v17  ;;  %v935_v15 = vpack.c.bf16 %v5007_v0, %v4990_v62  ;;  %v5068_v17 = vsel %vm757_vm11, %v629_v28, %v821_v39  ;;  %v721_v28 = vld [vmem:[%s4852_s22 + $0x190] sm:$0xff]  ;;  %v691_v63 = vld [vmem:[%s4852_s22 + $0xa0] sm:$0xff]  ;;  %v692_v39 = vld [vmem:[%s4852_s22 + $0xa8] sm:$0xff] }
  0xcd   : > { %1206 = vmatmul.mubr.bf16.gmra.mxu0 %v929_v45  ;;  %1286 = vmatmul.mubr.bf16.gmra.mxu1 %v945_v47  ;;  %v847_v45 = vmul.f32 0.2, %v655_v1  ;;  %v630_v47 = vld [vmem:[%s4727_s17 + $0xb8] sm:$0xff]  ;;  %v5075_v57 = vsel %vm790_vm13, %v662_v14, %v854_v59  ;;  %v1692_v16 = vmul.f32 %v719_v25, %v719_v25  ;;  %v1693_v20 = vmul.f32 %v720_v26, %v720_v26  ;;  %v725_v62 = vld [vmem:[%s4852_s22 + $0x1b0] sm:$0xff] }
  0xce   : > { %1215 = vmatprep.mubr.bf16.mxu0 %v932_v51  ;;  %1295 = vmatprep.mubr.bf16.mxu1 %v948_v10  ;;  %v1686_v51 = vmul.f32 %v713_v18, %v713_v18  ;;  %v684_v10 = vld [vmem:[%s4852_s22 + $0x68] sm:$0xff]  ;;  %vm758_vm9 = vcmp.gt.f32.partialorder %v630_v47, 0.0  ;;  %v822_v23 = vmul.f32 0.2, %v630_v47  ;;  %vm760_vm0 = vcmp.gt.f32.partialorder %v632_v58, 0.0  ;;  %v666_v14 = vld [vmem:[%s4727_s17 + $0x1d8] sm:$0xff] }
  0xcf   : > { %1766 = vadd.xlane.f32.xlu1 %v1765_v9  ;;  %v5020_v22 = vsel %vm783_vm6, %v655_v1, %v847_v45  ;;  %1721 = vadd.xlane.f32.xlu0 %v1720_v3  ;;  %v1657_v43 = vmul.f32 %v684_v10, %v684_v10  ;;  %v686_v9 = vld [vmem:[%s4852_s22 + $0x78] sm:$0xff]  ;;  %v5036_v1 = vsel %vm756_vm8, %v628_v12, %v820_v4  ;;  %v661_v3 = vld [vmem:[%s4727_s17 + $0x1b0] sm:$0xff]  ;;  %v5080_v10 = vld [vmem:[%s4727_s17 + $0xc0] sm:$0xff]  ;;  %v824_v38 = vmul.f32 0.2, %v632_v58 }
  0xd0   : > { %v1771_v50 = vadd.f32 %v1687_v54, %v1686_v51  ;;  %v5047_v33 = vsel %vm758_vm9, %v630_v47, %v822_v23  ;;  %v1659_v6 = vmul.f32 %v686_v9, %v686_v9  ;;  %v952_v12 = vpack.c.bf16 %v5015_v46, %v5012_v24  ;;  %v689_v24 = vld [vmem:[%s4852_s22 + $0x90] sm:$0xff]  ;;  %v690_v46 = vld [vmem:[%s4852_s22 + $0x98] sm:$0xff]  ;;  %v724_v9 = vld [vmem:[%s4852_s22 + $0x1a8] sm:$0xff] }
  0xd1   : > { %v1726_v60 = vadd.f32 %v1657_v43, %v1656_v42  ;;  %v951_v18 = vpack.c.bf16 %v5024_v44, %v5020_v22  ;;  %v938_v45 = vpack.c.bf16 %v5047_v33, %v5036_v1  ;;  %v5065_v47 = vsel %vm755_vm10, %v627_v27, %v819_v8  ;;  %v694_v25 = vld [vmem:[%s4852_s22 + $0xb8] sm:$0xff] }
  0xd2   : > { %v1660_v51 = vmul.f32 %v687_v49, %v687_v49  ;;  %v937_v23 = vpack.c.bf16 %v5068_v17, %v5065_v47  ;;  %vm789_vm15 = vcmp.gt.f32.partialorder %v661_v3, 0.0  ;;  %v853_v27 = vmul.f32 0.2, %v661_v3  ;;  %v726_v0 = vld [vmem:[%s4852_s22 + $0x1b8] sm:$0xff] }
  0xd3   : > { %1769 = vadd.xlane.f32.xlu1 %v1768_v32  ;;  %1724 = vadd.xlane.f32.xlu0 %v1723_v41  ;;  %v1729_v32 = vadd.f32 %v1659_v6, %v1658_v61  ;;  %vm762_vm1 = vcmp.gt.f32.partialorder %v634_v31, 0.0  ;;  %v1662_v41 = vmul.f32 %v689_v24, %v689_v24  ;;  %v1663_v42 = vmul.f32 %v690_v46, %v690_v46  ;;  %v5121_v6 = vld [vmem:[%s4727_s17 + $0x1c0] sm:$0xff] }
  0xd4   : > { %v5101_v43 = vsel %vm787_vm14, %v659_v19, %v851_v55  ;;  %v5107_v8 = vsel %vm789_vm15, %v661_v3, %v853_v27  ;;  %vm759_vm2 = vcmp.gt.f32.partialorder %v5080_v10, 0.0  ;;  %vm761_vm3 = vcmp.gt.f32.partialorder %v5097_v29, 0.0  ;;  %v693_v19 = vld [vmem:[%s4852_s22 + $0xb0] sm:$0xff]  ;;  %v695_v46 = vld [vmem:[%s4852_s22 + $0xc0] sm:$0xff]  ;;  %v696_v27 = vld [vmem:[%s4852_s22 + $0xc8] sm:$0xff] }
  0xd5   : > { %1216 = vmatmul.mubr.bf16.gmra.mxu0 %v931_v53  ;;  %1296 = vmatmul.mubr.bf16.gmra.mxu1 %v947_v30  ;;  %v852_v53 = vmul.f32 0.2, %v660_v36  ;;  %v1774_v30 = vadd.f32 %v1689_v2, %v1688_v40  ;;  %v1694_v40 = vmul.f32 %v721_v28, %v721_v28  ;;  %vm792_vm4 = vcmp.gt.f32.partialorder %v664_v35, 0.0 }
  0xd6   : > { %1225 = vmatprep.mubr.bf16.mxu0 %v934_v34  ;;  %1305 = vmatprep.mubr.bf16.mxu1 %v950_v13  ;;  %v1690_v34 = vmul.f32 %v717_v56, %v717_v56  ;;  %v688_v13 = vld [vmem:[%s4852_s22 + $0x88] sm:$0xff]  ;;  %v823_v56 = vmul.f32 0.2, %v5080_v10  ;;  %v858_v61 = vmul.f32 0.2, %v666_v14  ;;  %v1697_v49 = vmul.f32 %v724_v9, %v724_v9  ;;  %v637_v9 = vld [vmem:[%s4727_s17 + $0xf0] sm:$0xff] }
  0xd7   : > { %1772 = vadd.xlane.f32.xlu1 %v1771_v50  ;;  %v5071_v21 = vsel %vm788_vm12, %v660_v36, %v852_v53  ;;  %1727 = vadd.xlane.f32.xlu0 %v1726_v60  ;;  %v1661_v54 = vmul.f32 %v688_v13, %v688_v13  ;;  %v722_v36 = vld [vmem:[%s4852_s22 + $0x198] sm:$0xff]  ;;  %v1780_v50 = vadd.f32 %v1693_v20, %v1692_v16  ;;  %v856_v60 = vmul.f32 0.2, %v664_v35  ;;  %v728_v16 = vld [vmem:[%s4852_s22 + $0x1c8] sm:$0xff] }
  0xd8   : > { %v1777_v4 = vadd.f32 %v1691_v48, %v1690_v34  ;;  %v954_v37 = vpack.c.bf16 %v5075_v57, %v5071_v21  ;;  %v1695_v2 = vmul.f32 %v722_v36, %v722_v36  ;;  %v5115_v53 = vsel %vm760_vm0, %v632_v58, %v824_v38  ;;  %v5169_v38 = vld [vmem:[%s4727_s17 + $0xe0] sm:$0xff] }
  0xd9   : > { %v1735_v34 = vadd.f32 %v1663_v42, %v1662_v41  ;;  %v1696_v48 = vmul.f32 %v723_v5, %v723_v5  ;;  %vm794_vm5 = vcmp.gt.f32.partialorder %v666_v14, 0.0  ;;  %v953_v26 = vpack.c.bf16 %v5107_v8, %v5101_v43  ;;  %v729_v8 = vld [vmem:[%s4852_s22 + $0x1d0] sm:$0xff] }
  0xda   : > { %v1783_v13 = vadd.f32 %v1695_v2, %v1694_v40  ;;  %v825_v3 = vmul.f32 0.2, %v5097_v29  ;;  %v5142_v57 = vsel %vm759_vm2, %v5080_v10, %v823_v56  ;;  %v920_v22 = vsel %vm792_vm4, %v664_v35, %v856_v60  ;;  %v730_v56 = vld [vmem:[%s4852_s22 + $0x1d8] sm:$0xff] }
  0xdb   : > { %1775 = vadd.xlane.f32.xlu1 %v1774_v30  ;;  %1730 = vadd.xlane.f32.xlu0 %v1729_v32  ;;  %v5124_v30 = vld [vmem:[%s4727_s17 + $0x1d0] sm:$0xff]  ;;  %vm791_vm6 = vcmp.gt.f32.partialorder %v5121_v6, 0.0  ;;  %v855_v44 = vmul.f32 0.2, %v5121_v6  ;;  %v922_v58 = vsel %vm794_vm5, %v666_v14, %v858_v61  ;;  %v1786_v1 = vadd.f32 %v1697_v49, %v1696_v48  ;;  %v731_v48 = vld [vmem:[%s4852_s22 + $0x1e0] sm:$0xff]  ;;  %v732_v49 = vld [vmem:[%s4852_s22 + $0x1e8] sm:$0xff] }
  0xdc   : > { %vm793_vm7 = vcmp.gt.f32.partialorder %v5124_v30, 0.0  ;;  %v1666_v33 = vmul.f32 %v693_v19, %v693_v19  ;;  %v857_v32 = vmul.f32 0.2, %v5124_v30  ;;  %v1698_v55 = vmul.f32 %v725_v62, %v725_v62  ;;  %v697_v14 = vld [vmem:[%s4852_s22 + $0xd0] sm:$0xff] }
  0xdd   : > { %1226 = vmatmul.mubr.bf16.gmra.mxu0 %v933_v52  ;;  %1306 = vmatmul.mubr.bf16.gmra.mxu1 %v949_v7  ;;  %v826_v52 = vmul.f32 0.2, %v634_v31  ;;  %v1732_v7 = vadd.f32 %v1661_v54, %v1660_v51  ;;  %v670_v51 = vld [vmem:[%s4727_s17 + $0x1f8] sm:$0xff]  ;;  %v1699_v10 = vmul.f32 %v726_v0, %v726_v0  ;;  %v5164_v20 = vsel %vm761_vm3, %v5097_v29, %v825_v3 }
  0xde   : > { %1235 = vmatprep.mubr.bf16.mxu0 %v936_v11  ;;  %1315 = vmatprep.mubr.bf16.mxu1 %v952_v12  ;;  %v1664_v11 = vmul.f32 %v691_v63, %v691_v63  ;;  %v1665_v12 = vmul.f32 %v692_v39, %v692_v39  ;;  %v956_v28 = vpack.c.bf16 %v922_v58, %v920_v22  ;;  %vm798_vm11 = vcmp.gt.f32.partialorder %v670_v51, 0.0  ;;  %v667_v39 = vld [vmem:[%s4727_s17 + $0x1e0] sm:$0xff]  ;;  %v701_v58 = vld [vmem:[%s4852_s22 + $0xf0] sm:$0xff] }
  0xdf   : > { %1778 = vadd.xlane.f32.xlu1 %v1777_v4  ;;  %v5118_v59 = vsel %vm762_vm1, %v634_v31, %v826_v52  ;;  %1733 = vadd.xlane.f32.xlu0 %v1732_v7  ;;  %v668_v31 = vld [vmem:[%s4727_s17 + $0x1e8] sm:$0xff]  ;;  %v727_v4 = vld [vmem:[%s4852_s22 + $0x1c0] sm:$0xff]  ;;  %v862_v52 = vmul.f32 0.2, %v670_v51  ;;  %v1701_v7 = vmul.f32 %v728_v16, %v728_v16  ;;  %v1789_v41 = vadd.f32 %v1699_v10, %v1698_v55 }
  0xe0   : > { %v940_v21 = vpack.c.bf16 %v5118_v59, %v5115_v53  ;;  %v1738_v54 = vadd.f32 %v1665_v12, %v1664_v11  ;;  %vm796_vm10 = vcmp.gt.f32.partialorder %v668_v31, 0.0  ;;  %v1700_v29 = vmul.f32 %v727_v4, %v727_v4  ;;  %v669_v53 = vld [vmem:[%s4727_s17 + $0x1f0] sm:$0xff] }
  0xe1   : > { %v1668_v42 = vmul.f32 %v695_v46, %v695_v46  ;;  %v1669_v43 = vmul.f32 %v696_v27, %v696_v27  ;;  %v939_v40 = vpack.c.bf16 %v5164_v20, %v5142_v57  ;;  %v919_v2 = vsel %vm791_vm6, %v5121_v6, %v855_v44 }
  0xe2   : > { %v921_v5 = vsel %vm793_vm7, %v5124_v30, %v857_v32  ;;  %vm763_vm12 = vcmp.gt.f32.partialorder %v5169_v38, 0.0  ;;  %v926_v63 = vsel %vm798_vm11, %v670_v51, %v862_v52  ;;  %v1792_v59 = vadd.f32 %v1701_v7, %v1700_v29 }
  0xe3   : > { %1781 = vadd.xlane.f32.xlu1 %v1780_v50  ;;  %1736 = vadd.xlane.f32.xlu0 %v1735_v34  ;;  %v698_v50 = vld [vmem:[%s4852_s22 + $0xd8] sm:$0xff]  ;;  %v1670_v60 = vmul.f32 %v697_v14, %v697_v14  ;;  %vm765_vm13 = vcmp.gt.f32.partialorder %v637_v9, 0.0  ;;  %v1744_v6 = vadd.f32 %v1669_v43, %v1668_v42  ;;  %v1702_v30 = vmul.f32 %v729_v8, %v729_v8  ;;  %v991_v43 = vld [vmem:[%s602_s28] sm:$0x3] }
  0xe4   : > { %v1671_v61 = vmul.f32 %v698_v50, %v698_v50  ;;  %v1703_v34 = vmul.f32 %v730_v56, %v730_v56  ;;  %v827_v12 = vmul.f32 0.2, %v5169_v38  ;;  %v829_v19 = vmul.f32 0.2, %v637_v9 }
  0xe5   : > { %1236 = vmatmul.mubr.bf16.gmra.mxu0 %v935_v15  ;;  %1316 = vmatmul.mubr.bf16.gmra.mxu1 %v951_v18  ;;  %v636_v15 = vld [vmem:[%s4727_s17 + $0xe8] sm:$0xff]  ;;  %v638_v18 = vld [vmem:[%s4727_s17 + $0xf8] sm:$0xff]  ;;  %vm795_vm14 = vcmp.gt.f32.partialorder %v667_v39, 0.0  ;;  %v859_v3 = vmul.f32 0.2, %v667_v39  ;;  %vm797_vm15 = vcmp.gt.f32.partialorder %v669_v53, 0.0  ;;  %v1704_v0 = vmul.f32 %v731_v48, %v731_v48 }
  0xe6   : > { %1245 = vmatprep.mubr.bf16.mxu0 %v938_v45  ;;  %1325 = vmatprep.mubr.bf16.mxu1 %v954_v37  ;;  %v1667_v45 = vmul.f32 %v694_v25, %v694_v25  ;;  %vm764_vm8 = vcmp.gt.f32.partialorder %v636_v15, 0.0  ;;  %vm766_vm9 = vcmp.gt.f32.partialorder %v638_v18, 0.0  ;;  %v828_v24 = vmul.f32 0.2, %v636_v15  ;;  %v699_v25 = vld [vmem:[%s4852_s22 + $0xe0] sm:$0xff] }
  0xe7   : > { %1784 = vadd.xlane.f32.xlu1 %v1783_v13  ;;  %v830_v36 = vmul.f32 0.2, %v638_v18  ;;  %v860_v37 = vmul.f32 0.2, %v668_v31  ;;  %1787 = vadd.xlane.f32.xlu0 %v1786_v1  ;;  %v955_v13 = vpack.c.bf16 %v921_v5, %v919_v2  ;;  %v861_v57 = vmul.f32 0.2, %v669_v53 }
  0xe8   : > { %v1741_v35 = vadd.f32 %v1667_v45, %v1666_v33  ;;  %v892_v47 = vsel %vm764_vm8, %v636_v15, %v828_v24  ;;  %v1747_v62 = vadd.f32 %v1671_v61, %v1670_v60  ;;  %v1705_v22 = vmul.f32 %v732_v49, %v732_v49  ;;  %v733_v33 = vld [vmem:[%s4852_s22 + $0x1f0] sm:$0xff]  ;;  %v734_v45 = vld [vmem:[%s4852_s22 + $0x1f8] sm:$0xff] }
  0xe9   : > { %v894_v17 = vsel %vm766_vm9, %v638_v18, %v830_v36  ;;  %v1795_v44 = vadd.f32 %v1703_v34, %v1702_v30  ;;  %v1672_v15 = vmul.f32 %v699_v25, %v699_v25  ;;  %v891_v1 = vsel %vm763_vm12, %v5169_v38, %v827_v12 }
  0xea   : > { %v942_v11 = vpack.c.bf16 %v894_v17, %v892_v47  ;;  %v893_v32 = vsel %vm765_vm13, %v637_v9, %v829_v19  ;;  %v923_v51 = vsel %vm795_vm14, %v667_v39, %v859_v3  ;;  %v1798_v55 = vadd.f32 %v1705_v22, %v1704_v0 }
  0xeb   : > { %1739 = vadd.xlane.f32.xlu1 %v1738_v54  ;;  %1742 = vadd.xlane.f32.xlu0 %v1741_v35  ;;  %v925_v54 = vsel %vm797_vm15, %v669_v53, %v861_v57  ;;  %v1674_v10 = vmul.f32 %v701_v58, %v701_v58  ;;  %v1706_v20 = vmul.f32 %v733_v33, %v733_v33  ;;  %v1935_v52 = vstv %s1934_s23 }
  0xec   : > { %v1707_v24 = vmul.f32 %v734_v45, %v734_v45  ;;  %v941_v46 = vpack.c.bf16 %v893_v32, %v891_v1  ;;  %v957_v27 = vpack.c.bf16 %v925_v54, %v923_v51  ;;  %v6997_v35 = vmov 0.0  }
  0xed   : > { %1246 = vmatmul.mubr.bf16.gmra.mxu0 %v937_v23  ;;  %1326 = vmatmul.mubr.bf16.gmra.mxu1 %v953_v26  ;;  %v924_v23 = vsel %vm796_vm10, %v668_v31, %v860_v37  ;;  %v700_v26 = vld [vmem:[%s4852_s22 + $0xe8] sm:$0xff]  ;;  %v702_v31 = vld [vmem:[%s4852_s22 + $0xf8] sm:$0xff]  ;;  %v993_v37 = vlaneseq  ;;  %vm2142_vm3 = vcmask 130112   ;;  %vm2149_vm4 = vcmask 195712  }
  0xee   : > { %1255 = vmatprep.mubr.bf16.mxu0 %v940_v21  ;;  %1335 = vmatprep.mubr.bf16.mxu1 %v956_v28  ;;  %v958_v21 = vpack.c.bf16 %v926_v63, %v924_v23  ;;  %v1673_v18 = vmul.f32 %v700_v26, %v700_v26  ;;  %v1675_v4 = vmul.f32 %v702_v31, %v702_v31  ;;  %vm2156_vm7 = vcmask 261312  }
  0xef   : > { %1790 = vadd.xlane.f32.xlu1 %v1789_v41  ;;  %1793 = vadd.xlane.f32.xlu0 %v1792_v59  ;;  %v1801_v36 = vadd.f32 %v1707_v24, %v1706_v20  ;;  %v5210_v38 = vand.u32 127, %v993_v37  ;;  %v5215_v7 = vshrl.u32 %v993_v37, 7  ;;  %vm2163_vm11 = vcmask 326912  }
  0xf0   : > { %v1750_v16 = vadd.f32 %v1673_v18, %v1672_v15  ;;  %v1753_v28 = vadd.f32 %v1675_v4, %v1674_v10 }
  0xf1   : > { %7073 = vst [vmem:[#allocation9_spill] sm:$0xff] %v5210_v38  ;;  %vm1936_vm0 = vcmp.lt.s32.totalorder %v5210_v38, %v1935_v52  ;;  %7074 = vst [vmem:[#allocation10_spill] sm:$0xff] %v5215_v7  ;;  %v5221_v41 = vsub.s32 0, %v5215_v7  ;;  %v5224_v42 = vsub.s32 1, %v5215_v7 }
  0xf2   : > { %v3919_v29 = vsel %vm1936_vm0, 1.0, %v6997_v35 }
  0xf3   : > { %1745 = vadd.xlane.f32.xlu1 %v1744_v6  ;;  %1748 = vadd.xlane.f32.xlu0 %v1747_v62  ;;  %7075 = vst [vmem:[#allocation11_spill] sm:$0xff] %v5221_v41  ;;  %7076 = vst [vmem:[#allocation12_spill] sm:$0xff] %v5224_v42  ;;  %v5227_v14 = vrot.slane %v991_v43, %v5221_v41  ;;  %v5230_v50 = vrot.slane %v991_v43, %v5224_v42 }
  0xf5   : > { %1256 = vmatmul.mubr.bf16.gmra.mxu0 %v939_v40  ;;  %1336 = vmatmul.mubr.bf16.gmra.mxu1 %v955_v13 }
  0xf6   : > { %1265 = vmatprep.mubr.bf16.mxu0 %v942_v11  ;;  %1345 = vmatprep.mubr.bf16.mxu1 %v958_v21 }
  0xf7   : > { %1796 = vadd.xlane.f32.xlu1 %v1795_v44  ;;  %1799 = vadd.xlane.f32.xlu0 %v1798_v55 }
  0xfb   : > { %1751 = vadd.xlane.f32.xlu1 %v1750_v16  ;;  %1754 = vadd.xlane.f32.xlu0 %v1753_v28 }
  0xfd   : > { %1266 = vmatmul.mubr.bf16.gmra.mxu0 %v941_v46  ;;  %1346 = vmatmul.mubr.bf16.gmra.mxu1 %v957_v27 }
  0xff   : > { %1802 = vadd.xlane.f32.xlu1 %v1801_v36 }
 0x110   : > { %3290 = vbcast.lane.b32.xlu1 %v3919_v29, 264 }
 0x111   : > { %3286 = vbcast.lane.b32.xlu0 %v3919_v29, 256 }
 0x114   : > { %3294 = vbcast.lane.b32.xlu1 %v3919_v29, 272 }
 0x115   : > { %3302 = vbcast.lane.b32.xlu0 %v3919_v29, 288 }
 0x118   : > { %3298 = vbcast.lane.b32.xlu1 %v3919_v29, 280 }
 0x119   : > { %3310 = vbcast.lane.b32.xlu0 %v3919_v29, 304 }
 0x11c   : > { %3306 = vbcast.lane.b32.xlu1 %v3919_v29, 296 }
 0x11d   : > { %3318 = vbcast.lane.b32.xlu0 %v3919_v29, 320 }
 0x120   : > { %3314 = vbcast.lane.b32.xlu1 %v3919_v29, 312 }
 0x121   : > { %3326 = vbcast.lane.b32.xlu0 %v3919_v29, 336 }
 0x124   : > { %3322 = vbcast.lane.b32.xlu1 %v3919_v29, 328 }
 0x125   : > { %3334 = vbcast.lane.b32.xlu0 %v3919_v29, 352 }
 0x128   : > { %3330 = vbcast.lane.b32.xlu1 %v3919_v29, 344 }
 0x129   : > { %3342 = vbcast.lane.b32.xlu0 %v3919_v29, 368 }
 0x12c   : > { %3338 = vbcast.lane.b32.xlu1 %v3919_v29, 360 }
 0x130   : > { %3346 = vbcast.lane.b32.xlu1 %v3919_v29, 376 }
 0x135   : > { %v5278_v22 = vpop.xlane.xlu0 %1709 }
 0x13a   : > { %v5232_v5 = vpop.xlane.xlu1 %1712 }
 0x141   : > { %v5256_v34 = vpop.xlane.xlu1 %1760 }
 0x145   : > { %v5314_v43 = vpop.xlane.xlu0 %1757 }
 0x152   : > { %v5295_v54 = vpop.xlane.xlu1 %1763 }
 0x185   : > { %v1197_v40 = vpop.f32.mrf.mxu0  ;;  %v1277_v2 = vpop.f32.mrf.mxu1 }
 0x186   : > { %v5235_v9 = vadd.f32 %v1197_v40, %v5227_v14  ;;  %v5241_v17 = vadd.f32 %v1277_v2, %v5227_v14 }
 0x187   : > { %v1199_v8 = vpop.f32.mrf.mxu0  ;;  %v1279_v56 = vpop.f32.mrf.mxu1 }
 0x188   : > { %v5238_v47 = vadd.f32 %v1199_v8, %v5230_v50  ;;  %v5244_v23 = vadd.f32 %v1279_v56, %v5230_v50  ;;  %v1356_v60 = vmul.f32 %v5235_v9, %v5235_v9  ;;  %v1388_v48 = vmul.f32 %v5241_v17, %v5241_v17 }
 0x189   : > { %v1201_v63 = vpop.f32.mrf.mxu0  ;;  %v1281_v39 = vpop.f32.mrf.mxu1 }
 0x18a   : > { %v1357_v53 = vmul.f32 %v5238_v47, %v5238_v47  ;;  %v5249_v59 = vadd.f32 %v1281_v39, %v5227_v14  ;;  %v1389_v49 = vmul.f32 %v5244_v23, %v5244_v23  ;;  %v5273_v3 = vadd.f32 %v1201_v63, %v5227_v14 }
 0x18b   : > { %v1203_v61 = vpop.f32.mrf.mxu0  ;;  %v1283_v6 = vpop.f32.mrf.mxu1 }
 0x18c   : > { %v5254_v30 = vadd.f32 %v1283_v6, %v5230_v50  ;;  %v5263_v13 = vadd.f32 %v1203_v61, %v5230_v50  ;;  %v1420_v12 = vadd.f32 %v1357_v53, %v1356_v60  ;;  %v1390_v25 = vmul.f32 %v5249_v59, %v5249_v59 }
 0x18d   : > { %v1207_v11 = vpop.f32.mrf.mxu0  ;;  %v1287_v19 = vpop.f32.mrf.mxu1  ;;  %v1468_v1 = vadd.f32 %v1389_v49, %v1388_v48  ;;  %v1358_v10 = vmul.f32 %v5273_v3, %v5273_v3 }
 0x18e   : > { %v1391_v26 = vmul.f32 %v5254_v30, %v5254_v30  ;;  %v5270_v21 = vadd.f32 %v1207_v11, %v5227_v14  ;;  %1421 = vadd.xlane.f32.xlu0 %v1420_v12  ;;  %v5276_v62 = vadd.f32 %v1287_v19, %v5227_v14  ;;  %v1359_v58 = vmul.f32 %v5263_v13, %v5263_v13  ;;  %v5333_v48 = vpop.xlane.xlu1 %1766 }
 0x18f   : > { %v1209_v57 = vpop.f32.mrf.mxu0  ;;  %v1289_v0 = vpop.f32.mrf.mxu1 }
 0x190   : > { %v1360_v44 = vmul.f32 %v5270_v21, %v5270_v21  ;;  %v5283_v15 = vadd.f32 %v1209_v57, %v5230_v50  ;;  %v1471_v18 = vadd.f32 %v1391_v26, %v1390_v25  ;;  %v5288_v33 = vadd.f32 %v1289_v0, %v5230_v50 }
 0x191   : > { %v1211_v31 = vpop.f32.mrf.mxu0  ;;  %v1291_v45 = vpop.f32.mrf.mxu1  ;;  %v1392_v4 = vmul.f32 %v5276_v62, %v5276_v62  ;;  %v1423_v37 = vadd.f32 %v1359_v58, %v1358_v10 }
 0x192   : > { %v1361_v32 = vmul.f32 %v5283_v15, %v5283_v15  ;;  %v5293_v51 = vadd.f32 %v1211_v31, %v5227_v14  ;;  %1472 = vadd.xlane.f32.xlu1 %v1471_v18  ;;  %v5298_v55 = vadd.f32 %v1291_v45, %v5227_v14  ;;  %1469 = vadd.xlane.f32.xlu0 %v1468_v1  ;;  %v5350_v1 = vpop.xlane.xlu0 %1715 }
 0x193   : > { %v1213_v16 = vpop.f32.mrf.mxu0  ;;  %v1393_v20 = vmul.f32 %v5288_v33, %v5288_v33  ;;  %v1293_v24 = vpop.f32.mrf.mxu1 }
 0x194   : > { %v1362_v46 = vmul.f32 %v5293_v51, %v5293_v51  ;;  %v5309_v27 = vadd.f32 %v1213_v16, %v5230_v50  ;;  %v1426_v28 = vadd.f32 %v1361_v32, %v1360_v44  ;;  %v5312_v52 = vadd.f32 %v1293_v24, %v5230_v50 }
 0x195   : > { %v1217_v36 = vpop.f32.mrf.mxu0  ;;  %v1297_v29 = vpop.f32.mrf.mxu1  ;;  %v1394_v8 = vmul.f32 %v5298_v55, %v5298_v55  ;;  %v1474_v53 = vadd.f32 %v1393_v20, %v1392_v4 }
 0x196   : > { %v1363_v40 = vmul.f32 %v5309_v27, %v5309_v27  ;;  %v5319_v2 = vadd.f32 %v1217_v36, %v5227_v14  ;;  %1427 = vadd.xlane.f32.xlu1 %v1426_v28  ;;  %1424 = vadd.xlane.f32.xlu0 %v1423_v37  ;;  %v1395_v63 = vmul.f32 %v5312_v52, %v5312_v52 }
 0x197   : > { %v1219_v56 = vpop.f32.mrf.mxu0  ;;  %v5326_v39 = vadd.f32 %v1297_v29, %v5227_v14  ;;  %v1299_v60 = vpop.f32.mrf.mxu1 }
 0x198   : > { %v1364_v61 = vmul.f32 %v5319_v2, %v5319_v2  ;;  %v5331_v6 = vadd.f32 %v1219_v56, %v5230_v50  ;;  %v1429_v49 = vadd.f32 %v1363_v40, %v1362_v46  ;;  %v5336_v12 = vadd.f32 %v1299_v60, %v5230_v50  ;;  %v5362_v46 = vpop.xlane.xlu1 %1769 }
 0x199   : > { %v1221_v11 = vpop.f32.mrf.mxu0  ;;  %v1301_v19 = vpop.f32.mrf.mxu1  ;;  %v1477_v0 = vadd.f32 %v1395_v63, %v1394_v8  ;;  %v1396_v44 = vmul.f32 %v5326_v39, %v5326_v39 }
 0x19a   : > { %v1365_v25 = vmul.f32 %v5331_v6, %v5331_v6  ;;  %v5341_v26 = vadd.f32 %v1221_v11, %v5227_v14  ;;  %1430 = vadd.xlane.f32.xlu1 %v1429_v49  ;;  %v5344_v57 = vadd.f32 %v1301_v19, %v5227_v14  ;;  %1475 = vadd.xlane.f32.xlu0 %v1474_v53  ;;  %v5382_v19 = vpop.xlane.xlu0 %1718 }
 0x19b   : > { %v1223_v18 = vpop.f32.mrf.mxu0  ;;  %v1397_v58 = vmul.f32 %v5336_v12, %v5336_v12  ;;  %v1303_v31 = vpop.f32.mrf.mxu1 }
 0x19c   : > { %v1366_v45 = vmul.f32 %v5341_v26, %v5341_v26  ;;  %v5355_v32 = vadd.f32 %v1223_v18, %v5230_v50  ;;  %v1432_v10 = vadd.f32 %v1365_v25, %v1364_v61  ;;  %v5358_v16 = vadd.f32 %v1303_v31, %v5230_v50 }
 0x19d   : > { %v1227_v4 = vpop.f32.mrf.mxu0  ;;  %v1307_v20 = vpop.f32.mrf.mxu1  ;;  %v1398_v36 = vmul.f32 %v5344_v57, %v5344_v57  ;;  %v1480_v8 = vadd.f32 %v1397_v58, %v1396_v44 }
 0x19e   : > { %v1367_v24 = vmul.f32 %v5355_v32, %v5355_v32  ;;  %v5365_v28 = vadd.f32 %v1227_v4, %v5227_v14  ;;  %1478 = vadd.xlane.f32.xlu1 %v1477_v0  ;;  %1433 = vadd.xlane.f32.xlu0 %v1432_v10  ;;  %v1399_v29 = vmul.f32 %v5358_v16, %v5358_v16  ;;  %v5396_v4 = vpop.xlane.xlu1 %1772  ;;  %v5418_v35 = vpop.xlane.xlu0 %1721 }
 0x19f   : > { %v1229_v37 = vpop.f32.mrf.mxu0  ;;  %v5372_v40 = vadd.f32 %v1307_v20, %v5227_v14  ;;  %v1309_v56 = vpop.f32.mrf.mxu1 }
 0x1a0   : > { %v1368_v63 = vmul.f32 %v5365_v28, %v5365_v28  ;;  %v5377_v53 = vadd.f32 %v1229_v37, %v5230_v50  ;;  %v1435_v60 = vadd.f32 %v1367_v24, %v1366_v45  ;;  %v5380_v49 = vadd.f32 %v1309_v56, %v5230_v50 }
 0x1a1   : > { %7077 = vst [vmem:[#allocation13_spill] sm:$0xff] %v5372_v40  ;;  %v1231_v61 = vpop.f32.mrf.mxu0  ;;  %v1311_v11 = vpop.f32.mrf.mxu1  ;;  %v1483_v18 = vadd.f32 %v1399_v29, %v1398_v36  ;;  %v1400_v58 = vmul.f32 %v5372_v40, %v5372_v40 }
 0x1a2   : > { %7078 = vst [vmem:[#allocation14_spill] sm:$0xff] %v5377_v53  ;;  %7079 = vst [vmem:[#allocation15_spill] sm:$0xff] %v5380_v49  ;;  %v1369_v25 = vmul.f32 %v5377_v53, %v5377_v53  ;;  %v5387_v0 = vadd.f32 %v1231_v61, %v5227_v14  ;;  %1436 = vadd.xlane.f32.xlu1 %v1435_v60  ;;  %v5390_v44 = vadd.f32 %v1311_v11, %v5227_v14  ;;  %v5428_v7 = vpop.xlane.xlu1 %1775 }
 0x1a3   : > { %1481 = vadd.xlane.f32.xlu0 %v1480_v8  ;;  %v1233_v31 = vpop.f32.mrf.mxu0  ;;  %v1401_v45 = vmul.f32 %v5380_v49, %v5380_v49  ;;  %v1313_v10 = vpop.f32.mrf.mxu1 }
 0x1a4   : > { %7080 = vst [vmem:[#allocation16_spill] sm:$0xff] %v5387_v0  ;;  %7081 = vst [vmem:[#allocation17_spill] sm:$0xff] %v5390_v44  ;;  %v1370_v20 = vmul.f32 %v5387_v0, %v5387_v0  ;;  %v5401_v24 = vadd.f32 %v1233_v31, %v5230_v50  ;;  %v1438_v37 = vadd.f32 %v1369_v25, %v1368_v63 }
 0x1a5   : > { %v1237_v56 = vpop.f32.mrf.mxu0  ;;  %v5404_v36 = vadd.f32 %v1313_v10, %v5230_v50  ;;  %v1317_v29 = vpop.f32.mrf.mxu1  ;;  %v1402_v61 = vmul.f32 %v5390_v44, %v5390_v44  ;;  %v1486_v31 = vadd.f32 %v1401_v45, %v1400_v58 }
 0x1a6   : > { %7082 = vst [vmem:[#allocation18_spill] sm:$0xff] %v5401_v24  ;;  %v1371_v8 = vmul.f32 %v5401_v24, %v5401_v24  ;;  %v5409_v60 = vadd.f32 %v1237_v56, %v5227_v14  ;;  %1484 = vadd.xlane.f32.xlu1 %v1483_v18  ;;  %v5416_v25 = vadd.f32 %v1317_v29, %v5227_v14  ;;  %v5464_v0 = vpop.xlane.xlu1 %1778 }
 0x1a7   : > { %7083 = vst [vmem:[#allocation19_spill] sm:$0xff] %v5404_v36  ;;  %1439 = vadd.xlane.f32.xlu0 %v1438_v37  ;;  %v1239_v11 = vpop.f32.mrf.mxu0  ;;  %v1403_v63 = vmul.f32 %v5404_v36, %v5404_v36  ;;  %v1319_v10 = vpop.f32.mrf.mxu1 }
 0x1a8   : > { %7084 = vst [vmem:[#allocation20_spill] sm:$0xff] %v5409_v60  ;;  %7085 = vst [vmem:[#allocation21_spill] sm:$0xff] %v5416_v25  ;;  %v1372_v56 = vmul.f32 %v5409_v60, %v5409_v60  ;;  %v5423_v42 = vadd.f32 %v1239_v11, %v5230_v50  ;;  %v1441_v41 = vadd.f32 %v1371_v8, %v1370_v20 }
 0x1a9   : > { %v1241_v18 = vpop.f32.mrf.mxu0  ;;  %v5426_v37 = vadd.f32 %v1319_v10, %v5230_v50  ;;  %v1321_v38 = vpop.f32.mrf.mxu1  ;;  %v1489_v11 = vadd.f32 %v1403_v63, %v1402_v61  ;;  %v1404_v20 = vmul.f32 %v5416_v25, %v5416_v25 }
 0x1aa   : > { %7086 = vst [vmem:[#allocation22_spill] sm:$0xff] %v5423_v42  ;;  %v1373_v58 = vmul.f32 %v5423_v42, %v5423_v42  ;;  %v5433_v45 = vadd.f32 %v1241_v18, %v5227_v14  ;;  %1442 = vadd.xlane.f32.xlu1 %v1441_v41  ;;  %v5436_v29 = vadd.f32 %v1321_v38, %v5227_v14  ;;  %v5450_v63 = vpop.xlane.xlu0 %1724 }
 0x1ab   : > { %7087 = vst [vmem:[#allocation23_spill] sm:$0xff] %v5426_v37  ;;  %1487 = vadd.xlane.f32.xlu0 %v1486_v31  ;;  %v1243_v8 = vpop.f32.mrf.mxu0  ;;  %v1405_v10 = vmul.f32 %v5426_v37, %v5426_v37  ;;  %v1323_v60 = vpop.f32.mrf.mxu1 }
 0x1ac   : > { %7088 = vst [vmem:[#allocation24_spill] sm:$0xff] %v5433_v45  ;;  %7089 = vst [vmem:[#allocation25_spill] sm:$0xff] %v5436_v29  ;;  %v1374_v42 = vmul.f32 %v5433_v45, %v5433_v45  ;;  %v5445_v18 = vadd.f32 %v1243_v8, %v5230_v50  ;;  %v1444_v41 = vadd.f32 %v1373_v58, %v1372_v56 }
 0x1ad   : > { %v1247_v24 = vpop.f32.mrf.mxu0  ;;  %v5448_v38 = vadd.f32 %v1323_v60, %v5230_v50  ;;  %v1327_v61 = vpop.f32.mrf.mxu1  ;;  %v1406_v45 = vmul.f32 %v5436_v29, %v5436_v29  ;;  %v1492_v58 = vadd.f32 %v1405_v10, %v1404_v20 }
 0x1ae   : > { %7090 = vst [vmem:[#allocation26_spill] sm:$0xff] %v5445_v18  ;;  %v1375_v31 = vmul.f32 %v5445_v18, %v5445_v18  ;;  %v5455_v37 = vadd.f32 %v1247_v24, %v5227_v14  ;;  %1490 = vadd.xlane.f32.xlu1 %v1489_v11  ;;  %v5462_v60 = vadd.f32 %v1327_v61, %v5227_v14 }
 0x1af   : > { %7091 = vst [vmem:[#allocation27_spill] sm:$0xff] %v5448_v38  ;;  %1445 = vadd.xlane.f32.xlu0 %v1444_v41  ;;  %v1249_v8 = vpop.f32.mrf.mxu0  ;;  %v1407_v56 = vmul.f32 %v5448_v38, %v5448_v38  ;;  %v1329_v25 = vpop.f32.mrf.mxu1 }
 0x1b0   : > { %7092 = vst [vmem:[#allocation28_spill] sm:$0xff] %v5455_v37  ;;  %7093 = vst [vmem:[#allocation29_spill] sm:$0xff] %v5462_v60  ;;  %v1376_v24 = vmul.f32 %v5455_v37, %v5455_v37  ;;  %v5469_v18 = vadd.f32 %v1249_v8, %v5230_v50  ;;  %v1447_v29 = vadd.f32 %v1375_v31, %v1374_v42  ;;  %v5486_v38 = vpop.xlane.xlu0 %1727 }
 0x1b1   : > { %v1251_v11 = vpop.f32.mrf.mxu0  ;;  %v5472_v41 = vadd.f32 %v1329_v25, %v5230_v50  ;;  %v1331_v36 = vpop.f32.mrf.mxu1  ;;  %v1495_v37 = vadd.f32 %v1407_v56, %v1406_v45  ;;  %v1408_v8 = vmul.f32 %v5462_v60, %v5462_v60 }
 0x1b2   : > { %7094 = vst [vmem:[#allocation30_spill] sm:$0xff] %v5469_v18  ;;  %v1377_v61 = vmul.f32 %v5469_v18, %v5469_v18  ;;  %v5477_v20 = vadd.f32 %v1251_v11, %v5227_v14  ;;  %1448 = vadd.xlane.f32.xlu1 %v1447_v29  ;;  %v5480_v10 = vadd.f32 %v1331_v36, %v5227_v14 }
 0x1b3   : > { %7095 = vst [vmem:[#allocation31_spill] sm:$0xff] %v5472_v41  ;;  %1493 = vadd.xlane.f32.xlu0 %v1492_v58  ;;  %v1253_v42 = vpop.f32.mrf.mxu0  ;;  %v1409_v25 = vmul.f32 %v5472_v41, %v5472_v41  ;;  %v1333_v31 = vpop.f32.mrf.mxu1 }
 0x1b4   : > { %7096 = vst [vmem:[#allocation32_spill] sm:$0xff] %v5477_v20  ;;  %7097 = vst [vmem:[#allocation33_spill] sm:$0xff] %v5480_v10  ;;  %v1378_v11 = vmul.f32 %v5477_v20, %v5477_v20  ;;  %v5491_v29 = vadd.f32 %v1253_v42, %v5230_v50  ;;  %v1450_v36 = vadd.f32 %v1377_v61, %v1376_v24  ;;  %v5496_v58 = vpop.xlane.xlu1 %1781 }
 0x1b5   : > { %v1257_v18 = vpop.f32.mrf.mxu0  ;;  %v5494_v45 = vadd.f32 %v1333_v31, %v5230_v50  ;;  %v1337_v56 = vpop.f32.mrf.mxu1  ;;  %v1410_v20 = vmul.f32 %v5480_v10, %v5480_v10  ;;  %v1498_v31 = vadd.f32 %v1409_v25, %v1408_v8 }
 0x1b6   : > { %7098 = vst [vmem:[#allocation34_spill] sm:$0xff] %v5491_v29  ;;  %v1379_v41 = vmul.f32 %v5491_v29, %v5491_v29  ;;  %v5501_v60 = vadd.f32 %v1257_v18, %v5227_v14  ;;  %1496 = vadd.xlane.f32.xlu1 %v1495_v37  ;;  %v5508_v61 = vadd.f32 %v1337_v56, %v5227_v14  ;;  %v5518_v10 = vpop.xlane.xlu0 %1730 }
 0x1b7   : > { %7099 = vst [vmem:[#allocation35_spill] sm:$0xff] %v5494_v45  ;;  %1451 = vadd.xlane.f32.xlu0 %v1450_v36  ;;  %v1259_v42 = vpop.f32.mrf.mxu0  ;;  %v1411_v24 = vmul.f32 %v5494_v45, %v5494_v45  ;;  %v1339_v44 = vpop.f32.mrf.mxu1 }
 0x1b8   : > { %7100 = vst [vmem:[#allocation36_spill] sm:$0xff] %v5501_v60  ;;  %7101 = vst [vmem:[#allocation37_spill] sm:$0xff] %v5508_v61  ;;  %v1380_v29 = vmul.f32 %v5501_v60, %v5501_v60  ;;  %v5513_v18 = vadd.f32 %v1259_v42, %v5230_v50  ;;  %v1453_v49 = vadd.f32 %v1379_v41, %v1378_v11  ;;  %v5532_v45 = vpop.xlane.xlu1 %1784 }
 0x1b9   : > { %v1261_v40 = vpop.f32.mrf.mxu0  ;;  %v5516_v37 = vadd.f32 %v1339_v44, %v5230_v50  ;;  %v1341_v36 = vpop.f32.mrf.mxu1  ;;  %v1501_v42 = vadd.f32 %v1411_v24, %v1410_v20  ;;  %v1412_v41 = vmul.f32 %v5508_v61, %v5508_v61  ;;  %7106 = vst [vmem:[#allocation42_spill] sm:$0xff] %v5532_v45 }
 0x1ba   : > { %7102 = vst [vmem:[#allocation38_spill] sm:$0xff] %v5513_v18  ;;  %v1381_v56 = vmul.f32 %v5513_v18, %v5513_v18  ;;  %v5523_v8 = vadd.f32 %v1261_v40, %v5227_v14  ;;  %1454 = vadd.xlane.f32.xlu1 %v1453_v49  ;;  %v5526_v25 = vadd.f32 %v1341_v36, %v5227_v14  ;;  %v5554_v45 = vpop.xlane.xlu0 %1733 }
 0x1bb   : > { %7103 = vst [vmem:[#allocation39_spill] sm:$0xff] %v5516_v37  ;;  %1499 = vadd.xlane.f32.xlu0 %v1498_v31  ;;  %v1263_v44 = vpop.f32.mrf.mxu0  ;;  %v1413_v11 = vmul.f32 %v5516_v37, %v5516_v37  ;;  %v1343_v60 = vpop.f32.mrf.mxu1 }
 0x1bc   : > { %7104 = vst [vmem:[#allocation40_spill] sm:$0xff] %v5523_v8  ;;  %7105 = vst [vmem:[#allocation41_spill] sm:$0xff] %v5526_v25  ;;  %v1382_v40 = vmul.f32 %v5523_v8, %v5523_v8  ;;  %v5537_v49 = vadd.f32 %v1263_v44, %v5230_v50  ;;  %v1456_v36 = vadd.f32 %v1381_v56, %v1380_v29 }
 0x1bd   : > { %v1267_v18 = vpop.f32.mrf.mxu0  ;;  %v5540_v20 = vadd.f32 %v1343_v60, %v5230_v50  ;;  %v1347_v24 = vpop.f32.mrf.mxu1  ;;  %v1414_v61 = vmul.f32 %v5526_v25, %v5526_v25  ;;  %v1504_v60 = vadd.f32 %v1413_v11, %v1412_v41 }
 0x1be   : > { %7107 = vst [vmem:[#allocation43_spill] sm:$0xff] %v5537_v49  ;;  %v1383_v31 = vmul.f32 %v5537_v49, %v5537_v49  ;;  %v5545_v37 = vadd.f32 %v1267_v18, %v5227_v14  ;;  %1502 = vadd.xlane.f32.xlu1 %v1501_v42  ;;  %v5552_v56 = vadd.f32 %v1347_v24, %v5227_v14 }
 0x1bf   : > { %7108 = vst [vmem:[#allocation44_spill] sm:$0xff] %v5540_v20  ;;  %1457 = vadd.xlane.f32.xlu0 %v1456_v36  ;;  %v1269_v8 = vpop.f32.mrf.mxu0  ;;  %v1415_v29 = vmul.f32 %v5540_v20, %v5540_v20  ;;  %v1349_v44 = vpop.f32.mrf.mxu1 }
 0x1c0   : > { %7109 = vst [vmem:[#allocation45_spill] sm:$0xff] %v5545_v37  ;;  %7110 = vst [vmem:[#allocation46_spill] sm:$0xff] %v5552_v56  ;;  %v1384_v18 = vmul.f32 %v5545_v37, %v5545_v37  ;;  %v5559_v49 = vadd.f32 %v1269_v8, %v5230_v50  ;;  %v1459_v25 = vadd.f32 %v1383_v31, %v1382_v40  ;;  %v5564_v20 = vpop.xlane.xlu1 %1739 }
 0x1c1   : > { %v1271_v42 = vpop.f32.mrf.mxu0  ;;  %v5562_v36 = vadd.f32 %v1349_v44, %v5230_v50  ;;  %v1351_v53 = vpop.f32.mrf.mxu1  ;;  %7113 = vst [vmem:[#allocation49_spill] sm:$0xff] %v5564_v20  ;;  %v1507_v8 = vadd.f32 %v1415_v29, %v1414_v61  ;;  %v1416_v40 = vmul.f32 %v5552_v56, %v5552_v56  ;;  %v4245_v20 = vld [vmem:[%s4852_s22 + $0x28] sm:$0xff] }
 0x1c2   : > { %7111 = vst [vmem:[#allocation47_spill] sm:$0xff] %v5559_v49  ;;  %v1385_v41 = vmul.f32 %v5559_v49, %v5559_v49  ;;  %v5569_v11 = vadd.f32 %v1271_v42, %v5227_v14  ;;  %1460 = vadd.xlane.f32.xlu1 %v1459_v25  ;;  %v5572_v24 = vadd.f32 %v1351_v53, %v5227_v14  ;;  %v5586_v53 = vpop.xlane.xlu0 %1736 }
 0x1c3   : > { %7112 = vst [vmem:[#allocation48_spill] sm:$0xff] %v5562_v36  ;;  %1505 = vadd.xlane.f32.xlu0 %v1504_v60  ;;  %v1273_v31 = vpop.f32.mrf.mxu0  ;;  %v1417_v44 = vmul.f32 %v5562_v36, %v5562_v36  ;;  %v1353_v37 = vpop.f32.mrf.mxu1 }
 0x1c4   : > { %7114 = vst [vmem:[#allocation50_spill] sm:$0xff] %v5569_v11  ;;  %7115 = vst [vmem:[#allocation51_spill] sm:$0xff] %v5572_v24  ;;  %v1386_v49 = vmul.f32 %v5569_v11, %v5569_v11  ;;  %v5581_v42 = vadd.f32 %v1273_v31, %v5230_v50  ;;  %v1462_v25 = vadd.f32 %v1385_v41, %v1384_v18  ;;  %v5594_v36 = vpop.xlane.xlu1 %1790 }
 0x1c5   : > { %v5584_v14 = vadd.f32 %v1353_v37, %v5230_v50  ;;  %v1418_v29 = vmul.f32 %v5572_v24, %v5572_v24  ;;  %v1510_v11 = vadd.f32 %v1417_v44, %v1416_v40  ;;  %7118 = vst [vmem:[#allocation54_spill] sm:$0xff] %v5594_v36 }
 0x1c6   : > { %7116 = vst [vmem:[#allocation52_spill] sm:$0xff] %v5581_v42  ;;  %v1387_v61 = vmul.f32 %v5581_v42, %v5581_v42  ;;  %1508 = vadd.xlane.f32.xlu1 %v1507_v8  ;;  %v5596_v37 = vpop.xlane.xlu0 %1787 }
 0x1c7   : > { %7117 = vst [vmem:[#allocation53_spill] sm:$0xff] %v5584_v14  ;;  %1463 = vadd.xlane.f32.xlu0 %v1462_v25  ;;  %v1419_v60 = vmul.f32 %v5584_v14, %v5584_v14  ;;  %7119 = vst [vmem:[#allocation55_spill] sm:$0xff] %v5596_v37 }
 0x1c8   : > { %v1465_v31 = vadd.f32 %v1387_v61, %v1386_v49  ;;  %v5598_v18 = vpop.xlane.xlu1 %1745 }
 0x1c9   : > { %v1513_v50 = vadd.f32 %v1419_v60, %v1418_v29  ;;  %7120 = vst [vmem:[#allocation56_spill] sm:$0xff] %v5598_v18 }
 0x1ca   : > { %1466 = vadd.xlane.f32.xlu1 %v1465_v31  ;;  %v5600_v41 = vpop.xlane.xlu0 %1742 }
 0x1cb   : > { %1511 = vadd.xlane.f32.xlu0 %v1510_v11  ;;  %7121 = vst [vmem:[#allocation57_spill] sm:$0xff] %v5600_v41 }
 0x1cc   : > { %v5602_v24 = vpop.xlane.xlu1 %1796 }
 0x1cd   : > { %7122 = vst [vmem:[#allocation58_spill] sm:$0xff] %v5602_v24 }
 0x1ce   : > { %1514 = vadd.xlane.f32.xlu1 %v1513_v50  ;;  %v5604_v8 = vpop.xlane.xlu0 %1793 }
 0x1cf   : > { %7123 = vst [vmem:[#allocation59_spill] sm:$0xff] %v5604_v8 }
 0x1d0   : > { %v5606_v25 = vpop.xlane.xlu1 %1751 }
 0x1d1   : > { %7124 = vst [vmem:[#allocation60_spill] sm:$0xff] %v5606_v25 }
 0x1d2   : > { %v5608_v40 = vpop.xlane.xlu0 %1748 }
 0x1d3   : > { %7125 = vst [vmem:[#allocation61_spill] sm:$0xff] %v5608_v40  ;;  %v4239_v40 = vld [vmem:[%s4852_s22 + $0x108] sm:$0xff] }
 0x1d4   : > { %v5610_v49 = vpop.xlane.xlu1 %1802 }
 0x1d5   : > { %7126 = vst [vmem:[#allocation62_spill] sm:$0xff] %v5610_v49 }
 0x1d6   : > { %v5612_v44 = vpop.xlane.xlu0 %1799 }
 0x1d7   : > { %7127 = vst [vmem:[#allocation63_spill] sm:$0xff] %v5612_v44 }
 0x1d8   : > { %v5614_v11 = vpop.permute.xlu1 %3290 }
 0x1d9   : > { %7128 = vst [vmem:[#allocation64_spill] sm:$0xff] %v5614_v11 }
 0x1da   : > { %v5616_v61 = vpop.xlane.xlu0 %1754 }
 0x1db   : > { %7129 = vst [vmem:[#allocation65_spill] sm:$0xff] %v5616_v61 }
 0x1dc   : > { %v5618_v29 = vpop.permute.xlu1 %3294 }
 0x1dd   : > { %7130 = vst [vmem:[#allocation66_spill] sm:$0xff] %v5618_v29 }
 0x1de   : > { %v5620_v60 = vpop.permute.xlu0 %3286 }
 0x1df   : > { %7131 = vst [vmem:[#allocation67_spill] sm:$0xff] %v5620_v60 }
 0x1e0   : > { %v5622_v31 = vpop.permute.xlu1 %3298 }
 0x1e1   : > { %7132 = vst [vmem:[#allocation68_spill] sm:$0xff] %v5622_v31 }
 0x1e2   : > { %v5624_v50 = vpop.permute.xlu0 %3302 }
 0x1e3   : > { %7133 = vst [vmem:[#allocation69_spill] sm:$0xff] %v5624_v50 }
 0x1e4   : > { %v5626_v14 = vpop.permute.xlu1 %3306 }
 0x1e5   : > { %7134 = vst [vmem:[#allocation70_spill] sm:$0xff] %v5626_v14  ;;  %v1804_v14 = vmax.f32 %v5278_v22, 1e-24 }
 0x1e6   : > { %v5628_v42 = vpop.permute.xlu0 %3310 }
 0x1e7   : > { %7135 = vst [vmem:[#allocation71_spill] sm:$0xff] %v5628_v42  ;;  %v1820_v42 = vmax.f32 %v5314_v43, 1e-24  ;;  %4108 = vrsqrt.f32 %v1804_v14 }
 0x1e8   : > { %v5630_v56 = vpop.permute.xlu1 %3314 }
 0x1e9   : > { %7136 = vst [vmem:[#allocation72_spill] sm:$0xff] %v5630_v56  ;;  %4110 = vrsqrt.f32 %v1820_v42 }
 0x1ea   : > { %v5632_v49 = vpop.permute.xlu0 %3318 }
 0x1eb   : > { %7137 = vst [vmem:[#allocation73_spill] sm:$0xff] %v5632_v49 }
 0x1ec   : > { %v5634_v44 = vpop.permute.xlu1 %3322 }
 0x1ed   : > { %7138 = vst [vmem:[#allocation74_spill] sm:$0xff] %v5634_v44 }
 0x1ee   : > { %v5636_v11 = vpop.permute.xlu0 %3326 }
 0x1ef   : > { %7139 = vst [vmem:[#allocation75_spill] sm:$0xff] %v5636_v11 }
 0x1f0   : > { %v5638_v61 = vpop.permute.xlu1 %3330 }
 0x1f1   : > { %7140 = vst [vmem:[#allocation76_spill] sm:$0xff] %v5638_v61  ;;  %v1805_v61 = vmax.f32 %v5232_v5, 1e-24 }
 0x1f2   : > { %v5640_v29 = vpop.permute.xlu0 %3334 }
 0x1f3   : > { %7141 = vst [vmem:[#allocation77_spill] sm:$0xff] %v5640_v29  ;;  %v1821_v29 = vmax.f32 %v5256_v34, 1e-24 }
 0x1f4   : > { %v5642_v60 = vpop.permute.xlu1 %3338  ;;  %v4109_v34 = vpop.eup %4108 }
 0x1f5   : > { %7142 = vst [vmem:[#allocation78_spill] sm:$0xff] %v5642_v60 }
 0x1f6   : > { %v5644_v31 = vpop.permute.xlu0 %3342  ;;  %v4111_v14 = vpop.eup %4110 }
 0x1f7   : > { %7143 = vst [vmem:[#allocation79_spill] sm:$0xff] %v5644_v31 }
 0x1f8   : > { %v5648_v50 = vpop.permute.xlu1 %3346 }
 0x1f9   : > { %7144 = vst [vmem:[#allocation80_spill] sm:$0xff] %v5648_v50 }
 0x217   : > { %v1422_v56 = vpop.xlane.xlu0 %1421 }
 0x218   : > { %v1516_v49 = vmax.f32 %v1422_v56, 1e-24  ;;  %v1806_v56 = vmax.f32 %v5350_v1, 1e-24 }
 0x21a   : > { %4112 = vrsqrt.f32 %v1516_v49  ;;  %v1822_v49 = vmax.f32 %v5295_v54, 1e-24 }
 0x21b   : > { %v1473_v11 = vpop.xlane.xlu1 %1472  ;;  %v1470_v44 = vpop.xlane.xlu0 %1469 }
 0x21c   : > { %v1532_v60 = vmax.f32 %v1470_v44, 1e-24  ;;  %v1533_v25 = vmax.f32 %v1473_v11, 1e-24 }
 0x21e   : > { %4114 = vrsqrt.f32 %v1532_v60 }
 0x21f   : > { %v1428_v31 = vpop.xlane.xlu1 %1427  ;;  %4116 = vrsqrt.f32 %v1805_v61  ;;  %v1425_v43 = vpop.xlane.xlu0 %1424 }
 0x220   : > { %v1518_v22 = vmax.f32 %v1428_v31, 1e-24  ;;  %4118 = vrsqrt.f32 %v1821_v29  ;;  %v1517_v50 = vmax.f32 %v1425_v43, 1e-24  ;;  %v4237_v31 = vld [vmem:[%s4852_s22 + $0x8] sm:$0xff]  ;;  %v4238_v43 = vld [vmem:[%s4852_s22 + $0x100] sm:$0xff] }
 0x221   : > { %4120 = vrsqrt.f32 %v1533_v25  ;;  %v4236_v25 = vld [vmem:[%s4852_s22] sm:$0xff]  ;;  %v1900_v24 = vmul.f32 %v4238_v43, %v4111_v14 }
 0x222   : > { %4122 = vrsqrt.f32 %v1517_v50  ;;  %v1868_v60 = vmul.f32 %v4236_v25, %v4109_v34  ;;  %v1869_v50 = vmul.f32 %v4237_v31, %v4109_v34 }
 0x223   : > { %v1431_v42 = vpop.xlane.xlu1 %1430  ;;  %4124 = vrsqrt.f32 %v1518_v22  ;;  %v1476_v5 = vpop.xlane.xlu0 %1475  ;;  %v1807_v22 = vmax.f32 %v5382_v19, 1e-24 }
 0x224   : > { %4126 = vrsqrt.f32 %v1806_v56  ;;  %v1534_v11 = vmax.f32 %v1476_v5, 1e-24  ;;  %v1901_v56 = vmul.f32 %v4239_v40, %v4111_v14  ;;  %v1519_v41 = vmax.f32 %v1431_v42, 1e-24 }
 0x225   : > { %4128 = vrsqrt.f32 %v1822_v49  ;;  %v1823_v49 = vmax.f32 %v5333_v48, 1e-24 }
 0x226   : > { %4130 = vrsqrt.f32 %v1534_v11  ;;  %v4240_v11 = vld [vmem:[%s4852_s22 + $0x10] sm:$0xff] }
 0x227   : > { %v4113_v44 = vpop.eup %4112  ;;  %v1479_v61 = vpop.xlane.xlu1 %1478  ;;  %4132 = vrsqrt.f32 %v1807_v22 }
 0x228   : > { %v1580_v29 = vmul.f32 %v4113_v44, %v5235_v9  ;;  %v1581_v1 = vmul.f32 %v4113_v44, %v5238_v47  ;;  %v1535_v8 = vmax.f32 %v1479_v61, 1e-24  ;;  %v1434_v54 = vpop.xlane.xlu0 %1433  ;;  %v1808_v61 = vmax.f32 %v5418_v35, 1e-24 }
 0x229   : > { %v1520_v40 = vmax.f32 %v1434_v54, 1e-24  ;;  %v1824_v35 = vmax.f32 %v5362_v46, 1e-24  ;;  %v4242_v54 = vld [vmem:[%s4852_s22 + $0x110] sm:$0xff] }
 0x22a   : > { %v1941_v18 = vmul.f32 %v1868_v60, %v1580_v29  ;;  %v1942_v5 = vmul.f32 %v1869_v50, %v1581_v1  ;;  %v1973_v9 = vmul.f32 %v1900_v24, %v1580_v29  ;;  %v1974_v47 = vmul.f32 %v1901_v56, %v1581_v1 }
 0x22b   : > { %v4115_v36 = vpop.eup %4114  ;;  %4134 = vrsqrt.f32 %v1535_v8  ;;  %v5670_v8 = vpop.xlane.xlu1 %1436 }
 0x22c   : > { %v4117_v44 = vpop.eup %4116  ;;  %v2005_v25 = vadd.f32 %v1942_v5, %v1941_v18  ;;  %v1612_v19 = vmul.f32 %v4115_v36, %v5241_v17  ;;  %v1613_v34 = vmul.f32 %v4115_v36, %v5244_v23  ;;  %4136 = vrsqrt.f32 %v1519_v41  ;;  %v4241_v17 = vld [vmem:[%s4852_s22 + $0x18] sm:$0xff] }
 0x22d   : > { %v4119_v31 = vpop.eup %4118  ;;  %v2053_v18 = vadd.f32 %v1974_v47, %v1973_v9  ;;  %v1870_v29 = vmul.f32 %v4240_v11, %v4117_v44  ;;  %v1871_v1 = vmul.f32 %v4241_v17, %v4117_v44  ;;  %4138 = vrsqrt.f32 %v1520_v40  ;;  %v4243_v5 = vld [vmem:[%s4852_s22 + $0x118] sm:$0xff] }
 0x22e   : > { %v4121_v14 = vpop.eup %4120  ;;  %2006 = vadd.xlane.f32.xlu0 %v2005_v25  ;;  %v2628_v36 = vmul.f32 %v1868_v60, %v1612_v19  ;;  %v2629_v22 = vmul.f32 %v1869_v50, %v1613_v34  ;;  %v1902_v41 = vmul.f32 %v4242_v54, %v4119_v31  ;;  %v1903_v9 = vmul.f32 %v4243_v5, %v4119_v31  ;;  %v4244_v5 = vld [vmem:[%s4852_s22 + $0x20] sm:$0xff] }
 0x22f   : > { %v4123_v42 = vpop.eup %4122  ;;  %v1614_v60 = vmul.f32 %v4121_v14, %v5249_v59  ;;  %v2660_v50 = vmul.f32 %v1900_v24, %v1612_v19  ;;  %v2661_v46 = vmul.f32 %v1901_v56, %v1613_v34  ;;  %4140 = vrsqrt.f32 %v1823_v49  ;;  %v1485_v56 = vpop.xlane.xlu1 %1484 }
 0x230   : > { %v4125_v23 = vpop.eup %4124  ;;  %v1582_v43 = vmul.f32 %v4123_v42, %v5273_v3  ;;  %v1583_v48 = vmul.f32 %v4123_v42, %v5263_v13  ;;  %v1615_v3 = vmul.f32 %v4121_v14, %v5254_v30  ;;  %v1482_v13 = vpop.xlane.xlu0 %1481  ;;  %v2692_v11 = vadd.f32 %v2629_v22, %v2628_v36  ;;  %v4246_v36 = vld [vmem:[%s4852_s22 + $0x120] sm:$0xff] }
 0x231   : > { %v4127_v47 = vpop.eup %4126  ;;  %v1584_v40 = vmul.f32 %v4125_v23, %v5270_v21  ;;  %v1585_v42 = vmul.f32 %v4125_v23, %v5283_v15  ;;  %4142 = vrsqrt.f32 %v1808_v61  ;;  %v1536_v30 = vmax.f32 %v1482_v13, 1e-24 }
 0x232   : > { %2054 = vadd.xlane.f32.xlu0 %v2053_v18  ;;  %v1943_v44 = vmul.f32 %v1870_v29, %v1582_v43  ;;  %v1944_v25 = vmul.f32 %v1871_v1, %v1583_v48  ;;  %v1975_v31 = vmul.f32 %v1902_v41, %v1582_v43  ;;  %v1976_v54 = vmul.f32 %v1903_v9, %v1583_v48  ;;  %v4129_v24 = vpop.eup %4128  ;;  %v4247_v43 = vld [vmem:[%s4852_s22 + $0x128] sm:$0xff] }
 0x233   : > { %v1809_v18 = vmax.f32 %v5450_v63, 1e-24  ;;  %v1872_v37 = vmul.f32 %v4244_v5, %v4127_v47  ;;  %v1873_v59 = vmul.f32 %v4245_v20, %v4127_v47  ;;  %v2630_v19 = vmul.f32 %v1870_v29, %v1614_v60  ;;  %v4131_v14 = vpop.eup %4130 }
 0x234   : > { %v2008_v17 = vadd.f32 %v1944_v25, %v1943_v44  ;;  %v2631_v34 = vmul.f32 %v1871_v1, %v1615_v3  ;;  %4144 = vrsqrt.f32 %v1824_v35  ;;  %v2740_v49 = vadd.f32 %v2661_v46, %v2660_v50  ;;  %v4133_v20 = vpop.eup %4132  ;;  %v1440_v44 = vpop.xlane.xlu0 %1439 }
 0x235   : > { %v1945_v21 = vmul.f32 %v1872_v37, %v1584_v40  ;;  %v1946_v15 = vmul.f32 %v1873_v59, %v1585_v42  ;;  %v2056_v63 = vadd.f32 %v1976_v54, %v1975_v31  ;;  %4146 = vrsqrt.f32 %v1809_v18 }
 0x236   : > { %2693 = vadd.xlane.f32.xlu0 %v2692_v11  ;;  %2009 = vadd.xlane.f32.xlu1 %v2008_v17  ;;  %v1521_v23 = vmax.f32 %v5670_v8, 1e-24  ;;  %4148 = vrsqrt.f32 %v1536_v30  ;;  %v1537_v61 = vmax.f32 %v1485_v56, 1e-24  ;;  %v1904_v22 = vmul.f32 %v4246_v36, %v4129_v24  ;;  %v5696_v30 = vpop.xlane.xlu1 %1442  ;;  %v4249_v56 = vld [vmem:[%s4852_s22 + $0x38] sm:$0xff] }
 0x237   : > { %v1905_v48 = vmul.f32 %v4247_v43, %v4129_v24  ;;  %v2011_v29 = vadd.f32 %v1946_v15, %v1945_v21  ;;  %v2695_v1 = vadd.f32 %v2631_v34, %v2630_v19  ;;  %v1616_v35 = vmul.f32 %v4131_v14, %v5276_v62 }
 0x238   : > { %v4135_v47 = vpop.eup %4134  ;;  %v1617_v25 = vmul.f32 %v4131_v14, %v5288_v33  ;;  %v1977_v50 = vmul.f32 %v1904_v22, %v1584_v40  ;;  %v2662_v46 = vmul.f32 %v1902_v41, %v1614_v60  ;;  %v2663_v11 = vmul.f32 %v1903_v9, %v1615_v3 }
 0x239   : > { %v4137_v13 = vpop.eup %4136  ;;  %v1978_v8 = vmul.f32 %v1905_v48, %v1585_v42  ;;  %v1825_v17 = vmax.f32 %v5396_v4, 1e-24  ;;  %4150 = vrsqrt.f32 %v1521_v23  ;;  %v1522_v54 = vmax.f32 %v1440_v44, 1e-24  ;;  %v4253_v44 = vld [vmem:[%s4852_s22 + $0x48] sm:$0xff] }
 0x23a   : > { %2741 = vadd.xlane.f32.xlu0 %v2740_v49  ;;  %2057 = vadd.xlane.f32.xlu1 %v2056_v63  ;;  %v4139_v31 = vpop.eup %4138  ;;  %4152 = vrsqrt.f32 %v1537_v61  ;;  %v5688_v18 = vmul.f32 %v4135_v47, %v5298_v55  ;;  %v5691_v62 = vmul.f32 %v4135_v47, %v5312_v52  ;;  %v2664_v33 = vmul.f32 %v1904_v22, %v1616_v35  ;;  %v4248_v55 = vld [vmem:[%s4852_s22 + $0x30] sm:$0xff]  ;;  %v4251_v22 = vld [vmem:[%s4852_s22 + $0x138] sm:$0xff] }
 0x23b   : > { %v2665_v40 = vmul.f32 %v1905_v48, %v1617_v25  ;;  %v2632_v41 = vmul.f32 %v1872_v37, %v1616_v35  ;;  %v2633_v9 = vmul.f32 %v1873_v59, %v1617_v25  ;;  %v2059_v60 = vadd.f32 %v1978_v8, %v1977_v50  ;;  %v4252_v48 = vld [vmem:[%s4852_s22 + $0x40] sm:$0xff] }
 0x23c   : > { %v2743_v4 = vadd.f32 %v2663_v11, %v2662_v46  ;;  %v1586_v3 = vmul.f32 %v4137_v13, %v5293_v51  ;;  %v1587_v42 = vmul.f32 %v4137_v13, %v5309_v27  ;;  %4154 = vrsqrt.f32 %v1825_v17  ;;  %v4141_v21 = vpop.eup %4140  ;;  %v1488_v51 = vpop.xlane.xlu0 %1487 }
 0x23d   : > { %v1810_v5 = vmax.f32 %v5486_v38, 1e-24  ;;  %v1874_v24 = vmul.f32 %v4248_v55, %v4133_v20  ;;  %v1875_v52 = vmul.f32 %v4249_v56, %v4133_v20  ;;  %v1826_v15 = vmax.f32 %v5428_v7, 1e-24  ;;  %v4250_v20 = vld [vmem:[%s4852_s22 + $0x130] sm:$0xff] }
 0x23e   : > { %2012 = vadd.xlane.f32.xlu0 %v2011_v29  ;;  %2696 = vadd.xlane.f32.xlu1 %v2695_v1  ;;  %4156 = vrsqrt.f32 %v1522_v54  ;;  %v4143_v37 = vpop.eup %4142  ;;  %v2746_v59 = vadd.f32 %v2665_v40, %v2664_v33  ;;  %v2698_v27 = vadd.f32 %v2633_v9, %v2632_v41  ;;  %v1588_v49 = vmul.f32 %v4139_v31, %v5319_v2  ;;  %v1491_v1 = vpop.xlane.xlu1 %1490  ;;  %v4254_v54 = vld [vmem:[%s4852_s22 + $0x140] sm:$0xff]  ;;  %v4255_v40 = vld [vmem:[%s4852_s22 + $0x148] sm:$0xff] }
 0x23f   : > { %v2634_v38 = vmul.f32 %v1874_v24, %v5688_v18  ;;  %v2635_v19 = vmul.f32 %v1875_v52, %v5691_v62  ;;  %v1947_v34 = vmul.f32 %v1874_v24, %v1586_v3  ;;  %v1948_v14 = vmul.f32 %v1875_v52, %v1587_v42 }
 0x240   : > { %v1589_v7 = vmul.f32 %v4139_v31, %v5331_v6  ;;  %4158 = vrsqrt.f32 %v1810_v5  ;;  %v1811_v23 = vmax.f32 %v5518_v10, 1e-24  ;;  %v1906_v61 = vmul.f32 %v4250_v20, %v4141_v21  ;;  %v1446_v11 = vpop.xlane.xlu0 %1445 }
 0x241   : > { %v4145_v63 = vpop.eup %4144  ;;  %4160 = vrsqrt.f32 %v1826_v15  ;;  %v1907_v43 = vmul.f32 %v4251_v22, %v4141_v21  ;;  %v1876_v47 = vmul.f32 %v4252_v48, %v4143_v37  ;;  %v1877_v29 = vmul.f32 %v4253_v44, %v4143_v37  ;;  %v4258_v44 = vld [vmem:[%s4852_s22 + $0x150] sm:$0xff] }
 0x242   : > { %2060 = vadd.xlane.f32.xlu0 %v2059_v60  ;;  %2744 = vadd.xlane.f32.xlu1 %v2743_v4  ;;  %v5707_v36 = vpop.eup %4146  ;;  %v1538_v6 = vmax.f32 %v1488_v51, 1e-24  ;;  %v2701_v35 = vadd.f32 %v2635_v19, %v2634_v38  ;;  %v1979_v10 = vmul.f32 %v1906_v61, %v1586_v3  ;;  %v2014_v25 = vadd.f32 %v1948_v14, %v1947_v34  ;;  %v1449_v14 = vpop.xlane.xlu1 %1448 }
 0x243   : > { %v4149_v2 = vpop.eup %4148  ;;  %v1980_v13 = vmul.f32 %v1907_v43, %v1587_v42  ;;  %v1949_v50 = vmul.f32 %v1876_v47, %v1588_v49  ;;  %v1950_v8 = vmul.f32 %v1877_v29, %v1589_v7  ;;  %4162 = vrsqrt.f32 %v1811_v23 }
 0x244   : > { %v1523_v46 = vmax.f32 %v5696_v30, 1e-24  ;;  %v1539_v31 = vmax.f32 %v1491_v1, 1e-24  ;;  %v1908_v33 = vmul.f32 %v4254_v54, %v4145_v63  ;;  %v1909_v41 = vmul.f32 %v4255_v40, %v4145_v63  ;;  %v4260_v1 = vld [vmem:[%s4852_s22 + $0x60] sm:$0xff] }
 0x245   : > { %v1620_v9 = vmul.f32 %v4149_v2, %v5326_v39  ;;  %4164 = vrsqrt.f32 %v1538_v6  ;;  %v2666_v4 = vmul.f32 %v1906_v61, %v5688_v18  ;;  %v2667_v3 = vmul.f32 %v1907_v43, %v5691_v62 }
 0x246   : > { %2747 = vadd.xlane.f32.xlu0 %v2746_v59  ;;  %2699 = vadd.xlane.f32.xlu1 %v2698_v27  ;;  %v4151_v17 = vpop.eup %4150  ;;  %v1621_v42 = vmul.f32 %v4149_v2, %v5336_v12  ;;  %v2062_v5 = vadd.f32 %v1980_v13, %v1979_v10  ;;  %v2017_v30 = vadd.f32 %v1950_v8, %v1949_v50  ;;  %v1827_v56 = vmax.f32 %v5464_v0, 1e-24  ;;  %v1494_v12 = vpop.xlane.xlu0 %1493  ;;  %v4259_v2 = vld [vmem:[%s4852_s22 + $0x158] sm:$0xff]  ;;  %v4261_v13 = vld [vmem:[%s4852_s22 + $0x68] sm:$0xff]  ;;  %v4262_v8 = vld [vmem:[%s4852_s22 + $0x160] sm:$0xff] }
 0x247   : > { %v4153_v60 = vpop.eup %4152  ;;  %v1981_v55 = vmul.f32 %v1908_v33, %v1588_v49  ;;  %v1982_v24 = vmul.f32 %v1909_v41, %v1589_v7  ;;  %4166 = vrsqrt.f32 %v1523_v46  ;;  %v1524_v21 = vmax.f32 %v1446_v11, 1e-24  ;;  %v4257_v7 = vld [vmem:[%s4852_s22 + $0x58] sm:$0xff]  ;;  %v4263_v46 = vld [vmem:[%s4852_s22 + $0x168] sm:$0xff] }
 0x248   : > { %4168 = vrsqrt.f32 %v1539_v31  ;;  %v2668_v39 = vmul.f32 %v1908_v33, %v1620_v9  ;;  %v5721_v18 = vmul.f32 %v4153_v60, %v5344_v57  ;;  %v2669_v15 = vmul.f32 %v1909_v41, %v1621_v42  ;;  %v4256_v57 = vld [vmem:[%s4852_s22 + $0x50] sm:$0xff]  ;;  %v1497_v31 = vpop.xlane.xlu1 %1496 }
 0x249   : > { %v4155_v52 = vpop.eup %4154  ;;  %v2636_v37 = vmul.f32 %v1876_v47, %v1620_v9  ;;  %v2637_v51 = vmul.f32 %v1877_v29, %v1621_v42  ;;  %v1623_v59 = vmul.f32 %v4153_v60, %v5358_v16  ;;  %v2749_v0 = vadd.f32 %v2667_v3, %v2666_v4  ;;  %v7145_v47 = vld [vmem:[#allocation14_spill] sm:$0xff] }
 0x24a   : > { %2702 = vadd.xlane.f32.xlu0 %v2701_v35  ;;  %2015 = vadd.xlane.f32.xlu1 %v2014_v25  ;;  %v2065_v27 = vadd.f32 %v1982_v24, %v1981_v55  ;;  %v1590_v38 = vmul.f32 %v4151_v17, %v5341_v26  ;;  %v1591_v19 = vmul.f32 %v4151_v17, %v5355_v32  ;;  %4170 = vrsqrt.f32 %v1827_v56  ;;  %v1452_v42 = vpop.xlane.xlu0 %1451 }
 0x24b   : > { %v4157_v62 = vpop.eup %4156  ;;  %v1812_v34 = vmax.f32 %v5554_v45, 1e-24  ;;  %v1878_v49 = vmul.f32 %v4256_v57, %v5707_v36  ;;  %v1879_v63 = vmul.f32 %v4257_v7, %v5707_v36  ;;  %v1828_v16 = vmax.f32 %v5496_v58, 1e-24 }
 0x24c   : > { %4172 = vrsqrt.f32 %v1524_v21  ;;  %v1540_v20 = vmax.f32 %v1494_v12, 1e-24  ;;  %v2752_v32 = vadd.f32 %v2669_v15, %v2668_v39  ;;  %v2704_v45 = vadd.f32 %v2637_v51, %v2636_v37  ;;  %v7147_v39 = vld [vmem:[#allocation13_spill] sm:$0xff]  ;;  %v7148_v12 = vld [vmem:[#allocation15_spill] sm:$0xff] }
 0x24d   : > { %v4159_v23 = vpop.eup %4158  ;;  %v2638_v61 = vmul.f32 %v1878_v49, %v5721_v18  ;;  %v2639_v22 = vmul.f32 %v1879_v63, %v1623_v59  ;;  %v1951_v43 = vmul.f32 %v1878_v49, %v1590_v38  ;;  %v1952_v48 = vmul.f32 %v1879_v63, %v1591_v19  ;;  %v7150_v63 = vld [vmem:[#allocation17_spill] sm:$0xff] }
 0x24e   : > { %2063 = vadd.xlane.f32.xlu1 %v2062_v5  ;;  %2018 = vadd.xlane.f32.xlu0 %v2017_v30  ;;  %v4161_v26 = vpop.eup %4160  ;;  %v1592_v36 = vmul.f32 %v4157_v62, %v5365_v28  ;;  %v1593_v58 = vmul.f32 %v4157_v62, %v7145_v47  ;;  %4174 = vrsqrt.f32 %v1812_v34  ;;  %v1910_v29 = vmul.f32 %v4258_v44, %v4155_v52 }
 0x24f   : > { %v1911_v6 = vmul.f32 %v4259_v2, %v4155_v52  ;;  %v1880_v35 = vmul.f32 %v4260_v1, %v4159_v23  ;;  %v1813_v25 = vmax.f32 %v5586_v53, 1e-24  ;;  %v1881_v50 = vmul.f32 %v4261_v13, %v4159_v23  ;;  %v7146_v53 = vld [vmem:[#allocation42_spill] sm:$0xff]  ;;  %v4265_v2 = vld [vmem:[%s4852_s22 + $0x78] sm:$0xff] }
 0x250   : > { %v5738_v10 = vpop.eup %4162  ;;  %v1912_v28 = vmul.f32 %v4262_v8, %v4161_v26  ;;  %v1913_v11 = vmul.f32 %v4263_v46, %v4161_v26  ;;  %v1525_v17 = vmax.f32 %v1449_v14, 1e-24  ;;  %4176 = vrsqrt.f32 %v1540_v20  ;;  %v1500_v14 = vpop.xlane.xlu0 %1499  ;;  %v7151_v20 = vld [vmem:[#allocation19_spill] sm:$0xff] }
 0x251   : > { %v2707_v54 = vadd.f32 %v2639_v22, %v2638_v61  ;;  %v1983_v33 = vmul.f32 %v1910_v29, %v1590_v38  ;;  %v2020_v41 = vadd.f32 %v1952_v48, %v1951_v43  ;;  %v1984_v9 = vmul.f32 %v1911_v6, %v1591_v19  ;;  %v7153_v61 = vld [vmem:[#allocation18_spill] sm:$0xff]  ;;  %v1455_v43 = vpop.xlane.xlu1 %1454 }
 0x252   : > { %2750 = vadd.xlane.f32.xlu1 %v2749_v0  ;;  %2066 = vadd.xlane.f32.xlu0 %v2065_v27  ;;  %v4165_v40 = vpop.eup %4164  ;;  %v1953_v60 = vmul.f32 %v1880_v35, %v1592_v36  ;;  %v1954_v4 = vmul.f32 %v1881_v50, %v1593_v58  ;;  %4178 = vrsqrt.f32 %v1828_v16  ;;  %v1829_v3 = vmax.f32 %v7146_v53, 1e-24  ;;  %v7149_v0 = vld [vmem:[#allocation49_spill] sm:$0xff]  ;;  %v4264_v48 = vld [vmem:[%s4852_s22 + $0x70] sm:$0xff] }
 0x253   : > { %v2670_v5 = vmul.f32 %v1910_v29, %v5721_v18  ;;  %v1541_v55 = vmax.f32 %v1497_v31, 1e-24  ;;  %v2671_v24 = vmul.f32 %v1911_v6, %v1623_v59  ;;  %v1985_v56 = vmul.f32 %v1912_v28, %v1592_v36 }
 0x254   : > { %v4167_v30 = vpop.eup %4166  ;;  %v1986_v52 = vmul.f32 %v1913_v11, %v1593_v58  ;;  %4180 = vrsqrt.f32 %v1813_v25  ;;  %v1624_v62 = vmul.f32 %v4165_v40, %v7147_v39  ;;  %v1625_v15 = vmul.f32 %v4165_v40, %v7148_v12  ;;  %v7154_v58 = vld [vmem:[#allocation55_spill] sm:$0xff]  ;;  %v7155_v25 = vld [vmem:[#allocation20_spill] sm:$0xff]  ;;  %v7157_v39 = vld [vmem:[#allocation21_spill] sm:$0xff] }
 0x255   : > { %v4169_v21 = vpop.eup %4168  ;;  %4182 = vrsqrt.f32 %v1525_v17  ;;  %v2068_v37 = vadd.f32 %v1984_v9, %v1983_v33  ;;  %v2023_v51 = vadd.f32 %v1954_v4, %v1953_v60  ;;  %v1814_v27 = vmax.f32 %v7149_v0, 1e-24  ;;  %v4267_v40 = vld [vmem:[%s4852_s22 + $0x178] sm:$0xff]  ;;  %v4268_v9 = vld [vmem:[%s4852_s22 + $0x80] sm:$0xff]  ;;  %v4269_v60 = vld [vmem:[%s4852_s22 + $0x88] sm:$0xff] }
 0x256   : > { %2753 = vadd.xlane.f32.xlu0 %v2752_v32  ;;  %2705 = vadd.xlane.f32.xlu1 %v2704_v45  ;;  %4184 = vrsqrt.f32 %v1829_v3  ;;  %v1526_v38 = vmax.f32 %v1452_v42, 1e-24  ;;  %v2755_v59 = vadd.f32 %v2671_v24, %v2670_v5  ;;  %v2071_v19 = vadd.f32 %v1986_v52, %v1985_v56  ;;  %v7152_v32 = vld [vmem:[#allocation16_spill] sm:$0xff]  ;;  %v1503_v42 = vpop.xlane.xlu1 %1502  ;;  %v7158_v12 = vld [vmem:[#allocation23_spill] sm:$0xff] }
 0x257   : > { %v4171_v18 = vpop.eup %4170  ;;  %4186 = vrsqrt.f32 %v1541_v55  ;;  %v2672_v57 = vmul.f32 %v1912_v28, %v1624_v62  ;;  %v2673_v49 = vmul.f32 %v1913_v11, %v1625_v15  ;;  %v2640_v7 = vmul.f32 %v1880_v35, %v1624_v62 }
 0x258   : > { %v1626_v23 = vmul.f32 %v4169_v21, %v7150_v63  ;;  %v2641_v16 = vmul.f32 %v1881_v50, %v1625_v15  ;;  %v1627_v26 = vmul.f32 %v4169_v21, %v7151_v20  ;;  %v1594_v45 = vmul.f32 %v4167_v30, %v7152_v32  ;;  %v7156_v50 = vld [vmem:[#allocation22_spill] sm:$0xff] }
 0x259   : > { %v4173_v34 = vpop.eup %4172  ;;  %v1595_v22 = vmul.f32 %v4167_v30, %v7153_v61  ;;  %4188 = vrsqrt.f32 %v1814_v27  ;;  %v1882_v36 = vmul.f32 %v4264_v48, %v5738_v10  ;;  %v1830_v44 = vmax.f32 %v7154_v58, 1e-24  ;;  %v1458_v27 = vpop.xlane.xlu0 %1457  ;;  %v7161_v32 = vld [vmem:[#allocation26_spill] sm:$0xff] }
 0x25a   : > { %2708 = vadd.xlane.f32.xlu0 %v2707_v54  ;;  %2021 = vadd.xlane.f32.xlu1 %v2020_v41  ;;  %4190 = vrsqrt.f32 %v1526_v38  ;;  %v1542_v29 = vmax.f32 %v1500_v14, 1e-24  ;;  %v1883_v6 = vmul.f32 %v4265_v2, %v5738_v10  ;;  %v2758_v1 = vadd.f32 %v2673_v49, %v2672_v57  ;;  %v4266_v54 = vld [vmem:[%s4852_s22 + $0x170] sm:$0xff] }
 0x25b   : > { %v4175_v47 = vpop.eup %4174  ;;  %v2642_v35 = vmul.f32 %v1882_v36, %v1626_v23  ;;  %v5759_v13 = vmul.f32 %v4173_v34, %v7155_v25  ;;  %v5762_v8 = vmul.f32 %v4173_v34, %v7156_v50  ;;  %v2710_v46 = vadd.f32 %v2641_v16, %v2640_v7  ;;  %v7160_v16 = vld [vmem:[#allocation24_spill] sm:$0xff]  ;;  %v7162_v61 = vld [vmem:[#allocation54_spill] sm:$0xff] }
 0x25c   : > { %v2643_v11 = vmul.f32 %v1883_v6, %v1627_v26  ;;  %v1955_v17 = vmul.f32 %v1882_v36, %v1594_v45  ;;  %v1956_v31 = vmul.f32 %v1883_v6, %v1595_v22  ;;  %v1914_v33 = vmul.f32 %v4266_v54, %v4171_v18  ;;  %v4271_v36 = vld [vmem:[%s4852_s22 + $0x188] sm:$0xff]  ;;  %v4272_v58 = vld [vmem:[%s4852_s22 + $0x90] sm:$0xff]  ;;  %v7164_v54 = vld [vmem:[#allocation27_spill] sm:$0xff] }
 0x25d   : > { %v4177_v28 = vpop.eup %4176  ;;  %v1915_v41 = vmul.f32 %v4267_v40, %v4171_v18  ;;  %v1884_v10 = vmul.f32 %v4268_v9, %v4175_v47  ;;  %v1885_v4 = vmul.f32 %v4269_v60, %v4175_v47  ;;  %v1527_v3 = vmax.f32 %v1455_v43, 1e-24  ;;  %v4270_v43 = vld [vmem:[%s4852_s22 + $0x180] sm:$0xff]  ;;  %v1461_v9 = vpop.xlane.xlu1 %1460 }
 0x25e   : > { %2069 = vadd.xlane.f32.xlu1 %v2068_v37  ;;  %2024 = vadd.xlane.f32.xlu0 %v2023_v51  ;;  %4192 = vrsqrt.f32 %v1542_v29  ;;  %v1987_v5 = vmul.f32 %v1914_v33, %v1594_v45  ;;  %v2713_v52 = vadd.f32 %v2643_v11, %v2642_v35  ;;  %v2026_v21 = vadd.f32 %v1956_v31, %v1955_v17  ;;  %v7159_v51 = vld [vmem:[#allocation57_spill] sm:$0xff]  ;;  %v4273_v29 = vld [vmem:[%s4852_s22 + $0x98] sm:$0xff]  ;;  %v7165_v40 = vld [vmem:[#allocation56_spill] sm:$0xff] }
 0x25f   : > { %v4179_v53 = vpop.eup %4178  ;;  %v1988_v30 = vmul.f32 %v1915_v41, %v1595_v22  ;;  %v1957_v55 = vmul.f32 %v1884_v10, %v5759_v13  ;;  %v1958_v24 = vmul.f32 %v1885_v4, %v5762_v8  ;;  %v1628_v62 = vmul.f32 %v4177_v28, %v7157_v39 }
 0x260   : > { %v1629_v15 = vmul.f32 %v4177_v28, %v7158_v12  ;;  %4194 = vrsqrt.f32 %v1830_v44  ;;  %v1815_v0 = vmax.f32 %v7159_v51, 1e-24  ;;  %v1543_v38 = vmax.f32 %v1503_v42, 1e-24  ;;  %v7163_v28 = vld [vmem:[#allocation25_spill] sm:$0xff]  ;;  %v4275_v12 = vld [vmem:[%s4852_s22 + $0x198] sm:$0xff] }
 0x261   : > { %v4181_v56 = vpop.eup %4180  ;;  %4196 = vrsqrt.f32 %v1527_v3  ;;  %v2029_v34 = vadd.f32 %v1958_v24, %v1957_v55  ;;  %v2674_v14 = vmul.f32 %v1914_v33, %v1626_v23  ;;  %v2675_v57 = vmul.f32 %v1915_v41, %v1627_v26  ;;  %v7167_v55 = vld [vmem:[#allocation30_spill] sm:$0xff]  ;;  %v4276_v51 = vld [vmem:[%s4852_s22 + $0xa0] sm:$0xff] }
 0x262   : > { %2756 = vadd.xlane.f32.xlu1 %v2755_v59  ;;  %2072 = vadd.xlane.f32.xlu0 %v2071_v19  ;;  %v4183_v37 = vpop.eup %4182  ;;  %v2074_v19 = vadd.f32 %v1988_v30, %v1987_v5  ;;  %v4353_v49 = vmov 0   ;;  %v2644_v7 = vmul.f32 %v1884_v10, %v1628_v62  ;;  %v2645_v63 = vmul.f32 %v1885_v4, %v1629_v15  ;;  %v7166_v5 = vld [vmem:[#allocation28_spill] sm:$0xff] }
 0x263   : > { %v5773_v18 = vpop.eup %4184  ;;  %4058 = vset.pattern.permute.xlu0 %v4353_v49  ;;  %v1598_v20 = vmul.f32 %v4183_v37, %v7160_v16  ;;  %v1599_v45 = vmul.f32 %v4183_v37, %v7161_v32  ;;  %4059 = vset.pattern.permute.xlu1 %v4353_v49  ;;  %4198 = vrsqrt.f32 %v1815_v0  ;;  %v1831_v22 = vmax.f32 %v7162_v61, 1e-24  ;;  %v7169_v49 = vld [vmem:[#allocation29_spill] sm:$0xff] }
 0x264   : > { %v4187_v59 = vpop.eup %4186  ;;  %v1916_v48 = vmul.f32 %v4270_v43, %v4179_v53  ;;  %v1917_v47 = vmul.f32 %v4271_v36, %v4179_v53  ;;  %4200 = vrsqrt.f32 %v1543_v38  ;;  %v1528_v26 = vmax.f32 %v1458_v27, 1e-24  ;;  %v4277_v27 = vld [vmem:[%s4852_s22 + $0xa8] sm:$0xff] }
 0x265   : > { %v1886_v44 = vmul.f32 %v4272_v58, %v4181_v56  ;;  %v1887_v2 = vmul.f32 %v4273_v29, %v4181_v56  ;;  %v2761_v35 = vadd.f32 %v2675_v57, %v2674_v14  ;;  %v2716_v11 = vadd.f32 %v2645_v63, %v2644_v7  ;;  %v7168_v56 = vld [vmem:[#allocation59_spill] sm:$0xff] }
 0x266   : > { %2759 = vadd.xlane.f32.xlu0 %v2758_v1  ;;  %2711 = vadd.xlane.f32.xlu1 %v2710_v46  ;;  %v4189_v23 = vpop.eup %4188  ;;  %v1506_v1 = vpop.xlane.xlu0 %1505  ;;  %v1989_v25 = vmul.f32 %v1916_v48, %v5759_v13  ;;  %v1990_v50 = vmul.f32 %v1917_v47, %v5762_v8  ;;  %v1630_v46 = vmul.f32 %v4187_v59, %v7163_v28  ;;  %4202 = vrsqrt.f32 %v1831_v22  ;;  %v7171_v22 = vld [vmem:[#allocation61_spill] sm:$0xff]  ;;  %v4278_v28 = vld [vmem:[%s4852_s22 + $0x1a0] sm:$0xff] }
 0x267   : > { %v4191_v6 = vpop.eup %4190  ;;  %v1959_v17 = vmul.f32 %v1886_v44, %v1598_v20  ;;  %v1960_v31 = vmul.f32 %v1887_v2, %v1599_v45  ;;  %v1631_v33 = vmul.f32 %v4187_v59, %v7164_v54  ;;  %v1816_v41 = vmax.f32 %v7165_v40, 1e-24 }
 0x268   : > { %4204 = vrsqrt.f32 %v1528_v26  ;;  %v1544_v10 = vmax.f32 %v1506_v1, 1e-24  ;;  %v2077_v60 = vadd.f32 %v1990_v50, %v1989_v25  ;;  %v2676_v8 = vmul.f32 %v1916_v48, %v1628_v62  ;;  %v7173_v1 = vld [vmem:[#allocation34_spill] sm:$0xff] }
 0x269   : > { %v2677_v4 = vmul.f32 %v1917_v47, %v1629_v15  ;;  %v2646_v53 = vmul.f32 %v1886_v44, %v1630_v46  ;;  %v2032_v3 = vadd.f32 %v1960_v31, %v1959_v17  ;;  %v2647_v42 = vmul.f32 %v1887_v2, %v1631_v33  ;;  %v7172_v2 = vld [vmem:[#allocation32_spill] sm:$0xff]  ;;  %v7174_v25 = vld [vmem:[#allocation58_spill] sm:$0xff]  ;;  %v4279_v17 = vld [vmem:[%s4852_s22 + $0x1a8] sm:$0xff] }
 0x26a   : > { %2714 = vadd.xlane.f32.xlu0 %v2713_v52  ;;  %2027 = vadd.xlane.f32.xlu1 %v2026_v21  ;;  %v1600_v30 = vmul.f32 %v4191_v6, %v7166_v5  ;;  %v1601_v24 = vmul.f32 %v4191_v6, %v7167_v55  ;;  %v1832_v52 = vmax.f32 %v7168_v56, 1e-24  ;;  %4206 = vrsqrt.f32 %v1816_v41  ;;  %v4274_v21 = vld [vmem:[%s4852_s22 + $0x190] sm:$0xff]  ;;  %v1464_v48 = vpop.xlane.xlu0 %1463  ;;  %v4281_v41 = vld [vmem:[%s4852_s22 + $0xb8] sm:$0xff] }
 0x26b   : > { %v4193_v13 = vpop.eup %4192  ;;  %v1918_v39 = vmul.f32 %v4274_v21, %v5773_v18  ;;  %v1919_v37 = vmul.f32 %v4275_v12, %v5773_v18  ;;  %v1529_v15 = vmax.f32 %v1461_v9, 1e-24  ;;  %4208 = vrsqrt.f32 %v1544_v10  ;;  %v7170_v18 = vld [vmem:[#allocation31_spill] sm:$0xff]  ;;  %v7177_v21 = vld [vmem:[#allocation60_spill] sm:$0xff] }
 0x26c   : > { %v1888_v0 = vmul.f32 %v4276_v51, %v4189_v23  ;;  %v1889_v38 = vmul.f32 %v4277_v27, %v4189_v23  ;;  %v1632_v7 = vmul.f32 %v4193_v13, %v7169_v49  ;;  %v2719_v63 = vadd.f32 %v2647_v42, %v2646_v53  ;;  %v7175_v53 = vld [vmem:[#allocation33_spill] sm:$0xff]  ;;  %v7176_v56 = vld [vmem:[#allocation35_spill] sm:$0xff] }
 0x26d   : > { %v4195_v62 = vpop.eup %4194  ;;  %v1991_v14 = vmul.f32 %v1918_v39, %v1598_v20  ;;  %v1992_v57 = vmul.f32 %v1919_v37, %v1599_v45  ;;  %v1633_v61 = vmul.f32 %v4193_v13, %v7170_v18  ;;  %4210 = vrsqrt.f32 %v1832_v52 }
 0x26e   : > { %2075 = vadd.xlane.f32.xlu1 %v2074_v19  ;;  %2030 = vadd.xlane.f32.xlu0 %v2029_v34  ;;  %v4197_v59 = vpop.eup %4196  ;;  %v1509_v19 = vpop.xlane.xlu1 %1508  ;;  %v2764_v34 = vadd.f32 %v2677_v4, %v2676_v8  ;;  %v1961_v16 = vmul.f32 %v1888_v0, %v1600_v30  ;;  %v1962_v32 = vmul.f32 %v1889_v38, %v1601_v24  ;;  %v1817_v43 = vmax.f32 %v7171_v22, 1e-24 }
 0x26f   : > { %4212 = vrsqrt.f32 %v1529_v15  ;;  %v1545_v47 = vmax.f32 %v1509_v19, 1e-24  ;;  %v2080_v45 = vadd.f32 %v1992_v57, %v1991_v14  ;;  %v2678_v23 = vmul.f32 %v1918_v39, %v1630_v46  ;;  %v1512_v13 = vpop.xlane.xlu0 %1511  ;;  %v7180_v57 = vld [vmem:[#allocation63_spill] sm:$0xff] }
 0x270   : > { %v4199_v36 = vpop.eup %4198  ;;  %v2679_v26 = vmul.f32 %v1919_v37, %v1631_v33  ;;  %v2648_v58 = vmul.f32 %v1888_v0, %v1632_v7  ;;  %v2035_v44 = vadd.f32 %v1962_v32, %v1961_v16  ;;  %v2649_v29 = vmul.f32 %v1889_v38, %v1633_v61  ;;  %v4280_v33 = vld [vmem:[%s4852_s22 + $0xb0] sm:$0xff]  ;;  %v4283_v32 = vld [vmem:[%s4852_s22 + $0x1b8] sm:$0xff] }
 0x271   : > { %v4201_v20 = vpop.eup %4200  ;;  %v1602_v6 = vmul.f32 %v4197_v59, %v7172_v2  ;;  %4214 = vrsqrt.f32 %v1817_v43  ;;  %v1833_v50 = vmax.f32 %v7174_v25, 1e-24  ;;  %v1921_v31 = vmul.f32 %v4279_v17, %v4195_v62  ;;  %v7182_v25 = vld [vmem:[#allocation39_spill] sm:$0xff] }
 0x272   : > { %2762 = vadd.xlane.f32.xlu1 %v2761_v35  ;;  %2717 = vadd.xlane.f32.xlu0 %v2716_v11  ;;  %v1603_v35 = vmul.f32 %v4197_v59, %v7173_v1  ;;  %v1920_v11 = vmul.f32 %v4278_v28, %v4195_v62  ;;  %4216 = vrsqrt.f32 %v1545_v47  ;;  %v1530_v46 = vmax.f32 %v1464_v48, 1e-24  ;;  %v1467_v12 = vpop.xlane.xlu1 %1466  ;;  %v7178_v59 = vld [vmem:[#allocation36_spill] sm:$0xff]  ;;  %v4285_v48 = vld [vmem:[%s4852_s22 + $0xc8] sm:$0xff] }
 0x273   : > { %v4203_v54 = vpop.eup %4202  ;;  %v1890_v40 = vmul.f32 %v4280_v33, %v4199_v36  ;;  %v1891_v9 = vmul.f32 %v4281_v41, %v4199_v36  ;;  %v1994_v4 = vmul.f32 %v1921_v31, %v1601_v24  ;;  %v2722_v42 = vadd.f32 %v2649_v29, %v2648_v58  ;;  %v7181_v58 = vld [vmem:[#allocation37_spill] sm:$0xff]  ;;  %v7184_v33 = vld [vmem:[#allocation40_spill] sm:$0xff] }
 0x274   : > { %v1993_v8 = vmul.f32 %v1920_v11, %v1600_v30  ;;  %v1635_v52 = vmul.f32 %v4201_v20, %v7176_v56  ;;  %4218 = vrsqrt.f32 %v1833_v50  ;;  %v1818_v39 = vmax.f32 %v7177_v21, 1e-24  ;;  %v7183_v28 = vld [vmem:[#allocation65_spill] sm:$0xff] }
 0x275   : > { %v4205_v10 = vpop.eup %4204  ;;  %v1963_v5 = vmul.f32 %v1890_v40, %v1602_v6  ;;  %v1964_v55 = vmul.f32 %v1891_v9, %v1603_v35  ;;  %4220 = vrsqrt.f32 %v1530_v46  ;;  %v1546_v62 = vmax.f32 %v1512_v13, 1e-24  ;;  %v7185_v13 = vld [vmem:[#allocation43_spill] sm:$0xff] }
 0x276   : > { %2078 = vadd.xlane.f32.xlu1 %v2077_v60  ;;  %2033 = vadd.xlane.f32.xlu0 %v2032_v3  ;;  %v2767_v60 = vadd.f32 %v2679_v26, %v2678_v23  ;;  %v1634_v3 = vmul.f32 %v4201_v20, %v7175_v53  ;;  %v2083_v24 = vadd.f32 %v1994_v4, %v1993_v8  ;;  %v1834_v49 = vmax.f32 %v7180_v57, 1e-24  ;;  %v1515_v20 = vpop.xlane.xlu1 %1514  ;;  %v4286_v8 = vld [vmem:[%s4852_s22 + $0x1c0] sm:$0xff]  ;;  %v4287_v53 = vld [vmem:[%s4852_s22 + $0x1c8] sm:$0xff] }
 0x277   : > { %v4207_v37 = vpop.eup %4206  ;;  %v2680_v15 = vmul.f32 %v1920_v11, %v1632_v7  ;;  %v2681_v51 = vmul.f32 %v1921_v31, %v1633_v61  ;;  %v2038_v27 = vadd.f32 %v1964_v55, %v1963_v5  ;;  %v2651_v38 = vmul.f32 %v1891_v9, %v1635_v52  ;;  %v4284_v7 = vld [vmem:[%s4852_s22 + $0xc0] sm:$0xff]  ;;  %v4288_v5 = vld [vmem:[%s4852_s22 + $0xd0] sm:$0xff] }
 0x278   : > { %v4209_v30 = vpop.eup %4208  ;;  %v2650_v0 = vmul.f32 %v1890_v40, %v1634_v3  ;;  %v1604_v19 = vmul.f32 %v4205_v10, %v7178_v59  ;;  %4222 = vrsqrt.f32 %v1818_v39  ;;  %v1923_v18 = vmul.f32 %v4283_v32, %v4203_v54  ;;  %v7188_v59 = vld [vmem:[#allocation62_spill] sm:$0xff] }
 0x279   : > { %v1531_v43 = vmax.f32 %v1467_v12, 1e-24  ;;  %4224 = vrsqrt.f32 %v1546_v62  ;;  %v1892_v61 = vmul.f32 %v4284_v7, %v4207_v37  ;;  %v1893_v36 = vmul.f32 %v4285_v48, %v4207_v37 }
 0x27a   : > { %2765 = vadd.xlane.f32.xlu1 %v2764_v34  ;;  %2720 = vadd.xlane.f32.xlu0 %v2719_v63  ;;  %v7179_v34 = vld [vmem:[#allocation38_spill] sm:$0xff]  ;;  %v4211_v22 = vpop.eup %4210  ;;  %v1996_v26 = vmul.f32 %v1923_v18, %v1603_v35  ;;  %v2725_v29 = vadd.f32 %v2651_v38, %v2650_v0  ;;  %v1637_v50 = vmul.f32 %v4209_v30, %v7182_v25  ;;  %4226 = vrsqrt.f32 %v1834_v49  ;;  %v7187_v0 = vld [vmem:[#allocation44_spill] sm:$0xff] }
 0x27b   : > { %v1605_v14 = vmul.f32 %v4205_v10, %v7179_v34  ;;  %v4282_v63 = vld [vmem:[%s4852_s22 + $0x1b0] sm:$0xff]  ;;  %v1965_v2 = vmul.f32 %v1892_v61, %v1604_v19  ;;  %v1819_v11 = vmax.f32 %v7183_v28, 1e-24  ;;  %4228 = vrsqrt.f32 %v1531_v43  ;;  %v7190_v43 = vld [vmem:[#allocation47_spill] sm:$0xff] }
 0x27c   : > { %v1922_v16 = vmul.f32 %v4282_v63, %v4203_v54  ;;  %v4213_v47 = vpop.eup %4212  ;;  %v1547_v31 = vmax.f32 %v1515_v20, 1e-24  ;;  %v2683_v46 = vmul.f32 %v1923_v18, %v1635_v52  ;;  %v2653_v10 = vmul.f32 %v1893_v36, %v1637_v50  ;;  %v4292_v20 = vld [vmem:[%s4852_s22 + $0xe0] sm:$0xff] }
 0x27d   : > { %v1966_v1 = vmul.f32 %v1893_v36, %v1605_v14  ;;  %v1606_v40 = vmul.f32 %v4213_v47, %v7184_v33  ;;  %4230 = vrsqrt.f32 %v1819_v11  ;;  %v1924_v4 = vmul.f32 %v4286_v8, %v4211_v22  ;;  %v4291_v36 = vld [vmem:[%s4852_s22 + $0x1d8] sm:$0xff]  ;;  %v7191_v11 = vld [vmem:[#allocation46_spill] sm:$0xff]  ;;  %v7194_v8 = vld [vmem:[#allocation52_spill] sm:$0xff] }
 0x27e   : > { %2081 = vadd.xlane.f32.xlu1 %v2080_v45  ;;  %2036 = vadd.xlane.f32.xlu0 %v2035_v44  ;;  %v2770_v45 = vadd.f32 %v2681_v51, %v2680_v15  ;;  %v1995_v23 = vmul.f32 %v1922_v16, %v1602_v6  ;;  %v1636_v44 = vmul.f32 %v4209_v30, %v7181_v58  ;;  %v4215_v17 = vpop.eup %4214  ;;  %4232 = vrsqrt.f32 %v1547_v31  ;;  %v7186_v15 = vld [vmem:[#allocation41_spill] sm:$0xff]  ;;  %v7192_v31 = vld [vmem:[#allocation48_spill] sm:$0xff] }
 0x27f   : > { %v4217_v6 = vpop.eup %4216  ;;  %v2682_v54 = vmul.f32 %v1922_v16, %v1634_v3  ;;  %v2041_v41 = vadd.f32 %v1966_v1, %v1965_v2  ;;  %v1894_v55 = vmul.f32 %v4288_v5, %v4215_v17  ;;  %v4289_v3 = vld [vmem:[%s4852_s22 + $0xd8] sm:$0xff]  ;;  %v1997_v12 = vmul.f32 %v1924_v4, %v1604_v19  ;;  %v4295_v5 = vld [vmem:[%s4852_s22 + $0x1e8] sm:$0xff] }
 0x280   : > { %v2086_v35 = vadd.f32 %v1996_v26, %v1995_v23  ;;  %v2652_v9 = vmul.f32 %v1892_v61, %v1636_v44  ;;  %v1895_v52 = vmul.f32 %v4289_v3, %v4215_v17  ;;  %v1638_v51 = vmul.f32 %v4217_v6, %v7186_v15  ;;  %v4290_v61 = vld [vmem:[%s4852_s22 + $0x1d0] sm:$0xff]  ;;  %v4293_v26 = vld [vmem:[%s4852_s22 + $0xe8] sm:$0xff]  ;;  %v7195_v15 = vld [vmem:[#allocation51_spill] sm:$0xff] }
 0x281   : > { %v4219_v56 = vpop.eup %4218  ;;  %v2773_v39 = vadd.f32 %v2683_v46, %v2682_v54  ;;  %v1967_v62 = vmul.f32 %v1894_v55, %v1606_v40  ;;  %v1835_v34 = vmax.f32 %v7188_v59, 1e-24  ;;  %v2684_v63 = vmul.f32 %v1924_v4, %v1636_v44 }
 0x282   : > { %2768 = vadd.xlane.f32.xlu1 %v2767_v60  ;;  %2723 = vadd.xlane.f32.xlu0 %v2722_v42  ;;  %v1607_v60 = vmul.f32 %v4213_v47, %v7185_v13  ;;  %v1925_v42 = vmul.f32 %v4287_v53, %v4211_v22  ;;  %v4221_v21 = vpop.eup %4220  ;;  %v2728_v30 = vadd.f32 %v2653_v10, %v2652_v9  ;;  %v4294_v53 = vld [vmem:[%s4852_s22 + $0x1e0] sm:$0xff] }
 0x283   : > { %v2654_v18 = vmul.f32 %v1894_v55, %v1638_v51  ;;  %v1609_v7 = vmul.f32 %v4221_v21, %v7190_v43  ;;  %v1926_v48 = vmul.f32 %v4290_v61, %v4219_v56  ;;  %v1927_v47 = vmul.f32 %v4291_v36, %v4219_v56  ;;  %v4296_v56 = vld [vmem:[%s4852_s22 + $0xf0] sm:$0xff] }
 0x284   : > { %v1998_v37 = vmul.f32 %v1925_v42, %v1605_v14  ;;  %v2685_v19 = vmul.f32 %v1925_v42, %v1637_v50  ;;  %v7189_v14 = vld [vmem:[#allocation45_spill] sm:$0xff]  ;;  %4234 = vrsqrt.f32 %v1835_v34 }
 0x285   : > { %v4223_v38 = vpop.eup %4222  ;;  %v1608_v16 = vmul.f32 %v4221_v21, %v7189_v14  ;;  %v1999_v2 = vmul.f32 %v1926_v48, %v1606_v40  ;;  %v2000_v1 = vmul.f32 %v1927_v47, %v1607_v60  ;;  %v2686_v33 = vmul.f32 %v1926_v48, %v1638_v51  ;;  %v7193_v40 = vld [vmem:[#allocation50_spill] sm:$0xff] }
 0x286   : > { %2084 = vadd.xlane.f32.xlu1 %v2083_v24  ;;  %2039 = vadd.xlane.f32.xlu0 %v2038_v27  ;;  %v1968_v24 = vmul.f32 %v1895_v52, %v1607_v60  ;;  %v1639_v27 = vmul.f32 %v4217_v6, %v7187_v0  ;;  %v4225_v57 = vpop.eup %4224  ;;  %v2089_v49 = vadd.f32 %v1998_v37, %v1997_v12  ;;  %v7196_v0 = vld [vmem:[#allocation53_spill] sm:$0xff]  ;;  %v4298_v14 = vld [vmem:[%s4852_s22 + $0x1f0] sm:$0xff] }
 0x287   : > { %v4227_v23 = vpop.eup %4226  ;;  %v1897_v58 = vmul.f32 %v4293_v26, %v4223_v38  ;;  %v1640_v17 = vmul.f32 %v4225_v57, %v7191_v11  ;;  %v1641_v6 = vmul.f32 %v4225_v57, %v7192_v31  ;;  %v2092_v46 = vadd.f32 %v2000_v1, %v1999_v2  ;;  %v7200_v2 = vld [vmem:[#allocation11_spill] sm:$0xff] }
 0x288   : > { %v2044_v32 = vadd.f32 %v1968_v24, %v1967_v62  ;;  %v2655_v22 = vmul.f32 %v1895_v52, %v1639_v27  ;;  %v4229_v44 = vpop.eup %4228  ;;  %v1928_v42 = vmul.f32 %v4294_v53, %v4227_v23  ;;  %v1929_v55 = vmul.f32 %v4295_v5, %v4227_v23  ;;  %v4297_v52 = vld [vmem:[%s4852_s22 + $0xf8] sm:$0xff] }
 0x289   : > { %v1970_v28 = vmul.f32 %v1897_v58, %v1609_v7  ;;  %v1610_v9 = vmul.f32 %v4229_v44, %v7193_v40  ;;  %v2657_v60 = vmul.f32 %v1897_v58, %v1641_v6  ;;  %v1611_v4 = vmul.f32 %v4229_v44, %v7194_v8  ;;  %v7199_v44 = vld [vmem:[#allocation9_spill] sm:$0xff] }
 0x28a   : > { %2771 = vadd.xlane.f32.xlu1 %v2770_v45  ;;  %2726 = vadd.xlane.f32.xlu0 %v2725_v29  ;;  %v1896_v45 = vmul.f32 %v4292_v20, %v4223_v38  ;;  %v2776_v29 = vadd.f32 %v2685_v19, %v2684_v63  ;;  %v2731_v50 = vadd.f32 %v2655_v22, %v2654_v18  ;;  %v7198_v26 = vmov 0.0  }
 0x28b   : > { %v2001_v12 = vmul.f32 %v1928_v42, %v1608_v16  ;;  %v2002_v37 = vmul.f32 %v1929_v55, %v1609_v7  ;;  %v2688_v34 = vmul.f32 %v1928_v42, %v1640_v17  ;;  %v2172_v8 = vadd.s32 4294967248, %v7199_v44 }
 0x28c   : > { %v1969_v25 = vmul.f32 %v1896_v45, %v1608_v16  ;;  %v2656_v13 = vmul.f32 %v1896_v45, %v1640_v17  ;;  %v7197_v45 = vld [vmem:[#allocation10_spill] sm:$0xff]  ;;  %v7201_v17 = vld [vmem:[#allocation12_spill] sm:$0xff]  ;;  %v2179_v5 = vadd.s32 4294967240, %v7199_v44 }
 0x28d   : > { %v2095_v59 = vadd.f32 %v2002_v37, %v2001_v12  ;;  %vm2325_vm1 = vcmp.eq.s32.totalorder %v7197_v45, 0  ;;  %vm2982_vm2 = vcmp.eq.s32.totalorder %v7197_v45, 1 }
 0x28e   : > { %2087 = vadd.xlane.f32.xlu1 %v2086_v35  ;;  %2042 = vadd.xlane.f32.xlu0 %v2041_v41  ;;  %v4231_v35 = vpop.eup %4230  ;;  %v2687_v41 = vmul.f32 %v1927_v47, %v1639_v27  ;;  %v2047_v10 = vadd.f32 %v1970_v28, %v1969_v25  ;;  %v3920_v58 = vsel %vm2325_vm1, 1.0, %v7198_v26  ;;  %v3954_v25 = vsel %vm2982_vm2, 1.0, %v7198_v26 }
 0x28f   : > { %v4233_v54 = vpop.eup %4232  ;;  %v1898_v3 = vmul.f32 %v4296_v56, %v4231_v35  ;;  %v1899_v21 = vmul.f32 %v4297_v52, %v4231_v35  ;;  %v5851_v1 = vrot.slane %v3920_v58, %v7200_v2  ;;  %v5856_v28 = vsub.s32 %v7199_v44, %v7197_v45 }
 0x290   : > { %v1642_v51 = vmul.f32 %v4233_v54, %v7195_v15  ;;  %v1643_v27 = vmul.f32 %v4233_v54, %v7196_v0  ;;  %v5862_v31 = vrot.slane %v3920_v58, %v7201_v17  ;;  %v2186_v52 = vadd.s32 4294967232, %v7199_v44 }
 0x291   : > { %v1971_v62 = vmul.f32 %v1898_v3, %v1610_v9  ;;  %v1972_v24 = vmul.f32 %v1899_v21, %v1611_v4  ;;  %v4235_v38 = vpop.eup %4234  ;;  %v5902_v15 = vsub.s32 %v2172_v8, %v7197_v45 }
 0x292   : > { %2774 = vadd.xlane.f32.xlu1 %v2773_v39  ;;  %2729 = vadd.xlane.f32.xlu0 %v2728_v30  ;;  %v2779_v39 = vadd.f32 %v2687_v41, %v2686_v33  ;;  %v2734_v30 = vadd.f32 %v2657_v60, %v2656_v13  ;;  %v2658_v63 = vmul.f32 %v1898_v3, %v1642_v51  ;;  %v2144_v33 = vadd.s32 4294967280, %v7199_v44 }
 0x293   : > { %v2050_v57 = vadd.f32 %v1972_v24, %v1971_v62  ;;  %v2659_v19 = vmul.f32 %v1899_v21, %v1643_v27  ;;  %v1930_v16 = vmul.f32 %v4298_v14, %v4235_v38  ;;  %v2151_v41 = vadd.s32 4294967272, %v7199_v44 }
 0x294   : > { %v2165_v13 = vadd.s32 4294967256, %v7199_v44  ;;  %v5875_v60 = vrot.slane %v3954_v25, %v7201_v17  ;;  %v5888_v21 = vsub.s32 %v2144_v33, %v7197_v45 }
 0x295   : > { %v2737_v43 = vadd.f32 %v2659_v19, %v2658_v63  ;;  %v2003_v7 = vmul.f32 %v1930_v16, %v1610_v9  ;;  %v2690_v36 = vmul.f32 %v1930_v16, %v1642_v51  ;;  %v5915_v19 = vsub.s32 %v2186_v52, %v7197_v45 }
 0x296   : > { %2090 = vadd.xlane.f32.xlu1 %v2089_v49  ;;  %2045 = vadd.xlane.f32.xlu0 %v2044_v32  ;;  %v2689_v49 = vmul.f32 %v1929_v55, %v1641_v6  ;;  %v4299_v32 = vld [vmem:[%s4852_s22 + $0x1f8] sm:$0xff]  ;;  %v5865_v6 = vrot.slane %v3954_v25, %v7200_v2  ;;  %v5897_v37 = vsub.s32 %v2165_v13, %v7197_v45 }
 0x297   : > { %v1931_v18 = vmul.f32 %v4299_v32, %v4235_v38  ;;  %v5910_v38 = vsub.s32 %v2179_v5, %v7197_v45 }
 0x298   : > { %v2782_v22 = vadd.f32 %v2689_v49, %v2688_v34 }
 0x299   : > { %v2004_v61 = vmul.f32 %v1931_v18, %v1611_v4  ;;  %v2691_v47 = vmul.f32 %v1931_v18, %v1643_v27  ;;  %v5923_v18 = vadd.s32 4294967224, %v7199_v44 }
 0x29a   : > { %2777 = vadd.xlane.f32.xlu1 %v2776_v29  ;;  %2732 = vadd.xlane.f32.xlu0 %v2731_v50  ;;  %v2137_v29 = vadd.s32 4294967288, %v7199_v44 }
 0x29b   : > { %v2098_v48 = vadd.f32 %v2004_v61, %v2003_v7  ;;  %v2785_v20 = vadd.f32 %v2691_v47, %v2690_v36 }
 0x29c   : > { %v5859_v11 = vsub.s32 %v2137_v29, %v7197_v45 }
 0x29e   : > { %2093 = vadd.xlane.f32.xlu1 %v2092_v46  ;;  %2048 = vadd.xlane.f32.xlu0 %v2047_v10  ;;  %v2158_v10 = vadd.s32 4294967264, %v7199_v44 }
 0x2a0   : > { %v5894_v12 = vsub.s32 %v2158_v10, %v7197_v45 }
 0x2a2   : > { %2780 = vadd.xlane.f32.xlu1 %v2779_v39  ;;  %2735 = vadd.xlane.f32.xlu0 %v2734_v30  ;;  %v5891_v39 = vsub.s32 %v2151_v41, %v7197_v45 }
 0x2a6   : > { %2096 = vadd.xlane.f32.xlu1 %v2095_v59  ;;  %2051 = vadd.xlane.f32.xlu0 %v2050_v57 }
 0x2aa   : > { %2783 = vadd.xlane.f32.xlu1 %v2782_v22  ;;  %2738 = vadd.xlane.f32.xlu0 %v2737_v43 }
 0x2ae   : > { %2099 = vadd.xlane.f32.xlu1 %v2098_v48 }
 0x2b2   : > { %2786 = vadd.xlane.f32.xlu1 %v2785_v20 }
 0x2b7   : > { %v2007_v23 = vpop.xlane.xlu0 %2006 }
 0x2b8   : > { %v2339_v35 = vsub.f32 %v2007_v23, %v5851_v1  ;;  %v2136_v40 = vrot.slane %v2007_v23, %v5856_v28 }
 0x2ba   : > { %v2435_v55 = vmul.f32 0.5, %v2339_v35  ;;  %v2371_v62 = vand.u32 2147483647, %v2339_v35 }
 0x2bb   : > { %v2055_v50 = vpop.xlane.xlu0 %2054 }
 0x2bc   : > { %v5879_v4 = vsub.f32 %v2055_v50, %v5862_v31  ;;  %v2245_v30 = vrot.slane %v2055_v50, %v5856_v28  ;;  %v2467_v59 = vmul.f32 %v2435_v55, %v2339_v35  ;;  %vm5925_vm5 = vcmp.lt.f32.partialorder %v2371_v62, 0.1 }
 0x2bd   : > { %v3921_v26 = vadd.f32 -0.05, %v2371_v62 }
 0x2be   : > { %v2451_v51 = vmul.f32 0.5, %v5879_v4  ;;  %v2387_v43 = vand.u32 2147483647, %v5879_v4  ;;  %v2500_v23 = vmul.f32 10.0, %v2467_v59 }
 0x2bf   : > { %v2010_v54 = vpop.xlane.xlu1 %2009  ;;  %v2694_v46 = vpop.xlane.xlu0 %2693 }
 0x2c0   : > { %v2141_v9 = vrot.slane %v2010_v54, %v5859_v11  ;;  %v5883_v42 = vsub.f32 %v2694_v46, %v5865_v6  ;;  %v2340_v34 = vsub.f32 %v2010_v54, %v5851_v1  ;;  %v2823_v14 = vrot.slane %v2694_v46, %v5856_v28 }
 0x2c1   : > { %v2483_v48 = vmul.f32 %v2451_v51, %v5879_v4  ;;  %vm5945_vm6 = vcmp.lt.f32.partialorder %v2387_v43, 0.1 }
 0x2c2   : > { %v2143_v53 = vsel %vm2142_vm3, %v2141_v9, %v2136_v40  ;;  %v3092_v0 = vmul.f32 0.5, %v5883_v42  ;;  %v2436_v58 = vmul.f32 0.5, %v2340_v34  ;;  %v3028_v50 = vand.u32 2147483647, %v5883_v42 }
 0x2c3   : > { %v2058_v56 = vpop.xlane.xlu1 %2057  ;;  %v2742_v3 = vpop.xlane.xlu0 %2741  ;;  %v2372_v33 = vand.u32 2147483647, %v2340_v34  ;;  %v2516_v9 = vmul.f32 10.0, %v2483_v48 }
 0x2c4   : > { %v2249_v24 = vrot.slane %v2058_v56, %v5859_v11  ;;  %v5907_v27 = vsub.f32 %v2742_v3, %v5875_v60  ;;  %v5919_v16 = vsub.f32 %v2058_v56, %v5862_v31  ;;  %v3124_v36 = vmul.f32 %v3092_v0, %v5883_v42 }
 0x2c5   : > { %v2902_v35 = vrot.slane %v2742_v3, %v5856_v28  ;;  %v2468_v4 = vmul.f32 %v2436_v58, %v2340_v34  ;;  %v3937_v3 = vadd.f32 -0.05, %v2387_v43  ;;  %v3955_v52 = vadd.f32 -0.05, %v3028_v50 }
 0x2c6   : > { %v2250_v57 = vsel %vm2142_vm3, %v2249_v24, %v2245_v30  ;;  %v3108_v7 = vmul.f32 0.5, %v5907_v27  ;;  %v2452_v17 = vmul.f32 0.5, %v5919_v16  ;;  %v3156_v10 = vmul.f32 10.0, %v3124_v36 }
 0x2c7   : > { %v2697_v49 = vpop.xlane.xlu1 %2696  ;;  %v2013_v63 = vpop.xlane.xlu0 %2012  ;;  %v3044_v42 = vand.u32 2147483647, %v5907_v27  ;;  %v2564_v30 = vsel %vm5925_vm5, %v2500_v23, %v3921_v26  ;;  %v3922_v24 = vadd.f32 -0.05, %v2372_v33  ;;  %vm5961_vm8 = vcmp.lt.f32.partialorder %v3028_v50, 0.1 }
 0x2c8   : > { %v2827_v32 = vrot.slane %v2697_v49, %v5859_v11  ;;  %v2148_v61 = vrot.slane %v2013_v63, %v5888_v21  ;;  %v5936_v20 = vsub.f32 %v2697_v49, %v5865_v6  ;;  %v3140_v41 = vmul.f32 %v3108_v7, %v5907_v27 }
 0x2c9   : > { %v2484_v62 = vmul.f32 %v2452_v17, %v5919_v16  ;;  %vm5968_vm9 = vcmp.lt.f32.partialorder %v2372_v33, 0.1  ;;  %v3220_v49 = vsel %vm5961_vm8, %v3156_v10, %v3955_v52  ;;  %v3971_v22 = vadd.f32 -0.05, %v3044_v42 }
 0x2ca   : > { %v2828_v47 = vsel %vm2142_vm3, %v2827_v32, %v2823_v14  ;;  %v5939_v29 = vsel %vm2149_vm4, %v2148_v61, %v2143_v53  ;;  %v3093_v13 = vmul.f32 0.5, %v5936_v20  ;;  %v2388_v53 = vand.u32 2147483647, %v5919_v16 }
 0x2cb   : > { %v2745_v2 = vpop.xlane.xlu1 %2744  ;;  %v2061_v25 = vpop.xlane.xlu0 %2060  ;;  %v3172_v0 = vmul.f32 10.0, %v3140_v41  ;;  %v2501_v16 = vmul.f32 10.0, %v2468_v4  ;;  %v2580_v43 = vsel %vm5945_vm6, %v2516_v9, %v3937_v3  ;;  %v5981_v48 = vmul.f32 10.0, %v2484_v62 }
 0x2cc   : > { %v2906_v54 = vrot.slane %v2745_v2, %v5859_v11  ;;  %v2254_v40 = vrot.slane %v2061_v25, %v5888_v21  ;;  %v5966_v27 = vsub.f32 %v2745_v2, %v5875_v60  ;;  %v3125_v34 = vmul.f32 %v3093_v13, %v5936_v20 }
 0x2cd   : > { %v5977_v32 = vadd.f32 -0.05, %v2388_v53  ;;  %vm3076_vm10 = vcmp.lt.f32.partialorder %v3044_v42, 0.1  ;;  %v3252_v36 = vadd.f32 %v3220_v49, %v2564_v30  ;;  %v3029_v23 = vand.u32 2147483647, %v5936_v20 }
 0x2ce   : > { %v2907_v8 = vsel %vm2142_vm3, %v2906_v54, %v2902_v35  ;;  %v5956_v5 = vsel %vm2149_vm4, %v2254_v40, %v2250_v57  ;;  %v2341_v57 = vsub.f32 %v2013_v63, %v5851_v1  ;;  %v3109_v26 = vmul.f32 0.5, %v5966_v27  ;;  %v7210_v54 = vld [vmem:[#allocation67_spill] sm:$0xff] }
 0x2cf   : > { %v2700_v55 = vpop.xlane.xlu1 %2699  ;;  %v2748_v56 = vpop.xlane.xlu0 %2747  ;;  %v3236_v2 = vsel %vm3076_vm10, %v3172_v0, %v3971_v22  ;;  %v3157_v50 = vmul.f32 10.0, %v3125_v34  ;;  %v2357_v35 = vsub.f32 %v2061_v25, %v5862_v31  ;;  %v3364_v46 = vmul.f32 %v7210_v54, %v3252_v36 }
 0x2d0   : > { %v2832_v14 = vrot.slane %v2700_v55, %v5888_v21  ;;  %v2911_v58 = vrot.slane %v2748_v56, %v5888_v21  ;;  %v2437_v17 = vmul.f32 0.5, %v2341_v57  ;;  %v5990_v33 = vsub.f32 %v2700_v55, %v5865_v6 }
 0x2d1   : > { %v3268_v20 = vadd.f32 %v3236_v2, %v2580_v43  ;;  %v2373_v10 = vand.u32 2147483647, %v2341_v57  ;;  %v3045_v13 = vand.u32 2147483647, %v5966_v27  ;;  %3429 = vperm.xlu0 %4058, %v3364_v46   ;;  %vm6005_vm12 = vcmp.lt.f32.partialorder %v2388_v53, 0.1 }
 0x2d2   : > { %v2833_v63 = vsel %vm2149_vm4, %v2832_v14, %v2828_v47  ;;  %v5993_v41 = vsel %vm2149_vm4, %v2911_v58, %v2907_v8  ;;  %v5996_v47 = vsub.f32 %v2748_v56, %v5875_v60  ;;  %vm6009_vm13 = vcmp.lt.f32.partialorder %v3029_v23, 0.1 }
 0x2d3   : > { %v2016_v7 = vpop.xlane.xlu1 %2015  ;;  %v2703_v61 = vpop.xlane.xlu0 %2702  ;;  %v3956_v55 = vadd.f32 -0.05, %v3029_v23  ;;  %v3141_v56 = vmul.f32 %v3109_v26, %v5966_v27  ;;  %v3380_v3 = vmul.f32 %v7210_v54, %v3268_v20  ;;  %v2469_v52 = vmul.f32 %v2437_v17, %v2341_v57  ;;  %v7217_v26 = vld [vmem:[#allocation64_spill] sm:$0xff] }
 0x2d4   : > { %v2155_v25 = vrot.slane %v2016_v7, %v5891_v39  ;;  %v2837_v4 = vrot.slane %v2703_v61, %v5891_v39  ;;  %v2453_v62 = vmul.f32 0.5, %v2357_v35  ;;  %v3094_v53 = vmul.f32 0.5, %v5990_v33 }
 0x2d5   : > { %v3110_v0 = vmul.f32 0.5, %v5996_v47  ;;  %3477 = vperm.xlu1 %4059, %v3380_v3   ;;  %v2565_v34 = vsel %vm5968_vm9, %v2501_v16, %v3922_v24  ;;  %v3221_v27 = vsel %vm6009_vm13, %v3157_v50, %v3956_v55  ;;  %v6028_v14 = vadd.f32 -0.05, %v2373_v10 }
 0x2d6   : > { %v2157_v30 = vsel %vm2156_vm7, %v2155_v25, %v5939_v29  ;;  %v6018_v51 = vsel %vm2156_vm7, %v2837_v4, %v2833_v63  ;;  %vm6030_vm14 = vcmp.lt.f32.partialorder %v3045_v13, 0.1  ;;  %v2342_v22 = vsub.f32 %v2016_v7, %v5851_v1 }
 0x2d7   : > { %v5998_v40 = vpop.xlane.xlu1 %2063  ;;  %v6000_v9 = vpop.xlane.xlu0 %2018  ;;  %v3253_v43 = vadd.f32 %v3221_v27, %v2565_v34  ;;  %v3173_v36 = vmul.f32 10.0, %v3141_v56  ;;  %v2389_v63 = vand.u32 2147483647, %v2357_v35  ;;  %v2999_v59 = vsub.f32 %v2703_v61, %v5865_v6 }
 0x2d8   : > { %v2259_v24 = vrot.slane %v5998_v40, %v5891_v39  ;;  %v2485_v16 = vmul.f32 %v2453_v62, %v2357_v35  ;;  %v3030_v23 = vand.u32 2147483647, %v5990_v33  ;;  %v2162_v2 = vrot.slane %v6000_v9, %v5894_v12 }
 0x2d9   : > { %v3365_v58 = vmul.f32 %v7217_v26, %v3253_v43  ;;  %vm6042_vm15 = vcmp.lt.f32.partialorder %v2373_v10, 0.1  ;;  %v3972_v7 = vadd.f32 -0.05, %v3045_v13  ;;  %v3126_v17 = vmul.f32 %v3094_v53, %v5990_v33 }
 0x2da   : > { %v3142_v61 = vmul.f32 %v3110_v0, %v5996_v47  ;;  %v2260_v54 = vsel %vm2156_vm7, %v2259_v24, %v5956_v5  ;;  %v2502_v46 = vmul.f32 10.0, %v2469_v52  ;;  %v3046_v20 = vand.u32 2147483647, %v5996_v47 }
 0x2db   : > { %v2751_v49 = vpop.xlane.xlu1 %2750  ;;  %v6026_v57 = vpop.xlane.xlu0 %2066  ;;  %v2438_v25 = vmul.f32 0.5, %v2342_v22  ;;  %3432 = vperm.xlu1 %4059, %v3365_v58   ;;  %v6054_v10 = vsel %vm2163_vm11, %v2162_v2, %v2157_v30  ;;  %vm6058_vm0 = vcmp.lt.f32.partialorder %v2389_v63, 0.1  ;;  %v3939_v33 = vadd.f32 -0.05, %v2389_v63 }
 0x2dc   : > { %v3095_v8 = vmul.f32 0.5, %v2999_v59  ;;  %v3237_v5 = vsel %vm6030_vm14, %v3173_v36, %v3972_v7  ;;  %v2518_v55 = vmul.f32 10.0, %v2485_v16  ;;  %vm6064_vm1 = vcmp.lt.f32.partialorder %v3030_v23, 0.1 }
 0x2dd   : > { %v2374_v47 = vand.u32 2147483647, %v2342_v22  ;;  %v2581_v3 = vsel %vm6005_vm12, %v5981_v48, %v5977_v32  ;;  %v3158_v52 = vmul.f32 10.0, %v3126_v17  ;;  %v3174_v62 = vmul.f32 10.0, %v3142_v61 }
 0x2de   : > { %v3269_v30 = vadd.f32 %v3237_v5, %v2581_v3  ;;  %v2916_v53 = vrot.slane %v2751_v49, %v5891_v39  ;;  %v3957_v34 = vadd.f32 -0.05, %v3030_v23  ;;  %v3973_v27 = vadd.f32 -0.05, %v3046_v20 }
 0x2df   : > { %v6050_v35 = vpop.xlane.xlu1 %2705  ;;  %v6056_v4 = vpop.xlane.xlu0 %2753  ;;  %v2470_v29 = vmul.f32 %v2438_v25, %v2342_v22  ;;  %v2264_v43 = vrot.slane %v6026_v57, %v5894_v12  ;;  %v3031_v36 = vand.u32 2147483647, %v2999_v59  ;;  %v3127_v63 = vmul.f32 %v3095_v8, %v2999_v59 }
 0x2e0   : > { %v3381_v24 = vmul.f32 %v7217_v26, %v3269_v30  ;;  %v2917_v32 = vsel %vm2156_vm7, %v2916_v53, %v5993_v41  ;;  %vm6080_vm2 = vcmp.lt.f32.partialorder %v3046_v20, 0.1  ;;  %vm6084_vm5 = vcmp.lt.f32.partialorder %v2374_v47, 0.1 }
 0x2e1   : > { %v2358_v22 = vsub.f32 %v5998_v40, %v5862_v31  ;;  %v6091_v16 = vsel %vm2163_vm11, %v2264_v43, %v2260_v54  ;;  %vm2170_vm6 = vcmask 392512   ;;  %v3924_v23 = vadd.f32 -0.05, %v2374_v47 }
 0x2e2   : > { %v6095_v41 = vsub.f32 %v6000_v9, %v5851_v1  ;;  %3480 = vperm.xlu0 %4058, %v3381_v24   ;;  %v3222_v26 = vsel %vm6064_vm1, %v3158_v52, %v3957_v34  ;;  %v3238_v58 = vsel %vm6080_vm2, %v3174_v62, %v3973_v27  ;;  %v2503_v40 = vmul.f32 10.0, %v2470_v29 }
 0x2e3   : > { %v6073_v0 = vpop.xlane.xlu1 %2021  ;;  %v2709_v59 = vpop.xlane.xlu0 %2708  ;;  %v3015_v7 = vsub.f32 %v2751_v49, %v5875_v60  ;;  %v2566_v17 = vsel %vm6042_vm15, %v2502_v46, %v6028_v14  ;;  %v2582_v9 = vsel %vm6058_vm0, %v2518_v55, %v3939_v33  ;;  %vm6109_vm8 = vcmp.lt.f32.partialorder %v3031_v36, 0.1  ;;  %v7230_v46 = vld [vmem:[#allocation66_spill] sm:$0xff] }
 0x2e4   : > { %v3159_v54 = vmul.f32 10.0, %v3127_v63  ;;  %v3254_v20 = vadd.f32 %v3222_v26, %v2566_v17  ;;  %v3270_v25 = vadd.f32 %v3238_v58, %v2582_v9  ;;  %v3958_v8 = vadd.f32 -0.05, %v3031_v36 }
 0x2e5   : > { %v2390_v5 = vand.u32 2147483647, %v2358_v22  ;;  %v2842_v56 = vrot.slane %v6050_v35, %v5894_v12  ;;  %v2921_v49 = vrot.slane %v6056_v4, %v5894_v12  ;;  %v2454_v50 = vmul.f32 0.5, %v2358_v22 }
 0x2e6   : > { %v2439_v14 = vmul.f32 0.5, %v6095_v41  ;;  %v3366_v13 = vmul.f32 %v7230_v46, %v3254_v20  ;;  %v3382_v33 = vmul.f32 %v7230_v46, %v3270_v25  ;;  %v3111_v55 = vmul.f32 0.5, %v3015_v7 }
 0x2e7   : > { %v6101_v2 = vpop.xlane.xlu1 %2069  ;;  %v2359_v47 = vsub.f32 %v6026_v57, %v5862_v31  ;;  %v2843_v3 = vsel %vm2163_vm11, %v2842_v56, %v6018_v51  ;;  %v6125_v52 = vsel %vm2163_vm11, %v2921_v49, %v2917_v32  ;;  %v6127_v62 = vpop.xlane.xlu0 %2024  ;;  %v6131_v30 = vsub.f32 %v6050_v35, %v5865_v6 }
 0x2e8   : > { %3435 = vperm.xlu1 %4059, %v3366_v13   ;;  %3483 = vperm.xlu0 %4058, %v3382_v33   ;;  %v2567_v53 = vsel %vm6084_vm5, %v2503_v40, %v3924_v23  ;;  %v3223_v57 = vsel %vm6109_vm8, %v3159_v54, %v3958_v8  ;;  %vm2177_vm9 = vcmask 458112   ;;  %v2375_v51 = vand.u32 2147483647, %v6095_v41 }
 0x2e9   : > { %v3255_v27 = vadd.f32 %v3223_v57, %v2567_v53  ;;  %v6142_v29 = vsub.s32 %v5923_v18, %v7197_v45  ;;  %v6145_v43 = vadd.s32 4294967216, %v7199_v44  ;;  %vm6147_vm10 = vcmp.lt.f32.partialorder %v2390_v5, 0.1  ;;  %v7233_v18 = vld [vmem:[#allocation68_spill] sm:$0xff] }
 0x2ea   : > { %v2486_v36 = vmul.f32 %v2454_v50, %v2358_v22  ;;  %v2471_v63 = vmul.f32 %v2439_v14, %v6095_v41  ;;  %v3016_v24 = vsub.f32 %v6056_v4, %v5875_v60  ;;  %v2169_v32 = vrot.slane %v6073_v0, %v5897_v37 }
 0x2eb   : > { %v6137_v34 = vpop.xlane.xlu1 %2756  ;;  %v3047_v48 = vand.u32 2147483647, %v3015_v7  ;;  %v3143_v42 = vmul.f32 %v3111_v55, %v3015_v7  ;;  %v3367_v23 = vmul.f32 %v7233_v18, %v3255_v27  ;;  %v2847_v26 = vrot.slane %v2709_v59, %v5897_v37  ;;  %v6168_v61 = vpop.xlane.xlu0 %2072 }
 0x2ec   : > { %v2455_v58 = vmul.f32 0.5, %v2359_v47  ;;  %v3096_v40 = vmul.f32 0.5, %v6131_v30  ;;  %v2171_v22 = vsel %vm2170_vm6, %v2169_v32, %v6054_v10  ;;  %v2269_v41 = vrot.slane %v6101_v2, %v5897_v37 }
 0x2ed   : > { %v3940_v17 = vadd.f32 -0.05, %v2390_v5  ;;  %v2391_v4 = vand.u32 2147483647, %v2359_v47  ;;  %3438 = vperm.xlu1 %4059, %v3367_v23   ;;  %v2344_v9 = vsub.f32 %v6073_v0, %v5851_v1  ;;  %v6166_v7 = vsel %vm2170_vm6, %v2847_v26, %v2843_v3 }
 0x2ee   : > { %v3112_v54 = vmul.f32 0.5, %v3016_v24  ;;  %v6171_v20 = vsub.f32 %v2709_v59, %v5865_v6  ;;  %v2270_v10 = vsel %vm2170_vm6, %v2269_v41, %v6091_v16  ;;  %v2176_v25 = vrot.slane %v6127_v62, %v5902_v15 }
 0x2ef   : > { %v6177_v8 = vpop.xlane.xlu1 %2711  ;;  %v2519_v5 = vmul.f32 10.0, %v2486_v36  ;;  %vm6179_vm12 = vcmp.lt.f32.partialorder %v2375_v51, 0.1  ;;  %v2504_v56 = vmul.f32 10.0, %v2471_v63  ;;  %v3925_v49 = vadd.f32 -0.05, %v2375_v51 }
 0x2f0   : > { %v3175_v50 = vmul.f32 10.0, %v3143_v42  ;;  %vm6183_vm13 = vcmp.lt.f32.partialorder %v3047_v48, 0.1  ;;  %v3974_v59 = vadd.f32 -0.05, %v3047_v48  ;;  %v2487_v46 = vmul.f32 %v2455_v58, %v2359_v47  ;;  %v2760_v48 = vpop.xlane.xlu0 %2759 }
 0x2f1   : > { %v3128_v16 = vmul.f32 %v3096_v40, %v6131_v30  ;;  %v3941_v13 = vadd.f32 -0.05, %v2391_v4  ;;  %v3032_v33 = vand.u32 2147483647, %v6131_v30  ;;  %v2440_v55 = vmul.f32 0.5, %v2344_v9 }
 0x2f2   : > { %v6190_v3 = vsel %vm2177_vm9, %v2176_v25, %v2171_v22  ;;  %vm6192_vm14 = vcmp.lt.f32.partialorder %v2391_v4, 0.1  ;;  %v3048_v57 = vand.u32 2147483647, %v3016_v24  ;;  %v3144_v51 = vmul.f32 %v3112_v54, %v3016_v24 }
 0x2f3   : > { %v2376_v27 = vand.u32 2147483647, %v2344_v9  ;;  %v3097_v36 = vmul.f32 0.5, %v6171_v20  ;;  %v2583_v47 = vsel %vm6147_vm10, %v2519_v5, %v3940_v17  ;;  %v3239_v63 = vsel %vm6183_vm13, %v3175_v50, %v3974_v59  ;;  %v6207_v58 = vpop.xlane.xlu1 %2027 }
 0x2f4   : > { %v2926_v30 = vrot.slane %v6137_v34, %v5897_v37  ;;  %v2274_v32 = vrot.slane %v6168_v61, %v5902_v15  ;;  %v2520_v42 = vmul.f32 10.0, %v2487_v46  ;;  %v3160_v23 = vmul.f32 10.0, %v3128_v16 }
 0x2f5   : > { %v2360_v24 = vsub.f32 %v6101_v2, %v5862_v31  ;;  %v3271_v26 = vadd.f32 %v3239_v63, %v2583_v47  ;;  %vm6209_vm15 = vcmp.lt.f32.partialorder %v3032_v33, 0.1  ;;  %v2472_v40 = vmul.f32 %v2440_v55, %v2344_v9  ;;  %v2715_v55 = vpop.xlane.xlu0 %2714 }
 0x2f6   : > { %v2927_v22 = vsel %vm2170_vm6, %v2926_v30, %v6125_v52  ;;  %v6216_v41 = vsel %vm2177_vm9, %v2274_v32, %v2270_v10  ;;  %v3959_v17 = vadd.f32 -0.05, %v3032_v33  ;;  %vm6218_vm0 = vcmp.lt.f32.partialorder %v3048_v57, 0.1 }
 0x2f7   : > { %v3176_v2 = vmul.f32 10.0, %v3144_v51  ;;  %v3383_v54 = vmul.f32 %v7233_v18, %v3271_v26  ;;  %vm7070_vm1 = vcmask 523712   ;;  %v3975_v25 = vadd.f32 -0.05, %v3048_v57 }
 0x2f8   : > { %vm6223_vm2 = vcmp.lt.f32.partialorder %v2376_v27, 0.1  ;;  %v3033_v9 = vand.u32 2147483647, %v6171_v20  ;;  %v3129_v52 = vmul.f32 %v3097_v36, %v6171_v20  ;;  %v3926_v10 = vadd.f32 -0.05, %v2376_v27 }
 0x2f9   : > { %v2392_v50 = vand.u32 2147483647, %v2360_v24  ;;  %3486 = vperm.xlu0 %4058, %v3383_v54   ;;  %v2568_v14 = vsel %vm6179_vm12, %v2504_v56, %v3925_v49  ;;  %v3224_v59 = vsel %vm6209_vm15, %v3160_v23, %v3959_v17  ;;  %v2505_v18 = vmul.f32 10.0, %v2472_v40  ;;  %v6244_v49 = vpop.xlane.xlu1 %2075  ;;  %v7246_v36 = vld [vmem:[#allocation69_spill] sm:$0xff]  ;;  %v6268_v17 = vpop.xlane.xlu0 %2030 }
 0x2fa   : > { %v2456_v46 = vmul.f32 0.5, %v2360_v24  ;;  %v6235_v16 = vsub.f32 %v6137_v34, %v5875_v60  ;;  %v3256_v33 = vadd.f32 %v3224_v59, %v2568_v14  ;;  %v2345_v20 = vsub.f32 %v6127_v62, %v5851_v1  ;;  %v7249_v59 = vld [vmem:[#allocation70_spill] sm:$0xff] }
 0x2fb   : > { %v3240_v57 = vsel %vm6218_vm0, %v3176_v2, %v3975_v25  ;;  %v2852_v0 = vrot.slane %v6177_v8, %v5902_v15  ;;  %v2931_v56 = vrot.slane %v2760_v48, %v5902_v15  ;;  %v3161_v51 = vmul.f32 10.0, %v3129_v52 }
 0x2fc   : > { %v3960_v27 = vadd.f32 -0.05, %v3033_v9  ;;  %v3368_v34 = vmul.f32 %v7246_v36, %v3256_v33  ;;  %v2584_v47 = vsel %vm6192_vm14, %v2520_v42, %v3941_v13  ;;  %vm7069_vm5 = vcmask 589312  }
 0x2fd   : > { %v2361_v62 = vsub.f32 %v6168_v61, %v5862_v31  ;;  %v3272_v63 = vadd.f32 %v3240_v57, %v2584_v47  ;;  %v2853_v30 = vsel %vm2177_vm9, %v2852_v0, %v6166_v7  ;;  %v3002_v32 = vsub.f32 %v6177_v8, %v5865_v6  ;;  %v6271_v25 = vpop.xlane.xlu1 %2762 }
 0x2fe   : > { %v2488_v23 = vmul.f32 %v2456_v46, %v2360_v24  ;;  %v3113_v26 = vmul.f32 0.5, %v6235_v16  ;;  %3441 = vperm.xlu1 %4059, %v3368_v34   ;;  %v6257_v35 = vsel %vm2177_vm9, %v2931_v56, %v2927_v22  ;;  %v2569_v13 = vsel %vm6223_vm2, %v2505_v18, %v3926_v10 }
 0x2ff   : > { %vm3065_vm8 = vcmp.lt.f32.partialorder %v3033_v9, 0.1  ;;  %v2377_v53 = vand.u32 2147483647, %v2345_v20  ;;  %v3384_v61 = vmul.f32 %v7246_v36, %v3272_v63  ;;  %v6263_v42 = vadd.s32 4294967208, %v7199_v44  ;;  %v2718_v63 = vpop.xlane.xlu0 %2717 }
 0x300   : > { %v2441_v7 = vmul.f32 0.5, %v2345_v20  ;;  %v3018_v8 = vsub.f32 %v2760_v48, %v5875_v60  ;;  %v3225_v24 = vsel %vm3065_vm8, %v3161_v51, %v3960_v27  ;;  %v2183_v40 = vrot.slane %v6207_v58, %v5910_v38 }
 0x301   : > { %v2457_v22 = vmul.f32 0.5, %v2361_v62  ;;  %3489 = vperm.xlu0 %4058, %v3384_v61   ;;  %v3098_v4 = vmul.f32 0.5, %v3002_v32  ;;  %v3257_v2 = vadd.f32 %v3225_v24, %v2569_v13  ;;  %v2857_v54 = vrot.slane %v2715_v55, %v5910_v38 }
 0x302   : > { %vm6273_vm10 = vcmp.lt.f32.partialorder %v2392_v50, 0.1  ;;  %v2521_v9 = vmul.f32 10.0, %v2488_v23  ;;  %v3942_v48 = vadd.f32 -0.05, %v2392_v50  ;;  %v3145_v52 = vmul.f32 %v3113_v26, %v6235_v16 }
 0x303   : > { %v2185_v10 = vsel %vm7070_vm1, %v2183_v40, %v6190_v3  ;;  %v3049_v14 = vand.u32 2147483647, %v6235_v16  ;;  %v3369_v18 = vmul.f32 %v7249_v59, %v3257_v2  ;;  %v2346_v46 = vsub.f32 %v6207_v58, %v5851_v1 }
 0x304   : > { %v2858_v33 = vsel %vm7070_vm1, %v2857_v54, %v2853_v30  ;;  %v2473_v57 = vmul.f32 %v2441_v7, %v2345_v20  ;;  %v2393_v0 = vand.u32 2147483647, %v2361_v62  ;;  %v3114_v56 = vmul.f32 0.5, %v3018_v8 }
 0x305   : > { %v2279_v50 = vrot.slane %v6244_v49, %v5910_v38  ;;  %vm6287_vm12 = vcmp.lt.f32.partialorder %v2377_v53, 0.1  ;;  %v2489_v3 = vmul.f32 %v2457_v22, %v2361_v62  ;;  %v3130_v27 = vmul.f32 %v3098_v4, %v3002_v32  ;;  %3444 = vperm.xlu1 %4059, %v3369_v18  }
 0x306   : > { %v3003_v16 = vsub.f32 %v2715_v55, %v5865_v6  ;;  %v2190_v58 = vrot.slane %v6268_v17, %v5915_v19  ;;  %v3927_v36 = vadd.f32 -0.05, %v2377_v53  ;;  %v3177_v34 = vmul.f32 10.0, %v3145_v52  ;;  %v2079_v55 = vpop.xlane.xlu1 %2078 }
 0x307   : > { %v3034_v20 = vand.u32 2147483647, %v3002_v32  ;;  %v6296_v47 = vsel %vm7070_vm1, %v2279_v50, %v6216_v41  ;;  %vm6298_vm13 = vcmp.lt.f32.partialorder %v3049_v14, 0.1  ;;  %v3050_v62 = vand.u32 2147483647, %v3018_v8  ;;  %v2034_v50 = vpop.xlane.xlu0 %2033 }
 0x308   : > { %v2442_v23 = vmul.f32 0.5, %v2346_v46  ;;  %v6303_v26 = vsel %vm7069_vm5, %v2190_v58, %v2185_v10  ;;  %v2506_v13 = vmul.f32 10.0, %v2473_v57  ;;  %v3976_v61 = vadd.f32 -0.05, %v3049_v14 }
 0x309   : > { %vm6305_vm14 = vcmp.lt.f32.partialorder %v2393_v0, 0.1  ;;  %v3146_v32 = vmul.f32 %v3114_v56, %v3018_v8  ;;  %v2522_v41 = vmul.f32 10.0, %v2489_v3  ;;  %v3943_v7 = vadd.f32 -0.05, %v2393_v0 }
 0x30a   : > { %v3162_v24 = vmul.f32 10.0, %v3130_v27  ;;  %v3099_v40 = vmul.f32 0.5, %v3003_v16  ;;  %vm6309_vm15 = vcmp.lt.f32.partialorder %v3034_v20, 0.1  ;;  %v3961_v4 = vadd.f32 -0.05, %v3034_v20 }
 0x30b   : > { %v3241_v2 = vsel %vm6298_vm13, %v3177_v34, %v3976_v61  ;;  %v2936_v54 = vrot.slane %v6271_v25, %v5910_v38  ;;  %vm7068_vm0 = vcmask 654912   ;;  %vm6317_vm2 = vcmp.lt.f32.partialorder %v3050_v62, 0.1  ;;  %v6332_v34 = vpop.xlane.xlu1 %2765  ;;  %v6359_v22 = vpop.xlane.xlu0 %2720 }
 0x30c   : > { %v2378_v8 = vand.u32 2147483647, %v2346_v46  ;;  %v2474_v10 = vmul.f32 %v2442_v23, %v2346_v46  ;;  %v2585_v14 = vsel %vm6273_vm10, %v2521_v9, %v3942_v48  ;;  %v3178_v18 = vmul.f32 10.0, %v3146_v32 }
 0x30d   : > { %v3273_v57 = vadd.f32 %v3241_v2, %v2585_v14  ;;  %v6325_v0 = vsel %vm7070_vm1, %v2936_v54, %v6257_v35  ;;  %v2862_v56 = vrot.slane %v2718_v63, %v5915_v19  ;;  %v3977_v3 = vadd.f32 -0.05, %v3050_v62 }
 0x30e   : > { %v3131_v27 = vmul.f32 %v3099_v40, %v3003_v16  ;;  %v2362_v58 = vsub.f32 %v6244_v49, %v5862_v31  ;;  %v3226_v46 = vsel %vm6309_vm15, %v3162_v24, %v3961_v4  ;;  %v3035_v5 = vand.u32 2147483647, %v3003_v16 }
 0x30f   : > { %v3385_v9 = vmul.f32 %v7249_v59, %v3273_v57  ;;  %v6336_v48 = vsel %vm7069_vm5, %v2862_v56, %v2858_v33  ;;  %v2570_v35 = vsel %vm6287_vm12, %v2506_v13, %v3927_v36  ;;  %vm6340_vm8 = vcmp.lt.f32.partialorder %v2378_v8, 0.1  ;;  %v7262_v13 = vld [vmem:[#allocation71_spill] sm:$0xff] }
 0x310   : > { %v2507_v30 = vmul.f32 10.0, %v2474_v10  ;;  %v2347_v49 = vsub.f32 %v6268_v17, %v5851_v1  ;;  %v3258_v62 = vadd.f32 %v3226_v46, %v2570_v35  ;;  %v3928_v23 = vadd.f32 -0.05, %v2378_v8 }
 0x311   : > { %3492 = vperm.xlu0 %4058, %v3385_v9   ;;  %v3019_v59 = vsub.f32 %v6271_v25, %v5875_v60  ;;  %v3004_v33 = vsub.f32 %v2718_v63, %v5865_v6  ;;  %v3242_v51 = vsel %vm6317_vm2, %v3178_v18, %v3977_v3  ;;  %v3163_v16 = vmul.f32 10.0, %v3131_v27 }
 0x312   : > { %v2458_v36 = vmul.f32 0.5, %v2362_v58  ;;  %v3370_v61 = vmul.f32 %v7262_v13, %v3258_v62  ;;  %v2586_v32 = vsel %vm6305_vm14, %v2522_v41, %v3943_v7  ;;  %vm6354_vm10 = vcmp.lt.f32.partialorder %v3035_v5, 0.1  ;;  %v6367_v41 = vpop.xlane.xlu1 %2081  ;;  %v6392_v62 = vpop.xlane.xlu0 %2036 }
 0x313   : > { %v3962_v24 = vadd.f32 -0.05, %v3035_v5  ;;  %v3274_v40 = vadd.f32 %v3242_v51, %v2586_v32  ;;  %v2284_v25 = vrot.slane %v2079_v55, %v5915_v19  ;;  %v2443_v63 = vmul.f32 0.5, %v2347_v49 }
 0x314   : > { %3447 = vperm.xlu1 %4059, %v3370_v61   ;;  %v6362_v4 = vsub.f32 %v2079_v55, %v5862_v31  ;;  %v2197_v2 = vrot.slane %v2034_v50, %v6142_v29  ;;  %v2571_v53 = vsel %vm6340_vm8, %v2507_v30, %v3928_v23  ;;  %v3115_v7 = vmul.f32 0.5, %v3019_v59 }
 0x315   : > { %v3100_v54 = vmul.f32 0.5, %v3004_v33  ;;  %v3386_v52 = vmul.f32 %v7262_v13, %v3274_v40  ;;  %v6372_v8 = vsel %vm7069_vm5, %v2284_v25, %v6296_v47  ;;  %v2394_v10 = vand.u32 2147483647, %v2362_v58 }
 0x316   : > { %v6376_v55 = vsel %vm7068_vm0, %v2197_v2, %v6303_v26  ;;  %v3227_v14 = vsel %vm6354_vm10, %v3163_v16, %v3962_v24  ;;  %v2214_v18 = vadd.s32 4294967200, %v7199_v44  ;;  %v2490_v57 = vmul.f32 %v2458_v36, %v2362_v58  ;;  %v7265_v58 = vld [vmem:[#allocation72_spill] sm:$0xff] }
 0x317   : > { %3495 = vperm.xlu0 %4058, %v3386_v52   ;;  %v2348_v56 = vsub.f32 %v2034_v50, %v5851_v1  ;;  %v3259_v3 = vadd.f32 %v3227_v14, %v2571_v53  ;;  %v6384_v27 = vsub.s32 %v6145_v43, %v7197_v45  ;;  %v2379_v47 = vand.u32 2147483647, %v2347_v49  ;;  %v2724_v14 = vpop.xlane.xlu0 %2723 }
 0x318   : > { %v2475_v46 = vmul.f32 %v2443_v63, %v2347_v49  ;;  %v2459_v5 = vmul.f32 0.5, %v6362_v4  ;;  %v6389_v26 = vsub.s32 %v6263_v42, %v7197_v45  ;;  %v3051_v9 = vand.u32 2147483647, %v3019_v59  ;;  %v6398_v49 = vpop.xlane.xlu1 %2768 }
 0x319   : > { %v3147_v35 = vmul.f32 %v3115_v7, %v3019_v59  ;;  %v3132_v20 = vmul.f32 %v3100_v54, %v3004_v33  ;;  %v3371_v30 = vmul.f32 %v7265_v58, %v3259_v3  ;;  %vm6394_vm12 = vcmp.lt.f32.partialorder %v2394_v10, 0.1 }
 0x31a   : > { %v3944_v43 = vadd.f32 -0.05, %v2394_v10  ;;  %v3036_v23 = vand.u32 2147483647, %v3004_v33  ;;  %v6401_v51 = vsub.s32 %v2214_v18, %v7197_v45  ;;  %v2523_v42 = vmul.f32 10.0, %v2490_v57 }
 0x31b   : > { %v2395_v16 = vand.u32 2147483647, %v6362_v4  ;;  %v2380_v59 = vand.u32 2147483647, %v2348_v56  ;;  %v2444_v36 = vmul.f32 0.5, %v2348_v56  ;;  %3450 = vperm.xlu1 %4059, %v3371_v30   ;;  %v2491_v32 = vmul.f32 %v2459_v5, %v6362_v4  ;;  %v2040_v2 = vpop.xlane.xlu0 %2039 }
 0x31c   : > { %7268 = vst [vmem:[#allocation14_spill] sm:$0xff] %v6401_v51  ;;  %vm6404_vm13 = vcmp.lt.f32.partialorder %v2379_v47, 0.1  ;;  %v3929_v61 = vadd.f32 -0.05, %v2379_v47  ;;  %v3020_v33 = vsub.f32 %v6332_v34, %v5875_v60  ;;  %v2508_v17 = vmul.f32 10.0, %v2475_v46  ;;  %v6435_v46 = vpop.xlane.xlu1 %2084 }
 0x31d   : > { %vm6411_vm14 = vcmp.lt.f32.partialorder %v3051_v9, 0.1  ;;  %v3179_v40 = vmul.f32 10.0, %v3147_v35  ;;  %v3164_v25 = vmul.f32 10.0, %v3132_v20  ;;  %v3978_v63 = vadd.f32 -0.05, %v3051_v9 }
 0x31e   : > { %vm6415_vm15 = vcmp.lt.f32.partialorder %v3036_v23, 0.1  ;;  %v3005_v53 = vsub.f32 %v6359_v22, %v5865_v6  ;;  %v6423_v4 = vsub.f32 %v6367_v41, %v5862_v31  ;;  %v3963_v7 = vadd.f32 -0.05, %v3036_v23 }
 0x31f   : > { %v6425_v54 = vadd.f32 -0.05, %v2395_v16  ;;  %v2476_v52 = vmul.f32 %v2444_v36, %v2348_v56  ;;  %v6427_v10 = vadd.f32 -0.05, %v2380_v59  ;;  %vm7062_vm2 = vcmask 720512  }
 0x320   : > { %v6429_v18 = vmul.f32 10.0, %v2491_v32  ;;  %v2941_v57 = vrot.slane %v6332_v34, %v5915_v19  ;;  %v3116_v3 = vmul.f32 0.5, %v3020_v33  ;;  %v2867_v47 = vrot.slane %v6359_v22, %v6142_v29 }
 0x321   : > { %v2289_v5 = vrot.slane %v6367_v41, %v6142_v29  ;;  %v2587_v56 = vsel %vm6394_vm12, %v2523_v42, %v3944_v43  ;;  %v3243_v9 = vsel %vm6411_vm14, %v3179_v40, %v3978_v63  ;;  %v3228_v35 = vsel %vm6415_vm15, %v3164_v25, %v3963_v7  ;;  %v6472_v7 = vpop.xlane.xlu1 %2771 }
 0x322   : > { %v3101_v20 = vmul.f32 0.5, %v3005_v53  ;;  %v2460_v34 = vmul.f32 0.5, %v6423_v4  ;;  %v3275_v30 = vadd.f32 %v3243_v9, %v2587_v56  ;;  %v2572_v22 = vsel %vm6404_vm13, %v2508_v17, %v3929_v61 }
 0x323   : > { %v2509_v23 = vmul.f32 10.0, %v2476_v52  ;;  %v3052_v36 = vand.u32 2147483647, %v3020_v33  ;;  %v2349_v41 = vsub.f32 %v6392_v62, %v5851_v1  ;;  %v3260_v50 = vadd.f32 %v3228_v35, %v2572_v22 }
 0x324   : > { %vm6450_vm8 = vcmp.lt.f32.partialorder %v2395_v16, 0.1  ;;  %v2942_v42 = vsel %vm7069_vm5, %v2941_v57, %v6325_v0  ;;  %v3148_v32 = vmul.f32 %v3116_v3, %v3020_v33  ;;  %v3037_v24 = vand.u32 2147483647, %v3005_v53  ;;  %v7279_v16 = vld [vmem:[#allocation73_spill] sm:$0xff] }
 0x325   : > { %v3387_v40 = vmul.f32 %v7265_v58, %v3275_v30  ;;  %vm6457_vm10 = vcmp.lt.f32.partialorder %v2380_v59, 0.1  ;;  %v2868_v61 = vsel %vm7068_vm0, %v2867_v47, %v6336_v48  ;;  %v2396_v17 = vand.u32 2147483647, %v6423_v4 }
 0x326   : > { %v3372_v25 = vmul.f32 %v7279_v16, %v3260_v50  ;;  %v3021_v63 = vsub.f32 %v6398_v49, %v5875_v60  ;;  %v3133_v0 = vmul.f32 %v3101_v20, %v3005_v53  ;;  %v2290_v33 = vsel %vm7068_vm0, %v2289_v5, %v6372_v8 }
 0x327   : > { %v2492_v58 = vmul.f32 %v2460_v34, %v6423_v4  ;;  %v2204_v59 = vrot.slane %v6392_v62, %v6384_v27  ;;  %3498 = vperm.xlu0 %4058, %v3387_v40   ;;  %vm6474_vm12 = vcmp.lt.f32.partialorder %v3052_v36, 0.1  ;;  %v2381_v52 = vand.u32 2147483647, %v2349_v41 }
 0x328   : > { %v2445_v57 = vmul.f32 0.5, %v2349_v41  ;;  %3453 = vperm.xlu1 %4059, %v3372_v25   ;;  %v2946_v53 = vrot.slane %v6398_v49, %v6142_v29  ;;  %vm7066_vm13 = vcmask 786112   ;;  %v3180_v8 = vmul.f32 10.0, %v3148_v32  ;;  %v2727_v32 = vpop.xlane.xlu0 %2726  ;;  %v6507_v25 = vpop.xlane.xlu1 %2087 }
 0x329   : > { %v3979_v3 = vadd.f32 -0.05, %v3052_v36  ;;  %vm6480_vm14 = vcmp.lt.f32.partialorder %v3037_v24, 0.1  ;;  %v2872_v62 = vrot.slane %v2724_v14, %v6384_v27  ;;  %v3964_v47 = vadd.f32 -0.05, %v3037_v24 }
 0x32a   : > { %v6485_v5 = vadd.f32 -0.05, %v2396_v17  ;;  %v3117_v56 = vmul.f32 0.5, %v3021_v63  ;;  %v3006_v9 = vsub.f32 %v2724_v14, %v5865_v6  ;;  %v3165_v35 = vmul.f32 10.0, %v3133_v0 }
 0x32b   : > { %v6488_v20 = vmul.f32 10.0, %v2492_v58  ;;  %v2206_v49 = vsel %vm7062_vm2, %v2204_v59, %v6376_v55  ;;  %v6494_v34 = vsub.f32 %v6435_v46, %v5862_v31  ;;  %v2477_v30 = vmul.f32 %v2445_v57, %v2349_v41 }
 0x32c   : > { %v6496_v22 = vadd.f32 -0.05, %v2381_v52  ;;  %v2947_v36 = vsel %vm7068_vm0, %v2946_v53, %v2942_v42  ;;  %v6500_v50 = vsub.f32 %v2040_v2, %v5851_v1  ;;  %v3053_v14 = vand.u32 2147483647, %v3021_v63 }
 0x32d   : > { %v2873_v24 = vsel %vm7062_vm2, %v2872_v62, %v2868_v61  ;;  %v2294_v40 = vrot.slane %v6435_v46, %v6384_v27  ;;  %v3244_v55 = vsel %vm6474_vm12, %v3180_v8, %v3979_v3  ;;  %vm6509_vm15 = vcmp.lt.f32.partialorder %v2396_v17, 0.1  ;;  %v7290_v3 = vld [vmem:[#allocation74_spill] sm:$0xff]  ;;  %v6541_v62 = vpop.xlane.xlu0 %2042 }
 0x32e   : > { %v3149_v42 = vmul.f32 %v3117_v56, %v3021_v63  ;;  %v3102_v0 = vmul.f32 0.5, %v3006_v9  ;;  %v2211_v58 = vrot.slane %v2040_v2, %v6389_v26  ;;  %v2588_v61 = vsel %vm6450_vm8, %v6429_v18, %v6425_v54 }
 0x32f   : > { %v2461_v46 = vmul.f32 0.5, %v6494_v34  ;;  %v3276_v59 = vadd.f32 %v3244_v55, %v2588_v61  ;;  %v2573_v48 = vsel %vm6457_vm10, %v2509_v23, %v6427_v10  ;;  %v3229_v17 = vsel %vm6480_vm14, %v3165_v35, %v3964_v47 }
 0x330   : > { %v2510_v57 = vmul.f32 10.0, %v2477_v30  ;;  %v3038_v63 = vand.u32 2147483647, %v3006_v9  ;;  %v2446_v53 = vmul.f32 0.5, %v6500_v50  ;;  %v3261_v2 = vadd.f32 %v3229_v17, %v2573_v48 }
 0x331   : > { %vm6525_vm12 = vcmp.lt.f32.partialorder %v2381_v52, 0.1  ;;  %vm6529_vm8 = vcmp.lt.f32.partialorder %v3053_v14, 0.1  ;;  %v3980_v18 = vadd.f32 -0.05, %v3053_v14  ;;  %v6534_v43 = vsel %vm7062_vm2, %v2294_v40, %v2290_v33 }
 0x332   : > { %v3388_v10 = vmul.f32 %v7279_v16, %v3276_v59  ;;  %v3134_v23 = vmul.f32 %v3102_v0, %v3006_v9  ;;  %v2397_v13 = vand.u32 2147483647, %v6494_v34  ;;  %v3373_v4 = vmul.f32 %v7290_v3, %v3261_v2  ;;  %v6548_v16 = vpop.xlane.xlu1 %2774  ;;  %v7301_v9 = vld [vmem:[#allocation75_spill] sm:$0xff] }
 0x333   : > { %v3022_v52 = vsub.f32 %v6472_v7, %v5875_v60  ;;  %v3181_v47 = vmul.f32 10.0, %v3149_v42  ;;  %v2493_v56 = vmul.f32 %v2461_v46, %v6494_v34  ;;  %v6545_v35 = vsel %vm7066_vm13, %v2211_v58, %v2206_v49 }
 0x334   : > { %3501 = vperm.xlu0 %4058, %v3388_v10   ;;  %v3007_v33 = vsub.f32 %v2727_v32, %v5865_v6  ;;  %vm6550_vm10 = vcmp.lt.f32.partialorder %v3038_v63, 0.1  ;;  %v2382_v30 = vand.u32 2147483647, %v6500_v50  ;;  %v2478_v14 = vmul.f32 %v2446_v53, %v6500_v50  ;;  %3456 = vperm.xlu1 %4059, %v3373_v4  }
 0x335   : > { %v6558_v34 = vsub.f32 %v6507_v25, %v5862_v31  ;;  %v3965_v49 = vadd.f32 -0.05, %v3038_v63  ;;  %v2951_v40 = vrot.slane %v6472_v7, %v6384_v27  ;;  %v2877_v55 = vrot.slane %v2727_v32, %v6389_v26 }
 0x336   : > { %vm7065_vm14 = vcmask 851712   ;;  %v6565_v42 = vsub.f32 %v6541_v62, %v5851_v1  ;;  %v3166_v0 = vmul.f32 10.0, %v3134_v23  ;;  %v6567_v58 = vadd.f32 -0.05, %v2397_v13  ;;  %v2091_v41 = vpop.xlane.xlu1 %2090 }
 0x337   : > { %v3054_v50 = vand.u32 2147483647, %v3022_v52  ;;  %v3118_v61 = vmul.f32 0.5, %v3022_v52  ;;  %v6569_v46 = vmul.f32 10.0, %v2493_v56  ;;  %v3103_v59 = vmul.f32 0.5, %v3007_v33  ;;  %v2730_v56 = vpop.xlane.xlu0 %2729 }
 0x338   : > { %v2589_v7 = vsel %vm6509_vm15, %v6488_v20, %v6485_v5  ;;  %v3245_v32 = vsel %vm6529_vm8, %v3181_v47, %v3980_v18  ;;  %v6577_v48 = vmul.f32 10.0, %v2478_v14  ;;  %v6579_v17 = vadd.f32 -0.05, %v2382_v30 }
 0x339   : > { %v2462_v63 = vmul.f32 0.5, %v6558_v34  ;;  %v3277_v53 = vadd.f32 %v3245_v32, %v2589_v7  ;;  %v2952_v2 = vsel %vm7062_vm2, %v2951_v40, %v2947_v36  ;;  %v2878_v10 = vsel %vm7066_vm13, %v2877_v55, %v2873_v24 }
 0x33a   : > { %v3039_v23 = vand.u32 2147483647, %v3007_v33  ;;  %v2447_v4 = vmul.f32 0.5, %v6565_v42  ;;  %vm6585_vm15 = vcmp.lt.f32.partialorder %v2397_v13, 0.1  ;;  %v3150_v54 = vmul.f32 %v3118_v61, %v3022_v52  ;;  %v2778_v32 = vpop.xlane.xlu1 %2777 }
 0x33b   : > { %vm6589_vm8 = vcmp.lt.f32.partialorder %v3054_v50, 0.1  ;;  %v3389_v18 = vmul.f32 %v7290_v3, %v3277_v53  ;;  %v2574_v36 = vsel %vm6525_vm12, %v2510_v57, %v6496_v22  ;;  %v3230_v24 = vsel %vm6550_vm10, %v3166_v0, %v3965_v49  ;;  %v2046_v7 = vpop.xlane.xlu0 %2045 }
 0x33c   : > { %vm6599_vm2 = vcmp.lt.f32.partialorder %v2382_v30, 0.1  ;;  %v3981_v13 = vadd.f32 -0.05, %v3054_v50  ;;  %v3135_v14 = vmul.f32 %v3103_v59, %v3007_v33  ;;  %v2299_v40 = vrot.slane %v6507_v25, %v6389_v26 }
 0x33d   : > { %v3262_v55 = vadd.f32 %v3230_v24, %v2574_v36  ;;  %v2398_v52 = vand.u32 2147483647, %v6558_v34  ;;  %v2494_v3 = vmul.f32 %v2462_v63, %v6558_v34  ;;  %v2218_v22 = vrot.slane %v6541_v62, %v6401_v51  ;;  %3504 = vperm.xlu0 %4058, %v3389_v18  }
 0x33e   : > { %v2383_v57 = vand.u32 2147483647, %v6565_v42  ;;  %vm6610_vm12 = vcmp.lt.f32.partialorder %v3039_v23, 0.1  ;;  %v2479_v33 = vmul.f32 %v2447_v4, %v6565_v42  ;;  %v2956_v25 = vrot.slane %v6548_v16, %v6389_v26  ;;  %v2094_v20 = vpop.xlane.xlu1 %2093 }
 0x33f   : > { %v3374_v30 = vmul.f32 %v7301_v9, %v3262_v55  ;;  %v3182_v49 = vmul.f32 10.0, %v3150_v54  ;;  %v3966_v0 = vadd.f32 -0.05, %v3039_v23  ;;  %v3023_v34 = vsub.f32 %v6548_v16, %v5875_v60 }
 0x340   : > { %v2882_v62 = vrot.slane %v2730_v56, %v6401_v51  ;;  %v3167_v50 = vmul.f32 10.0, %v3135_v14  ;;  %v2300_v61 = vsel %vm7066_vm13, %v2299_v40, %v6534_v43  ;;  %v3008_v59 = vsub.f32 %v2730_v56, %v5865_v6 }
 0x341   : > { %3459 = vperm.xlu1 %4059, %v3374_v30   ;;  %v6625_v42 = vsub.f32 %v2091_v41, %v5862_v31  ;;  %v6627_v63 = vmul.f32 10.0, %v2494_v3  ;;  %v6629_v53 = vadd.f32 -0.05, %v2398_v52  ;;  %v2220_v16 = vsel %vm7065_vm14, %v2218_v22, %v6545_v35 }
 0x342   : > { %v6633_v23 = vadd.f32 -0.05, %v2383_v57  ;;  %v6635_v4 = vmul.f32 10.0, %v2479_v33  ;;  %v2957_v43 = vsel %vm7066_vm13, %v2956_v25, %v2952_v2  ;;  %v2304_v56 = vrot.slane %v2091_v41, %v6401_v51 }
 0x343   : > { %v2221_v54 = vadd.s32 4294967192, %v7199_v44  ;;  %v3055_v18 = vand.u32 2147483647, %v3023_v34  ;;  %v3119_v36 = vmul.f32 0.5, %v3023_v34  ;;  %v6641_v24 = vsel %vm7065_vm14, %v2882_v62, %v2878_v10  ;;  %v7308_v62 = vld [vmem:[#allocation76_spill] sm:$0xff] }
 0x344   : > { %v6644_v14 = vsub.f32 %v2046_v7, %v5851_v1  ;;  %v3104_v40 = vmul.f32 0.5, %v3008_v59  ;;  %v2463_v35 = vmul.f32 0.5, %v6625_v42  ;;  %v2590_v2 = vsel %vm6585_vm15, %v6569_v46, %v6567_v58  ;;  %v2733_v46 = vpop.xlane.xlu0 %2732 }
 0x345   : > { %v3246_v41 = vsel %vm6589_vm8, %v3182_v49, %v3981_v13  ;;  %v6654_v55 = vsub.s32 %v2221_v54, %v7197_v45  ;;  %v2575_v10 = vsel %vm6599_vm2, %v6577_v48, %v6579_v17  ;;  %v3231_v22 = vsel %vm6610_vm12, %v3167_v50, %v3966_v0 }
 0x346   : > { %v3278_v3 = vadd.f32 %v3246_v41, %v2590_v2  ;;  %v3040_v33 = vand.u32 2147483647, %v3008_v59  ;;  %v2448_v30 = vmul.f32 0.5, %v6644_v14  ;;  %v3263_v5 = vadd.f32 %v3231_v22, %v2575_v10 }
 0x347   : > { %v3024_v58 = vsub.f32 %v2778_v32, %v5875_v60  ;;  %vm6664_vm10 = vcmp.lt.f32.partialorder %v2398_v52, 0.1  ;;  %v3151_v25 = vmul.f32 %v3119_v36, %v3023_v34  ;;  %v2305_v49 = vsel %vm7065_vm14, %v2304_v56, %v2300_v61 }
 0x348   : > { %v2399_v48 = vand.u32 2147483647, %v6625_v42  ;;  %v3390_v17 = vmul.f32 %v7301_v9, %v3278_v3  ;;  %vm6671_vm2 = vcmp.lt.f32.partialorder %v2383_v57, 0.1  ;;  %vm6675_vm15 = vcmp.lt.f32.partialorder %v3055_v18, 0.1  ;;  %v2049_v41 = vpop.xlane.xlu0 %2048  ;;  %v6696_v3 = vpop.xlane.xlu1 %2780 }
 0x349   : > { %v3982_v0 = vadd.f32 -0.05, %v3055_v18  ;;  %v3136_v52 = vmul.f32 %v3104_v40, %v3008_v59  ;;  %v3375_v50 = vmul.f32 %v7308_v62, %v3263_v5  ;;  %v2495_v34 = vmul.f32 %v2463_v35, %v6625_v42 }
 0x34a   : > { %v2225_v61 = vrot.slane %v2046_v7, %v6654_v55  ;;  %v2384_v56 = vand.u32 2147483647, %v6644_v14  ;;  %3507 = vperm.xlu0 %4058, %v3390_v17   ;;  %v2961_v57 = vrot.slane %v2778_v32, %v6401_v51  ;;  %vm6684_vm8 = vcmp.lt.f32.partialorder %v3040_v33, 0.1 }
 0x34b   : > { %vm7067_vm12 = vcmask 917312   ;;  %v2480_v54 = vmul.f32 %v2448_v30, %v6644_v14  ;;  %3462 = vperm.xlu1 %4059, %v3375_v50   ;;  %v3056_v59 = vand.u32 2147483647, %v3024_v58  ;;  %v3183_v18 = vmul.f32 10.0, %v3151_v25 }
 0x34c   : > { %v3967_v36 = vadd.f32 -0.05, %v3040_v33  ;;  %v3120_v40 = vmul.f32 0.5, %v3024_v58  ;;  %v3009_v42 = vsub.f32 %v2733_v46, %v5865_v6  ;;  %v3168_v7 = vmul.f32 10.0, %v3136_v52  ;;  %v2097_v47 = vpop.xlane.xlu1 %2096 }
 0x34d   : > { %v6690_v35 = vadd.f32 -0.05, %v2399_v48  ;;  %v6693_v2 = vsub.f32 %v2094_v20, %v5862_v31  ;;  %v2228_v32 = vadd.s32 4294967184, %v7199_v44  ;;  %v6698_v10 = vmul.f32 10.0, %v2495_v34 }
 0x34e   : > { %v2227_v14 = vsel %vm7067_vm12, %v2225_v61, %v2220_v16  ;;  %v6701_v22 = vadd.f32 -0.05, %v2384_v56  ;;  %v2962_v33 = vsel %vm7065_vm14, %v2961_v57, %v2957_v43  ;;  %v6704_v30 = vmul.f32 10.0, %v2480_v54 }
 0x34f   : > { %v6706_v5 = vadd.f32 -0.05, %v3056_v59  ;;  %v2887_v25 = vrot.slane %v2733_v46, %v6654_v55  ;;  %v2309_v17 = vrot.slane %v2094_v20, %v6654_v55  ;;  %v3152_v52 = vmul.f32 %v3120_v40, %v3024_v58 }
 0x350   : > { %v3041_v50 = vand.u32 2147483647, %v3009_v42  ;;  %v3105_v51 = vmul.f32 0.5, %v3009_v42  ;;  %v6711_v34 = vsub.f32 %v2049_v41, %v5851_v1  ;;  %v2464_v16 = vmul.f32 0.5, %v6693_v2 }
 0x351   : > { %v6715_v61 = vsub.s32 %v2228_v32, %v7197_v45  ;;  %v2591_v43 = vsel %vm6664_vm10, %v6627_v63, %v6629_v53  ;;  %v3247_v46 = vsel %vm6675_vm15, %v3183_v18, %v3982_v0  ;;  %v2576_v57 = vsel %vm6671_vm2, %v6635_v4, %v6633_v23  ;;  %v2736_v4 = vpop.xlane.xlu0 %2735 }
 0x352   : > { %v2449_v58 = vmul.f32 0.5, %v6711_v34  ;;  %v3279_v20 = vadd.f32 %v3247_v46, %v2591_v43  ;;  %v3232_v54 = vsel %vm6684_vm8, %v3168_v7, %v3967_v36  ;;  %vm6730_vm14 = vcmp.lt.f32.partialorder %v2399_v48, 0.1  ;;  %v7319_v7 = vld [vmem:[#allocation77_spill] sm:$0xff] }
 0x353   : > { %vm6734_vm13 = vcmp.lt.f32.partialorder %v3056_v59, 0.1  ;;  %v2888_v53 = vsel %vm7067_vm12, %v2887_v25, %v6641_v24  ;;  %v2310_v13 = vsel %vm7067_vm12, %v2309_v17, %v2305_v49  ;;  %v3264_v8 = vadd.f32 %v3232_v54, %v2576_v57  ;;  %v6773_v54 = vpop.xlane.xlu1 %2783 }
 0x354   : > { %v3025_v23 = vsub.f32 %v6696_v3, %v5875_v60  ;;  %v3184_v0 = vmul.f32 10.0, %v3152_v52  ;;  %v3137_v48 = vmul.f32 %v3105_v51, %v3009_v42  ;;  %v2400_v9 = vand.u32 2147483647, %v6693_v2 }
 0x355   : > { %v3391_v59 = vmul.f32 %v7308_v62, %v3279_v20  ;;  %vm6745_vm10 = vcmp.lt.f32.partialorder %v2384_v56, 0.1  ;;  %vm6749_vm2 = vcmp.lt.f32.partialorder %v3041_v50, 0.1  ;;  %v2496_v49 = vmul.f32 %v2464_v16, %v6693_v2  ;;  %v6771_v57 = vpop.xlane.xlu0 %2051 }
 0x356   : > { %vm2233_vm15 = vcmask 982912   ;;  %v2232_v36 = vrot.slane %v2049_v41, %v6715_v61  ;;  %v3376_v32 = vmul.f32 %v7319_v7, %v3264_v8  ;;  %v2385_v51 = vand.u32 2147483647, %v6711_v34 }
 0x357   : > { %v2481_v42 = vmul.f32 %v2449_v58, %v6711_v34  ;;  %3510 = vperm.xlu0 %4058, %v3391_v59   ;;  %v2966_v62 = vrot.slane %v6696_v3, %v6654_v55  ;;  %v3010_v56 = vsub.f32 %v2736_v4, %v5865_v6  ;;  %v3057_v25 = vand.u32 2147483647, %v3025_v23 }
 0x358   : > { %3465 = vperm.xlu1 %4059, %v3376_v32   ;;  %v3121_v17 = vmul.f32 0.5, %v3025_v23  ;;  %v2892_v2 = vrot.slane %v2736_v4, %v6715_v61  ;;  %v2369_v52 = vsub.f32 %v2097_v47, %v5862_v31  ;;  %v3169_v41 = vmul.f32 10.0, %v3137_v48 }
 0x359   : > { %v3968_v16 = vadd.f32 -0.05, %v3041_v50  ;;  %v6763_v43 = vadd.f32 -0.05, %v2400_v9  ;;  %v2314_v46 = vrot.slane %v2097_v47, %v6715_v61  ;;  %v6766_v34 = vmul.f32 10.0, %v2496_v49 }
 0x35a   : > { %v6769_v58 = vsel %vm2233_vm15, %v2232_v36, %v2227_v14  ;;  %v3106_v3 = vmul.f32 0.5, %v3010_v56  ;;  %v2465_v20 = vmul.f32 0.5, %v2369_v52  ;;  %v6775_v8 = vmul.f32 10.0, %v2481_v42 }
 0x35b   : > { %v6777_v4 = vadd.f32 -0.05, %v2385_v51  ;;  %v6780_v50 = vsel %vm7067_vm12, %v2966_v62, %v2962_v33  ;;  %v2235_v47 = vadd.s32 4294967176, %v7199_v44  ;;  %v3153_v48 = vmul.f32 %v3121_v17, %v3025_v23 }
 0x35c   : > { %v3984_v59 = vadd.f32 -0.05, %v3057_v25  ;;  %v6784_v14 = vsel %vm2233_vm15, %v2892_v2, %v2888_v53  ;;  %v3042_v49 = vand.u32 2147483647, %v3010_v56  ;;  %vm6786_vm8 = vcmp.lt.f32.partialorder %v3057_v25, 0.1 }
 0x35d   : > { %v6791_v32 = vsel %vm2233_vm15, %v2314_v46, %v2310_v13  ;;  %v2354_v42 = vsub.f32 %v6771_v57, %v5851_v1  ;;  %v2592_v44 = vsel %vm6730_vm14, %v6698_v10, %v6690_v35  ;;  %v3248_v33 = vsel %vm6734_vm13, %v3184_v0, %v6706_v5  ;;  %v7330_v2 = vld [vmem:[#allocation78_spill] sm:$0xff] }
 0x35e   : > { %vm6802_vm12 = vcmp.lt.f32.partialorder %v2400_v9, 0.1  ;;  %v3138_v23 = vmul.f32 %v3106_v3, %v3010_v56  ;;  %v2401_v62 = vand.u32 2147483647, %v2369_v52  ;;  %v2497_v13 = vmul.f32 %v2465_v20, %v2369_v52  ;;  %v6822_v9 = vpop.xlane.xlu0 %2738  ;;  %v6824_v56 = vpop.xlane.xlu1 %2099 }
 0x35f   : > { %v3280_v25 = vadd.f32 %v3248_v33, %v2592_v44  ;;  %v6807_v17 = vsub.s32 %v2235_v47, %v7197_v45  ;;  %v2450_v1 = vmul.f32 0.5, %v2354_v42  ;;  %v2577_v35 = vsel %vm6745_vm10, %v6704_v30, %v6701_v22 }
 0x360   : > { %v3233_v10 = vsel %vm6749_vm2, %v3169_v41, %v3968_v16  ;;  %vm6815_vm13 = vcmp.lt.f32.partialorder %v2385_v51, 0.1  ;;  %v2386_v40 = vand.u32 2147483647, %v2354_v42  ;;  %v3026_v45 = vsub.f32 %v6773_v54, %v5875_v60 }
 0x361   : > { %v3392_v63 = vmul.f32 %v7319_v7, %v3280_v25  ;;  %v3265_v0 = vadd.f32 %v3233_v10, %v2577_v35  ;;  %v3185_v18 = vmul.f32 10.0, %v3153_v48  ;;  %vm6826_vm14 = vcmp.lt.f32.partialorder %v3042_v49, 0.1 }
 0x362   : > { %v3969_v30 = vadd.f32 -0.05, %v3042_v49  ;;  %v2482_v24 = vmul.f32 %v2450_v1, %v2354_v42  ;;  %vm6830_vm10 = vcmp.lt.f32.partialorder %v2401_v62, 0.1  ;;  %v3951_v7 = vadd.f32 -0.05, %v2401_v62  ;;  %v2787_v1 = vpop.xlane.xlu1 %2786 }
 0x363   : > { %3513 = vperm.xlu0 %4058, %v3392_v63   ;;  %v3377_v52 = vmul.f32 %v7330_v2, %v3265_v0  ;;  %v3058_v41 = vand.u32 2147483647, %v3026_v45  ;;  %v3122_v16 = vmul.f32 0.5, %v3026_v45  ;;  %v3170_v46 = vmul.f32 10.0, %v3138_v23 }
 0x364   : > { %v2530_v3 = vmul.f32 10.0, %v2497_v13  ;;  %v3011_v20 = vsub.f32 %v6822_v9, %v5865_v6  ;;  %v2370_v47 = vsub.f32 %v6824_v56, %v5862_v31  ;;  %v2239_v48 = vrot.slane %v6771_v57, %v6807_v17 }
 0x365   : > { %vm6841_vm2 = vcmp.lt.f32.partialorder %v2386_v40, 0.1  ;;  %3468 = vperm.xlu1 %4059, %v3377_v52   ;;  %v2971_v42 = vrot.slane %v6773_v54, %v6715_v61  ;;  %v3154_v44 = vmul.f32 %v3122_v16, %v3026_v45  ;;  %vm2240_vm0 = vcmask 1048512  }
 0x366   : > { %v2515_v33 = vmul.f32 10.0, %v2482_v24  ;;  %v3936_v23 = vadd.f32 -0.05, %v2386_v40  ;;  %v3043_v62 = vand.u32 2147483647, %v3011_v20  ;;  %v3107_v6 = vmul.f32 0.5, %v3011_v20 }
 0x367   : > { %vm6847_vm5 = vcmp.lt.f32.partialorder %v3058_v41, 0.1  ;;  %v2319_v31 = vrot.slane %v6824_v56, %v6807_v17  ;;  %v2466_v57 = vmul.f32 0.5, %v2370_v47  ;;  %v3249_v25 = vsel %vm6786_vm8, %v3185_v18, %v3984_v59 }
 0x368   : > { %v3186_v35 = vmul.f32 10.0, %v3154_v44  ;;  %v3985_v54 = vadd.f32 -0.05, %v3058_v41  ;;  %v3139_v10 = vmul.f32 %v3107_v6, %v3011_v20  ;;  %v2593_v40 = vsel %vm6802_vm12, %v6766_v34, %v6763_v43  ;;  %v7338_v6 = vld [vmem:[#allocation80_spill] sm:$0xff] }
 0x369   : > { %vm6859_vm1 = vcmp.lt.f32.partialorder %v3043_v62, 0.1  ;;  %v2402_v0 = vand.u32 2147483647, %v2370_v47  ;;  %v2498_v45 = vmul.f32 %v2466_v57, %v2370_v47  ;;  %v3281_v56 = vadd.f32 %v3249_v25, %v2593_v40  ;;  %v3478_v25 = vpop.permute.xlu1 %3477 }
 0x36a   : > { %v3171_v24 = vmul.f32 10.0, %v3139_v10  ;;  %v2578_v59 = vsel %vm6815_vm13, %v6775_v8, %v6777_v4  ;;  %v3234_v36 = vsel %vm6826_vm14, %v3170_v46, %v3969_v30  ;;  %v3027_v53 = vsub.f32 %v2787_v1, %v5875_v60  ;;  %v7337_v4 = vld [vmem:[#allocation79_spill] sm:$0xff] }
 0x36b   : > { %v3970_v43 = vadd.f32 -0.05, %v3043_v62  ;;  %v3393_v34 = vmul.f32 %v7330_v2, %v3281_v56  ;;  %v3266_v18 = vadd.f32 %v3234_v36, %v2578_v59  ;;  %v2976_v52 = vrot.slane %v2787_v1, %v6807_v17  ;;  %v3430_v1 = vpop.permute.xlu0 %3429 }
 0x36c   : > { %v3059_v41 = vand.u32 2147483647, %v3027_v53  ;;  %v3123_v16 = vmul.f32 0.5, %v3027_v53  ;;  %v2594_v20 = vsel %vm6830_vm10, %v2530_v3, %v3951_v7  ;;  %v3250_v8 = vsel %vm6847_vm5, %v3186_v35, %v3985_v54 }
 0x36d   : > { %3516 = vperm.xlu0 %4058, %v3393_v34   ;;  %v3378_v5 = vmul.f32 %v7337_v4, %v3266_v18  ;;  %v3282_v22 = vadd.f32 %v3250_v8, %v2594_v20  ;;  %v2579_v60 = vsel %vm6841_vm2, %v2515_v33, %v3936_v23  ;;  %v3235_v30 = vsel %vm6859_vm1, %v3171_v24, %v3970_v43 }
 0x36e   : > { %v2897_v2 = vrot.slane %v6822_v9, %v6807_v17  ;;  %v2531_v51 = vmul.f32 10.0, %v2498_v45  ;;  %v3155_v7 = vmul.f32 %v3123_v16, %v3027_v53  ;;  %v3267_v46 = vadd.f32 %v3235_v30, %v2579_v60 }
 0x36f   : > { %v2972_v3 = vsel %vm2233_vm15, %v2971_v42, %v6780_v50  ;;  %v2320_v47 = vsel %vm2240_vm0, %v2319_v31, %v6791_v32  ;;  %v3952_v44 = vadd.f32 -0.05, %v2402_v0  ;;  %3471 = vperm.xlu1 %4059, %v3378_v5   ;;  %v3394_v49 = vmul.f32 %v7337_v4, %v3282_v22  ;;  %v3481_v35 = vpop.permute.xlu0 %3480 }
 0x370   : > { %v2977_v33 = vsel %vm2240_vm0, %v2976_v52, %v2972_v3  ;;  %v3187_v23 = vmul.f32 10.0, %v3155_v7  ;;  %v3986_v62 = vadd.f32 -0.05, %v3059_v41  ;;  %v3379_v13 = vmul.f32 %v7338_v6, %v3267_v46 }
 0x371   : > { %v2241_v9 = vsel %vm2240_vm0, %v2239_v48, %v6769_v58  ;;  %vm2434_vm1 = vcmp.lt.f32.partialorder %v2402_v0, 0.1  ;;  %vm3091_vm5 = vcmp.lt.f32.partialorder %v3059_v41, 0.1  ;;  %3519 = vperm.xlu0 %4058, %v3394_v49   ;;  %vm2321_vm12 = vcmask 1041409  }
 0x372   : > { %v2898_v50 = vsel %vm2240_vm0, %v2897_v2, %v6784_v14  ;;  %v2595_v32 = vsel %vm2434_vm1, %v2531_v51, %v3952_v44  ;;  %v3251_v42 = vsel %vm3091_vm5, %v3187_v23, %v3986_v62  ;;  %v2322_v31 = vsel %vm2321_vm12, %v2320_v47, %v2241_v9  ;;  %v3433_v14 = vpop.permute.xlu1 %3432 }
 0x373   : > { %3474 = vperm.xlu1 %4059, %v3379_v13   ;;  %v3283_v57 = vadd.f32 %v3251_v42, %v2595_v32  ;;  %2324 = vst [vmem:[%s6897_s1] sm:$0x3] %v2322_v31  ;;  %v2978_v58 = vsel %vm2321_vm12, %v2977_v33, %v2898_v50  ;;  %v3484_v10 = vpop.permute.xlu0 %3483  ;;  %v3531_v22 = vrot.slane %v3433_v14, %v5859_v11  ;;  %vm7346_vm8 = vcmask 720512  }
 0x374   : > { %3953 = vst [vmem:[%s6897_s1 + $0x2] sm:$0x3] %v2978_v58  ;;  %v3610_v60 = vrot.slane %v3481_v35, %v5859_v11  ;;  %v3615_v2 = vrot.slane %v3484_v10, %v5888_v21  ;;  %v3527_v51 = vrot.slane %v3430_v1, %v5856_v28  ;;  %v3606_v7 = vrot.slane %v3478_v25, %v5856_v28  ;;  %vm7347_vm13 = vmmov %vm7346_vm8 }
 0x375   : > { %v3395_v48 = vmul.f32 %v7338_v6, %v3283_v57  ;;  %vm7348_vm14 = vcmask 786112   ;;  %vm7350_vm2 = vcmask 851712   ;;  %vm7352_vm5 = vcmask 917312  }
 0x376   : > { %v3436_v54 = vpop.permute.xlu1 %3435  ;;  %v3532_v11 = vsel %vm2142_vm3, %v3531_v22, %v3527_v51  ;;  %v3611_v23 = vsel %vm2142_vm3, %v3610_v60, %v3606_v7  ;;  %vm7339_vm3 = vcmask 523712   ;;  %vm7349_vm10 = vmmov %vm7348_vm14 }
 0x377   : > { %3522 = vperm.xlu0 %4058, %v3395_v48   ;;  %v3487_v63 = vpop.permute.xlu0 %3486  ;;  %v3536_v30 = vrot.slane %v3436_v54, %v5888_v21  ;;  %v3616_v6 = vsel %vm2149_vm4, %v3615_v2, %v3611_v23  ;;  %vm7351_vm1 = vmmov %vm7350_vm2 }
 0x378   : > { %v3620_v3 = vrot.slane %v3487_v63, %v5891_v39 }
 0x379   : > { %v3537_v28 = vsel %vm2149_vm4, %v3536_v30, %v3532_v11  ;;  %vm7340_vm4 = vmmov %vm7339_vm3 }
 0x37a   : > { %v3439_v40 = vpop.permute.xlu1 %3438 }
 0x37b   : > { %v3541_v46 = vrot.slane %v3439_v40, %v5891_v39 }
 0x37c   : > { %v3490_v45 = vpop.permute.xlu0 %3489 }
 0x37d   : > { %v3625_v49 = vrot.slane %v3490_v45, %v5894_v12  ;;  %v3542_v9 = vsel %vm2156_vm7, %v3541_v46, %v3537_v28  ;;  %v3727_v28 = vld [vmem:[%s6897_s1] sm:$0x3] (%p4435_p1) }
 0x37e   : > { %v3442_v0 = vpop.permute.xlu1 %3441  ;;  %3728 = vst [vmem:[%s3710_s19] sm:$0x3] (%p4435_p1), %v3727_v28 }
 0x37f   : > { %v3546_v44 = vrot.slane %v3442_v0, %v5894_v12  ;;  %v3621_v12 = vsel %vm2156_vm7, %v3620_v3, %v3616_v6  ;;  %vm7341_vm7 = vcmask 589312   ;;  %v3729_v6 = vld [vmem:[%s6897_s1 + $0x2] sm:$0x3] (%p4435_p1) }
 0x380   : > { %3730 = vst [vmem:[%s3710_s19 + $0x8] sm:$0x3] (%p4435_p1), %v3729_v6 }
 0x381   : > { %v3547_v31 = vsel %vm2163_vm11, %v3546_v44, %v3542_v9 }
 0x382   : > { %v3445_v56 = vpop.permute.xlu1 %3444 }
 0x383   : > { %v3551_v21 = vrot.slane %v3445_v56, %v5897_v37 }
 0x38c   : > { %v3493_v24 = vpop.permute.xlu0 %3492 }
 0x38d   : > { %v3630_v62 = vrot.slane %v3493_v24, %v5897_v37  ;;  %v3626_v37 = vsel %vm2163_vm11, %v3625_v49, %v3621_v12  ;;  %vm7342_vm11 = vmmov %vm7341_vm7  ;;  %v7343_v24 = vld [vmem:[#allocation14_spill] sm:$0xff] }
 0x38f   : > { %v3448_v59 = vpop.permute.xlu1 %3447  ;;  %v3631_v25 = vsel %vm2170_vm6, %v3630_v62, %v3626_v37 }
 0x390   : > { %v3556_v39 = vrot.slane %v3448_v59, %v5902_v15 }
 0x392   : > { %v3496_v36 = vpop.permute.xlu0 %3495 }
 0x393   : > { %v3635_v13 = vrot.slane %v3496_v36, %v5902_v15  ;;  %v3552_v15 = vsel %vm2170_vm6, %v3551_v21, %v3547_v31  ;;  %vm7344_vm6 = vcmask 654912  }
 0x395   : > { %v3636_v35 = vsel %vm2177_vm9, %v3635_v13, %v3631_v25 }
 0x396   : > { %v3451_v53 = vpop.permute.xlu1 %3450 }
 0x397   : > { %v3561_v50 = vrot.slane %v3451_v53, %v5910_v38 }
 0x3a2   : > { %v3499_v43 = vpop.permute.xlu0 %3498 }
 0x3a3   : > { %v3454_v34 = vpop.permute.xlu1 %3453  ;;  %v3640_v32 = vrot.slane %v3499_v43, %v5910_v38  ;;  %v3557_v38 = vsel %vm2177_vm9, %v3556_v39, %v3552_v15  ;;  %vm7345_vm9 = vmmov %vm7344_vm6 }
 0x3a4   : > { %v3566_v57 = vrot.slane %v3454_v34, %v5915_v19  ;;  %v3562_v40 = vsel %vm7339_vm3, %v3561_v50, %v3557_v38  ;;  %vm7353_vm3 = vmmov %vm7352_vm5 }
 0x3a6   : > { %v3567_v56 = vsel %vm7341_vm7, %v3566_v57, %v3562_v40 }
 0x3af   : > { %v3502_v18 = vpop.permute.xlu0 %3501  ;;  %v3457_v52 = vpop.permute.xlu1 %3456 }
 0x3b0   : > { %v3645_v58 = vrot.slane %v3502_v18, %v5915_v19  ;;  %v3571_v1 = vrot.slane %v3457_v52, %v6142_v29  ;;  %v3641_v19 = vsel %vm7340_vm4, %v3640_v32, %v3636_v35  ;;  %vm3684_vm4 = vcmask 1041408  }
 0x3b8   : > { %v3505_v41 = vpop.permute.xlu0 %3504 }
 0x3b9   : > { %v3650_v14 = vrot.slane %v3505_v41, %v6142_v29  ;;  %v3646_v29 = vsel %vm7342_vm11, %v3645_v58, %v3641_v19 }
 0x3bb   : > { %v3651_v43 = vsel %vm7345_vm9, %v3650_v14, %v3646_v29 }
 0x3bc   : > { %v3460_v16 = vpop.permute.xlu1 %3459 }
 0x3bd   : > { %v3576_v54 = vrot.slane %v3460_v16, %v6384_v27 }
 0x3c5   : > { %v3508_v20 = vpop.permute.xlu0 %3507 }
 0x3c6   : > { %v3463_v8 = vpop.permute.xlu1 %3462  ;;  %v3655_v10 = vrot.slane %v3508_v20, %v6384_v27  ;;  %v3572_v27 = vsel %vm7344_vm6, %v3571_v1, %v3567_v56 }
 0x3c7   : > { %v3581_v63 = vrot.slane %v3463_v8, %v6389_v26 }
 0x3c8   : > { %v3656_v52 = vsel %vm7347_vm13, %v3655_v10, %v3651_v43 }
 0x3d2   : > { %v3511_v4 = vpop.permute.xlu0 %3510 }
 0x3d3   : > { %v3466_v5 = vpop.permute.xlu1 %3465  ;;  %v3660_v0 = vrot.slane %v3511_v4, %v6389_v26  ;;  %v3577_v26 = vsel %vm7346_vm8, %v3576_v54, %v3572_v27 }
 0x3d4   : > { %v3586_v59 = vrot.slane %v3466_v5, %v7343_v24  ;;  %v3582_v20 = vsel %vm7348_vm14, %v3581_v63, %v3577_v26 }
 0x3d5   : > { %v3661_v8 = vsel %vm7349_vm10, %v3660_v0, %v3656_v52 }
 0x3d6   : > { %v3587_v5 = vsel %vm7350_vm2, %v3586_v59, %v3582_v20 }
 0x3de   : > { %v3514_v47 = vpop.permute.xlu0 %3513 }
 0x3df   : > { %v3665_v36 = vrot.slane %v3514_v47, %v7343_v24 }
 0x3e0   : > { %v3469_v33 = vpop.permute.xlu1 %3468 }
 0x3e1   : > { %v3591_v34 = vrot.slane %v3469_v33, %v6654_v55  ;;  %v3666_v22 = vsel %vm7351_vm1, %v3665_v36, %v3661_v8 }
 0x3e8   : > { %v3517_v42 = vpop.permute.xlu0 %3516 }
 0x3e9   : > { %v3670_v18 = vrot.slane %v3517_v42, %v6654_v55  ;;  %v3592_v55 = vsel %vm7352_vm5, %v3591_v34, %v3587_v5 }
 0x3ea   : > { %v3472_v48 = vpop.permute.xlu1 %3471 }
 0x3eb   : > { %v3596_v41 = vrot.slane %v3472_v48, %v6715_v61  ;;  %v3671_v30 = vsel %vm7353_vm3, %v3670_v18, %v3666_v22 }
 0x3ec   : > { %v3520_v45 = vpop.permute.xlu0 %3519 }
 0x3ed   : > { %v3675_v16 = vrot.slane %v3520_v45, %v6715_v61  ;;  %v3597_v51 = vsel %vm2233_vm15, %v3596_v41, %v3592_v55 }
 0x3ee   : > { %v3475_v53 = vpop.permute.xlu1 %3474 }
 0x3ef   : > { %v3601_v4 = vrot.slane %v3475_v53, %v6807_v17  ;;  %v3676_v61 = vsel %vm2233_vm15, %v3675_v16, %v3671_v30  ;;  %vm3697_vm15 = vcmask 0  }
 0x3f1   : > { %v3602_v7 = vsel %vm2240_vm0, %v3601_v4, %v3597_v51 }
 0x3f2   : > { %v3523_v60 = vpop.permute.xlu0 %3522 }
 0x3f3   : > { %v3680_v2 = vrot.slane %v3523_v60, %v6807_v17 }
 0x3f5   : > { %v3681_v46 = vsel %vm2240_vm0, %v3680_v2, %v3676_v61 }
 0x3f6   : > { %v3682_v3 = vsel %vm2321_vm12, %v3681_v46, %v3602_v7 }
 0x3f7   : > { %v3685_v47 = vsel %vm3684_vm4, %v3682_v3, 0.0 }
 0x3f8   : > { %3686 = vadd.xlane.f32.xlu1 %v3685_v47 }
 0x481   : > { %v3687_v44 = vpop.xlane.xlu1 %3686 }
 0x482   : > { %v3688_v49 = vrot.slane %v3687_v44, 4 }
 0x484   : > { %v3689_v33 = vadd.f32 %v3688_v49, %v3687_v44 }
 0x486   : > { %v3690_v11 = vrot.slane %v3689_v33, 2 }
 0x488   : > { %v3691_v17 = vadd.f32 %v3690_v11, %v3689_v33 }
 0x48a   : > { %v3692_v23 = vrot.slane %v3691_v17, 1 }
 0x48c   : > { %v3693_v21 = vadd.f32 %v3692_v23, %v3691_v17 }
 0x48e   : > { %4028 = vpush %v3693_v21 }
 0x4bd   : > { %3708 = sbr.rel (!%p4435_p1) target bundleno = 1218 (0x4c2), region = 86 }
 0x4bf   : > { %s4029_s14 = spop %4028 }
 0x4c0   : > { %v3695_v62 = vstv %s4029_s14 }
 0x4c1   : > { %3698 = vst.msk [vmem:[%s606_s0] sm:$0x1] %vm3697_vm15, %v3695_v62 }
 0x4c2 PF: > { %p25_p9 = scmp.ge.s32.totalorder %s4419_s13, 6   ;;  %s7354_s1 = smov %s4344_s10 }
 0x4c3   : > { %s7355_s10 = smov %s4429_s16  ;;  %s7356_s11 = smov %s4419_s13 }
 0x4c4   :  { %27 = sbr.rel (!%p25_p9) target bundleno = 27 (0x1b), region = 178 }

</bundles_post_ra>
